<compile_context>
chip_gen: v7x
topology: tpu7x:2x2x1
jax: 0.10.0
libtpu: 0.0.40
codegen_flags: <defaults>
</compile_context>

<pallas_src>
import functools

import jax
import jax.numpy as jnp
from jax import lax
from jax.experimental import pallas as pl
from jax.experimental.pallas import tpu as pltpu

NEG_SLOPE = 0.2
BN_EPS = 1e-5


def _lrelu(y):
    return jnp.where(y > 0, y, NEG_SLOPE * y)


# ------------- Kernel A: conv2 (+bias) + partial BatchNorm2d stats -----------
# x_ref holds the phase-split conv1 output flattened over (batch, u, v):
#   row p = n*hq*wq + u*wq + v,  channel (2r+c)*Cin + ci = y1_pad[n, 2u+r, 2v+c, ci]
# Output row p (for u<ho, v<wo) is conv2 output pixel (n, u, v); each 2x2 tap
# (ta, tb) contributes a contiguous row-slab matmul at offset ta*wq + tb.

def _conv2_kernel(rows, cin4, wq, x_ref, w_ref, b_ref, mask_ref,
                  o_ref, sum_ref, ssq_ref):
    # x_ref:    (rows + pad, 4*Cin)  bf16
    # w_ref:    (16*Cin, Cout)       bf16   (rows ordered (ta, tb, r, c, ci))
    # b_ref:    (1, Cout)            f32
    # mask_ref: (rows, 1)            f32    (1.0 on valid output rows)
    # o_ref:    (rows, Cout)         f32    (lane-dense)
    # sum_ref / ssq_ref: (1, Cout)   f32    (BN2 partial stats, valid rows only)
    cout = w_ref.shape[1]
    acc = jnp.zeros((rows, cout), jnp.float32)
    for ta in (0, 1):                       # 4 accumulating MXU dots, K = 4*Cin
        for tb in (0, 1):
            t = 2 * ta + tb
            off = ta * wq + tb
            acc = acc + jnp.dot(x_ref[off:off + rows, :],
                                w_ref[t * cin4:(t + 1) * cin4, :],
                                preferred_element_type=jnp.float32)
    y = acc + b_ref[...]
    o_ref[...] = y
    ym = y * mask_ref[...]
    sum_ref[...] = jnp.sum(ym, axis=0, keepdims=True)
    ssq_ref[...] = jnp.sum(ym * y, axis=0, keepdims=True)


def conv2_pallas(xflat, w2mat_bf16, b2, mask, rows, cin4, wq):
    rin = xflat.shape[0]
    k, cout = w2mat_bf16.shape
    kern = functools.partial(_conv2_kernel, rows, cin4, wq)
    return pl.pallas_call(
        kern,
        out_shape=(jax.ShapeDtypeStruct((rows, cout), jnp.float32),
                   jax.ShapeDtypeStruct((1, cout), jnp.float32),
                   jax.ShapeDtypeStruct((1, cout), jnp.float32)),
        grid=(1,),
        in_specs=[
            pl.BlockSpec((rin, cin4), lambda i: (0, 0)),
            pl.BlockSpec((k, cout), lambda i: (0, 0)),
            pl.BlockSpec((1, cout), lambda i: (0, 0)),
            pl.BlockSpec((rows, 1), lambda i: (0, 0)),
        ],
        out_specs=(pl.BlockSpec((rows, cout), lambda i: (0, 0)),
                   pl.BlockSpec((1, cout), lambda i: (0, 0)),
                   pl.BlockSpec((1, cout), lambda i: (0, 0))),
        compiler_params=pltpu.CompilerParams(
            dimension_semantics=("arbitrary",)),
    )(xflat, w2mat_bf16, b2.reshape(1, cout), mask)


# -- Kernel B: [BN2-normalize + LeakyReLU] -> fc matmul -> BN1d + LeakyReLU ---
# Single full-K block per output tile (no accumulator); grid over output tiles
# only ("parallel" -> both TCs on v7x).  Each tile sees the full batch, so the
# per-feature BN1d batch statistics are exact.

def _fc_kernel(x_ref, mu_ref, sc_ref, sh_ref, w_ref, b_ref, g_ref, be_ref,
               o_ref):
    a = _lrelu((x_ref[...] - mu_ref[...]) * sc_ref[...] + sh_ref[...])
    y = jnp.dot(a.astype(jnp.bfloat16), w_ref[...],
                preferred_element_type=jnp.float32) + b_ref[...]
    mean = jnp.mean(y, axis=0, keepdims=True)                    # over batch
    var = jnp.mean(jnp.square(y - mean), axis=0, keepdims=True)  # biased
    y_hat = (y - mean) * lax.rsqrt(var + BN_EPS)
    o_ref[...] = _lrelu(y_hat * g_ref[...] + be_ref[...]).astype(o_ref.dtype)


def fc_pallas(flat, mu_vec, sc_vec, sh_vec, w3mat_bf16, b3, g3, be3, tn=512):
    n, kdim = flat.shape
    nout = w3mat_bf16.shape[1]
    if nout % tn != 0:
        tn = nout
    grid = (nout // tn,)
    return pl.pallas_call(
        _fc_kernel,
        out_shape=jax.ShapeDtypeStruct((n, nout), jnp.float32),
        grid=grid,
        in_specs=[
            pl.BlockSpec((n, kdim), lambda j: (0, 0)),
            pl.BlockSpec((1, kdim), lambda j: (0, 0)),
            pl.BlockSpec((1, kdim), lambda j: (0, 0)),
            pl.BlockSpec((1, kdim), lambda j: (0, 0)),
            pl.BlockSpec((kdim, tn), lambda j: (0, j)),
            pl.BlockSpec((1, tn), lambda j: (0, j)),
            pl.BlockSpec((1, tn), lambda j: (0, j)),
            pl.BlockSpec((1, tn), lambda j: (0, j)),
        ],
        out_specs=pl.BlockSpec((n, tn), lambda j: (0, j)),
        compiler_params=pltpu.CompilerParams(
            dimension_semantics=("parallel",)),
    )(flat, mu_vec, sc_vec, sh_vec, w3mat_bf16,
      b3.reshape(1, nout), g3.reshape(1, nout), be3.reshape(1, nout))


# ---------------------- parameter preprocessing (hoisted) --------------------

def preprocess_params(raw_params, input_size):
    """Done ONCE outside the jitted forward: weight reorders + bf16 casts."""
    (w1, b1, w2, b2, g2, be2, w3, b3, g3, be3) = raw_params
    ho = wo = input_size // 4
    cout2, c1 = w2.shape[0], w2.shape[1]                  # 128, 64

    w1_hwio = jnp.transpose(w1, (2, 3, 1, 0))             # torch OIHW -> HWIO

    # conv2 weight -> (16*Cin, Cout); row order (ta, tb, r, c, ci), matching
    # the phase-split channel order (2r+c)*Cin+ci with kh=2ta+r, kw=2tb+c.
    w2r = w2.reshape(cout2, c1, 2, 2, 2, 2)               # (o, ci, ta, r, tb, c)
    w2mat = jnp.transpose(w2r, (2, 4, 3, 5, 1, 0)).reshape(16 * c1, cout2)
    w2mat = w2mat.astype(jnp.bfloat16)

    # fc weight: fold the PyTorch NCHW .view() flatten into the weight (input
    # dim reordered from (ch, i, j) to (i, j, ch)), cast to bf16 once.
    nout = w3.shape[0]
    w3r = w3.reshape(nout, cout2, ho, wo)                 # (o, ch, i, j)
    w3mat = jnp.transpose(w3r, (2, 3, 1, 0)).reshape(ho * wo * cout2, nout)
    w3mat = w3mat.astype(jnp.bfloat16)

    return (w1_hwio, b1, w2mat, b2, g2, be2, w3mat, b3, g3, be3)


# ------------------------------- forward -------------------------------------

def front_end_forward(x_nchw, prep):
    (w1_hwio, b1, w2mat, b2, g2, be2, w3mat, b3, g3, be3) = prep
    n, _, s, _ = x_nchw.shape
    ho = wo = s // 4                 # conv2 output spatial
    hq, wq = ho + 1, wo + 1          # phase-split grid
    cout2 = w2mat.shape[1]
    cin4 = w2mat.shape[0] // 4       # 4 * conv1 output channels

    x = jnp.transpose(x_nchw, (0, 2, 3, 1))                     # NCHW -> NHWC

    # conv1 + LeakyReLU: negligible FLOPs -> XLA conv (per perf review).
    y1 = lax.conv_general_dilated(
        x, w1_hwio, window_strides=(2, 2), padding=((1, 1), (1, 1)),
        dimension_numbers=("NHWC", "HWIO", "NHWC"))
    y1 = _lrelu(y1 + b1.reshape(1, 1, 1, -1))                   # (N, S/2, S/2, 64)

    # Phase split (space-to-depth of the zero-padded conv1 output) as one
    # reshape+transpose, fused with the bf16 cast.
    y1p = jnp.pad(y1, ((0, 0), (1, 1), (1, 1), (0, 0)))
    xq = jnp.transpose(
        y1p.reshape(n, hq, 2, wq, 2, y1.shape[-1]),
        (0, 1, 3, 2, 4, 5)).reshape(n, hq, wq, cin4).astype(jnp.bfloat16)

    # Flatten (batch, u, v) so each conv2 tap is one contiguous 2-D row slab.
    # Rows with u==ho or v==wo are over-computed garbage: masked out of the BN
    # stats in-kernel and stripped below (tiny XLA slice).
    rows = n * hq * wq
    xflat = jnp.pad(xq.reshape(rows, cin4), ((0, wq + 1), (0, 0)))

    uu = jnp.arange(hq * wq) // wq
    vv = jnp.arange(hq * wq) % wq
    mask = jnp.tile(((uu < ho) & (vv < wo)).astype(jnp.float32),
                    n).reshape(rows, 1)

    y2, s1, s2 = conv2_pallas(xflat, w2mat, b2, mask, rows, cin4, wq)

    # BatchNorm2d batch statistics from the kernel's partial sums.
    count = float(n * ho * wo)
    mean2 = s1[0] / count
    var2 = jnp.maximum(s2[0] / count - mean2 * mean2, 0.0)      # biased variance
    scale2 = g2 * lax.rsqrt(var2 + BN_EPS)

    # Strip over-computed rows; flatten to fc input (NHWC order; the NCHW
    # .view() permutation already lives in w3mat).
    fc_in = ho * wo * cout2
    flat = y2.reshape(n, hq, wq, cout2)[:, :ho, :wo, :].reshape(n, fc_in)
    mu_vec = jnp.tile(mean2, ho * wo).reshape(1, fc_in)
    sc_vec = jnp.tile(scale2, ho * wo).reshape(1, fc_in)
    sh_vec = jnp.tile(be2, ho * wo).reshape(1, fc_in)

    return fc_pallas(flat, mu_vec, sc_vec, sh_vec, w3mat, b3, g3, be3)


# --------------------------------- main ---------------------------------------

if __name__ == "__main__":
    N, C_IN, S = 2, 1, 16          # small shapes: input_dim=1, input_size=16
    key = jax.random.PRNGKey(0)
    keys = jax.random.split(key, 6)

    x = jax.random.normal(keys[0], (N, C_IN, S, S), jnp.float32)   # NCHW

    # Deterministic "initialize_weights"-style params (normal(0, 0.02) weights,
    # zero biases, BN gamma ~ normal(1, 0.02), beta = 0).
    w1 = 0.02 * jax.random.normal(keys[1], (64, C_IN, 4, 4), jnp.float32)
    b1 = jnp.zeros((64,), jnp.float32)
    w2 = 0.02 * jax.random.normal(keys[2], (128, 64, 4, 4), jnp.float32)
    b2 = jnp.zeros((128,), jnp.float32)
    g2 = 1.0 + 0.02 * jax.random.normal(keys[3], (128,), jnp.float32)
    be2 = jnp.zeros((128,), jnp.float32)
    fc_in = 128 * (S // 4) * (S // 4)
    w3 = 0.02 * jax.random.normal(keys[4], (1024, fc_in), jnp.float32)  # torch (out, in)
    b3 = jnp.zeros((1024,), jnp.float32)
    g3 = 1.0 + 0.02 * jax.random.normal(keys[5], (1024,), jnp.float32)
    be3 = jnp.zeros((1024,), jnp.float32)

    raw_params = (w1, b1, w2, b2, g2, be2, w3, b3, g3, be3)
    prep = preprocess_params(raw_params, input_size=S)   # hoisted out of jit

    out = jax.jit(front_end_forward)(x, prep)
    out = jax.block_until_ready(out)
    assert out.shape == (N, 1024), out.shape
    assert out.dtype == jnp.float32
    assert bool(jnp.all(jnp.isfinite(out)))
    print("KERNEL_OK")
</pallas_src>

<mosaic_0001>
module attributes {stable_mosaic.version = 11 : i64} {
  func.func @_conv2_kernel(%arg0: i32, %arg1: memref<56x256xbf16, #tpu.memory_space<vmem>>, %arg2: memref<1024x128xbf16, #tpu.memory_space<vmem>>, %arg3: memref<1x128xf32, #tpu.memory_space<vmem>>, %arg4: memref<50x1xf32, #tpu.memory_space<vmem>>, %arg5: memref<50x128xf32, #tpu.memory_space<vmem>>, %arg6: memref<1x128xf32, #tpu.memory_space<vmem>>, %arg7: memref<1x128xf32, #tpu.memory_space<vmem>>) attributes {dimension_semantics = [#tpu.dimension_semantics<arbitrary>], iteration_bounds = array<i64: 1>, scalar_prefetch = 0 : i64, scratch_operands = 0 : i64, tpu.core_type = #tpu.core_type<tc>, window_params = [{pipeline_mode = #tpu.pipeline_mode<synchronous>, transform_indices = @transform_0, window_bounds = array<i64: 56, 256>}, {pipeline_mode = #tpu.pipeline_mode<synchronous>, transform_indices = @transform_1, window_bounds = array<i64: 1024, 128>}, {pipeline_mode = #tpu.pipeline_mode<synchronous>, transform_indices = @transform_2, window_bounds = array<i64: 1, 128>}, {pipeline_mode = #tpu.pipeline_mode<synchronous>, transform_indices = @transform_3, window_bounds = array<i64: 50, 1>}, {pipeline_mode = #tpu.pipeline_mode<synchronous>, transform_indices = @transform_4, window_bounds = array<i64: 50, 128>}, {pipeline_mode = #tpu.pipeline_mode<synchronous>, transform_indices = @transform_5, window_bounds = array<i64: 1, 128>}, {pipeline_mode = #tpu.pipeline_mode<synchronous>, transform_indices = @transform_6, window_bounds = array<i64: 1, 128>}]} {
    %cst = arith.constant 0.000000e+00 : f32
    %0 = vector.broadcast %cst : f32 to vector<50x128xf32>
    %c0 = arith.constant 0 : index
    %c0_0 = arith.constant 0 : index
    %1 = vector.load %arg1[%c0, %c0_0] : memref<56x256xbf16, #tpu.memory_space<vmem>>, vector<50x256xbf16>
    %c0_1 = arith.constant 0 : index
    %c0_2 = arith.constant 0 : index
    %2 = vector.load %arg2[%c0_1, %c0_2] : memref<1024x128xbf16, #tpu.memory_space<vmem>>, vector<256x128xbf16>
    %cst_3 = arith.constant dense<0.000000e+00> : vector<50x128xf32>
    %3 = tpu.matmul %1, %2, %cst_3 {dimension_numbers = #tpu.dot_dimension_numbers<[1], [0], [0], [1], [0, 0, 1, 1], [], []>} : vector<50x256xbf16>, vector<256x128xbf16>, vector<50x128xf32> -> vector<50x128xf32>
    %4 = arith.addf %0, %3 : vector<50x128xf32>
    %c1 = arith.constant 1 : index
    %c0_4 = arith.constant 0 : index
    %5 = vector.load %arg1[%c1, %c0_4] : memref<56x256xbf16, #tpu.memory_space<vmem>>, vector<50x256xbf16>
    %c256 = arith.constant 256 : index
    %c0_5 = arith.constant 0 : index
    %6 = vector.load %arg2[%c256, %c0_5] : memref<1024x128xbf16, #tpu.memory_space<vmem>>, vector<256x128xbf16>
    %cst_6 = arith.constant dense<0.000000e+00> : vector<50x128xf32>
    %7 = tpu.matmul %5, %6, %cst_6 {dimension_numbers = #tpu.dot_dimension_numbers<[1], [0], [0], [1], [0, 0, 1, 1], [], []>} : vector<50x256xbf16>, vector<256x128xbf16>, vector<50x128xf32> -> vector<50x128xf32>
    %8 = arith.addf %4, %7 : vector<50x128xf32>
    %c5 = arith.constant 5 : index
    %c0_7 = arith.constant 0 : index
    %9 = vector.load %arg1[%c5, %c0_7] : memref<56x256xbf16, #tpu.memory_space<vmem>>, vector<50x256xbf16>
    %c512 = arith.constant 512 : index
    %c0_8 = arith.constant 0 : index
    %10 = vector.load %arg2[%c512, %c0_8] : memref<1024x128xbf16, #tpu.memory_space<vmem>>, vector<256x128xbf16>
    %cst_9 = arith.constant dense<0.000000e+00> : vector<50x128xf32>
    %11 = tpu.matmul %9, %10, %cst_9 {dimension_numbers = #tpu.dot_dimension_numbers<[1], [0], [0], [1], [0, 0, 1, 1], [], []>} : vector<50x256xbf16>, vector<256x128xbf16>, vector<50x128xf32> -> vector<50x128xf32>
    %12 = arith.addf %8, %11 : vector<50x128xf32>
    %c6 = arith.constant 6 : index
    %c0_10 = arith.constant 0 : index
    %13 = vector.load %arg1[%c6, %c0_10] : memref<56x256xbf16, #tpu.memory_space<vmem>>, vector<50x256xbf16>
    %c768 = arith.constant 768 : index
    %c0_11 = arith.constant 0 : index
    %14 = vector.load %arg2[%c768, %c0_11] : memref<1024x128xbf16, #tpu.memory_space<vmem>>, vector<256x128xbf16>
    %cst_12 = arith.constant dense<0.000000e+00> : vector<50x128xf32>
    %15 = tpu.matmul %13, %14, %cst_12 {dimension_numbers = #tpu.dot_dimension_numbers<[1], [0], [0], [1], [0, 0, 1, 1], [], []>} : vector<50x256xbf16>, vector<256x128xbf16>, vector<50x128xf32> -> vector<50x128xf32>
    %16 = arith.addf %12, %15 : vector<50x128xf32>
    %c0_13 = arith.constant 0 : index
    %c0_14 = arith.constant 0 : index
    %17 = vector.load %arg3[%c0_13, %c0_14] : memref<1x128xf32, #tpu.memory_space<vmem>>, vector<1x128xf32>
    %18 = vector.broadcast %17 : vector<1x128xf32> to vector<50x128xf32>
    %19 = arith.addf %16, %18 : vector<50x128xf32>
    %c0_15 = arith.constant 0 : index
    %c0_16 = arith.constant 0 : index
    %20 = vector.load %arg5[%c0_15, %c0_16] : memref<50x128xf32, #tpu.memory_space<vmem>>, vector<50x128xf32>
    tpu.vector_store %arg5[%c0_15, %c0_16], %19 {strides = array<i32>} : memref<50x128xf32, #tpu.memory_space<vmem>>, vector<50x128xf32>,
    %c0_17 = arith.constant 0 : index
    %c0_18 = arith.constant 0 : index
    %21 = vector.load %arg4[%c0_17, %c0_18] : memref<50x1xf32, #tpu.memory_space<vmem>>, vector<50x1xf32>
    %22 = vector.broadcast %21 : vector<50x1xf32> to vector<50x128xf32>
    %23 = arith.mulf %19, %22 : vector<50x128xf32>
    %cst_19 = arith.constant dense<0.000000e+00> : vector<128xf32>
    %24 = vector.multi_reduction <add>, %23, %cst_19 [0] : vector<50x128xf32> to vector<128xf32>
    %25 = vector.shape_cast %24 : vector<128xf32> to vector<1x128xf32>
    %c0_20 = arith.constant 0 : index
    %c0_21 = arith.constant 0 : index
    %26 = vector.load %arg6[%c0_20, %c0_21] : memref<1x128xf32, #tpu.memory_space<vmem>>, vector<1x128xf32>
    tpu.vector_store %arg6[%c0_20, %c0_21], %25 {strides = array<i32>} : memref<1x128xf32, #tpu.memory_space<vmem>>, vector<1x128xf32>,
    %27 = arith.mulf %23, %19 : vector<50x128xf32>
    %cst_22 = arith.constant dense<0.000000e+00> : vector<128xf32>
    %28 = vector.multi_reduction <add>, %27, %cst_22 [0] : vector<50x128xf32> to vector<128xf32>
    %29 = vector.shape_cast %28 : vector<128xf32> to vector<1x128xf32>
    %c0_23 = arith.constant 0 : index
    %c0_24 = arith.constant 0 : index
    %30 = vector.load %arg7[%c0_23, %c0_24] : memref<1x128xf32, #tpu.memory_space<vmem>>, vector<1x128xf32>
    tpu.vector_store %arg7[%c0_23, %c0_24], %29 {strides = array<i32>} : memref<1x128xf32, #tpu.memory_space<vmem>>, vector<1x128xf32>,
    return
  }
  func.func @transform_0(%arg0: i32) -> (i32, i32) {
    %c0_i32 = arith.constant 0 : i32
    %c0_i32_0 = arith.constant 0 : i32
    %c0_i32_1 = arith.constant 0 : i32
    return %c0_i32, %c0_i32_0 : i32, i32
  }
  func.func @transform_1(%arg0: i32) -> (i32, i32) {
    %c0_i32 = arith.constant 0 : i32
    %c0_i32_0 = arith.constant 0 : i32
    %c0_i32_1 = arith.constant 0 : i32
    return %c0_i32, %c0_i32_0 : i32, i32
  }
  func.func @transform_2(%arg0: i32) -> (i32, i32) {
    %c0_i32 = arith.constant 0 : i32
    %c0_i32_0 = arith.constant 0 : i32
    %c0_i32_1 = arith.constant 0 : i32
    return %c0_i32, %c0_i32_0 : i32, i32
  }
  func.func @transform_3(%arg0: i32) -> (i32, i32) {
    %c0_i32 = arith.constant 0 : i32
    %c0_i32_0 = arith.constant 0 : i32
    %c0_i32_1 = arith.constant 0 : i32
    return %c0_i32, %c0_i32_0 : i32, i32
  }
  func.func @transform_4(%arg0: i32) -> (i32, i32) {
    %c0_i32 = arith.constant 0 : i32
    %c0_i32_0 = arith.constant 0 : i32
    %c0_i32_1 = arith.constant 0 : i32
    return %c0_i32, %c0_i32_0 : i32, i32
  }
  func.func @transform_5(%arg0: i32) -> (i32, i32) {
    %c0_i32 = arith.constant 0 : i32
    %c0_i32_0 = arith.constant 0 : i32
    %c0_i32_1 = arith.constant 0 : i32
    return %c0_i32, %c0_i32_0 : i32, i32
  }
  func.func @transform_6(%arg0: i32) -> (i32, i32) {
    %c0_i32 = arith.constant 0 : i32
    %c0_i32_0 = arith.constant 0 : i32
    %c0_i32_1 = arith.constant 0 : i32
    return %c0_i32, %c0_i32_0 : i32, i32
  }
}

module attributes {stable_mosaic.version = 11 : i64} {
  func.func @_fc_kernel(%arg0: i32, %arg1: memref<2x2048xf32, #tpu.memory_space<vmem>>, %arg2: memref<1x2048xf32, #tpu.memory_space<vmem>>, %arg3: memref<1x2048xf32, #tpu.memory_space<vmem>>, %arg4: memref<1x2048xf32, #tpu.memory_space<vmem>>, %arg5: memref<2048x512xbf16, #tpu.memory_space<vmem>>, %arg6: memref<1x512xf32, #tpu.memory_space<vmem>>, %arg7: memref<1x512xf32, #tpu.memory_space<vmem>>, %arg8: memref<1x512xf32, #tpu.memory_space<vmem>>, %arg9: memref<2x512xf32, #tpu.memory_space<vmem>>) attributes {dimension_semantics = [#tpu.dimension_semantics<parallel>], iteration_bounds = array<i64: 2>, scalar_prefetch = 0 : i64, scratch_operands = 0 : i64, tpu.core_type = #tpu.core_type<tc>, window_params = [{pipeline_mode = #tpu.pipeline_mode<synchronous>, transform_indices = @transform_0, window_bounds = array<i64: 2, 2048>}, {pipeline_mode = #tpu.pipeline_mode<synchronous>, transform_indices = @transform_1, window_bounds = array<i64: 1, 2048>}, {pipeline_mode = #tpu.pipeline_mode<synchronous>, transform_indices = @transform_2, window_bounds = array<i64: 1, 2048>}, {pipeline_mode = #tpu.pipeline_mode<synchronous>, transform_indices = @transform_3, window_bounds = array<i64: 1, 2048>}, {transform_indices = @transform_4, window_bounds = array<i64: 2048, 512>}, {transform_indices = @transform_5, window_bounds = array<i64: 1, 512>}, {transform_indices = @transform_6, window_bounds = array<i64: 1, 512>}, {transform_indices = @transform_7, window_bounds = array<i64: 1, 512>}, {transform_indices = @transform_8, window_bounds = array<i64: 2, 512>}]} {
    %c0 = arith.constant 0 : index
    %c0_0 = arith.constant 0 : index
    %0 = vector.load %arg1[%c0, %c0_0] : memref<2x2048xf32, #tpu.memory_space<vmem>>, vector<2x2048xf32>
    %c0_1 = arith.constant 0 : index
    %c0_2 = arith.constant 0 : index
    %1 = vector.load %arg2[%c0_1, %c0_2] : memref<1x2048xf32, #tpu.memory_space<vmem>>, vector<1x2048xf32>
    %2 = vector.broadcast %1 : vector<1x2048xf32> to vector<2x2048xf32>
    %3 = arith.subf %0, %2 : vector<2x2048xf32>
    %c0_3 = arith.constant 0 : index
    %c0_4 = arith.constant 0 : index
    %4 = vector.load %arg3[%c0_3, %c0_4] : memref<1x2048xf32, #tpu.memory_space<vmem>>, vector<1x2048xf32>
    %5 = vector.broadcast %4 : vector<1x2048xf32> to vector<2x2048xf32>
    %6 = arith.mulf %3, %5 : vector<2x2048xf32>
    %c0_5 = arith.constant 0 : index
    %c0_6 = arith.constant 0 : index
    %7 = vector.load %arg4[%c0_5, %c0_6] : memref<1x2048xf32, #tpu.memory_space<vmem>>, vector<1x2048xf32>
    %8 = vector.broadcast %7 : vector<1x2048xf32> to vector<2x2048xf32>
    %9 = arith.addf %6, %8 : vector<2x2048xf32>
    %cst = arith.constant 0.000000e+00 : f32
    %10 = vector.broadcast %cst : f32 to vector<2x2048xf32>
    %11 = arith.cmpf ogt, %9, %10 : vector<2x2048xf32>
    %cst_7 = arith.constant 2.000000e-01 : f32
    %12 = vector.broadcast %cst_7 : f32 to vector<2x2048xf32>
    %13 = arith.mulf %12, %9 : vector<2x2048xf32>
    %14 = arith.select %11, %9, %13 : vector<2x2048xi1>, vector<2x2048xf32>
    %15 = arith.truncf %14 : vector<2x2048xf32> to vector<2x2048xbf16>
    %c0_8 = arith.constant 0 : index
    %c0_9 = arith.constant 0 : index
    %16 = vector.load %arg5[%c0_8, %c0_9] : memref<2048x512xbf16, #tpu.memory_space<vmem>>, vector<2048x512xbf16>
    %cst_10 = arith.constant dense<0.000000e+00> : vector<2x512xf32>
    %17 = tpu.matmul %15, %16, %cst_10 {dimension_numbers = #tpu.dot_dimension_numbers<[1], [0], [0], [1], [0, 0, 1, 1], [], []>} : vector<2x2048xbf16>, vector<2048x512xbf16>, vector<2x512xf32> -> vector<2x512xf32>
    %c0_11 = arith.constant 0 : index
    %c0_12 = arith.constant 0 : index
    %18 = vector.load %arg6[%c0_11, %c0_12] : memref<1x512xf32, #tpu.memory_space<vmem>>, vector<1x512xf32>
    %19 = vector.broadcast %18 : vector<1x512xf32> to vector<2x512xf32>
    %20 = arith.addf %17, %19 : vector<2x512xf32>
    %cst_13 = arith.constant dense<0.000000e+00> : vector<512xf32>
    %21 = vector.multi_reduction <add>, %20, %cst_13 [0] : vector<2x512xf32> to vector<512xf32>
    %22 = vector.shape_cast %21 : vector<512xf32> to vector<1x512xf32>
    %cst_14 = arith.constant 2.000000e+00 : f32
    %23 = vector.broadcast %cst_14 : f32 to vector<1x512xf32>
    %24 = arith.divf %22, %23 : vector<1x512xf32>
    %25 = vector.broadcast %24 : vector<1x512xf32> to vector<2x512xf32>
    %26 = arith.subf %20, %25 : vector<2x512xf32>
    %27 = arith.mulf %26, %26 : vector<2x512xf32>
    %cst_15 = arith.constant dense<0.000000e+00> : vector<512xf32>
    %28 = vector.multi_reduction <add>, %27, %cst_15 [0] : vector<2x512xf32> to vector<512xf32>
    %29 = vector.shape_cast %28 : vector<512xf32> to vector<1x512xf32>
    %cst_16 = arith.constant 2.000000e+00 : f32
    %30 = vector.broadcast %cst_16 : f32 to vector<1x512xf32>
    %31 = arith.divf %29, %30 : vector<1x512xf32>
    %32 = vector.broadcast %24 : vector<1x512xf32> to vector<2x512xf32>
    %33 = arith.subf %20, %32 : vector<2x512xf32>
    %cst_17 = arith.constant 9.99999974E-6 : f32
    %34 = vector.broadcast %cst_17 : f32 to vector<1x512xf32>
    %35 = arith.addf %31, %34 : vector<1x512xf32>
    %36 = math.rsqrt %35 : vector<1x512xf32>
    %37 = vector.broadcast %36 : vector<1x512xf32> to vector<2x512xf32>
    %38 = arith.mulf %33, %37 : vector<2x512xf32>
    %c0_18 = arith.constant 0 : index
    %c0_19 = arith.constant 0 : index
    %39 = vector.load %arg7[%c0_18, %c0_19] : memref<1x512xf32, #tpu.memory_space<vmem>>, vector<1x512xf32>
    %40 = vector.broadcast %39 : vector<1x512xf32> to vector<2x512xf32>
    %41 = arith.mulf %38, %40 : vector<2x512xf32>
    %c0_20 = arith.constant 0 : index
    %c0_21 = arith.constant 0 : index
    %42 = vector.load %arg8[%c0_20, %c0_21] : memref<1x512xf32, #tpu.memory_space<vmem>>, vector<1x512xf32>
    %43 = vector.broadcast %42 : vector<1x512xf32> to vector<2x512xf32>
    %44 = arith.addf %41, %43 : vector<2x512xf32>
    %cst_22 = arith.constant 0.000000e+00 : f32
    %45 = vector.broadcast %cst_22 : f32 to vector<2x512xf32>
    %46 = arith.cmpf ogt, %44, %45 : vector<2x512xf32>
    %cst_23 = arith.constant 2.000000e-01 : f32
    %47 = vector.broadcast %cst_23 : f32 to vector<2x512xf32>
    %48 = arith.mulf %47, %44 : vector<2x512xf32>
    %49 = arith.select %46, %44, %48 : vector<2x512xi1>, vector<2x512xf32>
    %c0_24 = arith.constant 0 : index
    %c0_25 = arith.constant 0 : index
    %50 = vector.load %arg9[%c0_24, %c0_25] : memref<2x512xf32, #tpu.memory_space<vmem>>, vector<2x512xf32>
    tpu.vector_store %arg9[%c0_24, %c0_25], %49 {strides = array<i32>} : memref<2x512xf32, #tpu.memory_space<vmem>>, vector<2x512xf32>,
    return
  }
  func.func @transform_0(%arg0: i32) -> (i32, i32) {
    %c0_i32 = arith.constant 0 : i32
    %c0_i32_0 = arith.constant 0 : i32
    %c0_i32_1 = arith.constant 0 : i32
    return %c0_i32, %c0_i32_0 : i32, i32
  }
  func.func @transform_1(%arg0: i32) -> (i32, i32) {
    %c0_i32 = arith.constant 0 : i32
    %c0_i32_0 = arith.constant 0 : i32
    %c0_i32_1 = arith.constant 0 : i32
    return %c0_i32, %c0_i32_0 : i32, i32
  }
  func.func @transform_2(%arg0: i32) -> (i32, i32) {
    %c0_i32 = arith.constant 0 : i32
    %c0_i32_0 = arith.constant 0 : i32
    %c0_i32_1 = arith.constant 0 : i32
    return %c0_i32, %c0_i32_0 : i32, i32
  }
  func.func @transform_3(%arg0: i32) -> (i32, i32) {
    %c0_i32 = arith.constant 0 : i32
    %c0_i32_0 = arith.constant 0 : i32
    %c0_i32_1 = arith.constant 0 : i32
    return %c0_i32, %c0_i32_0 : i32, i32
  }
  func.func @transform_4(%arg0: i32) -> (i32, i32) {
    %c0_i32 = arith.constant 0 : i32
    %c0_i32_0 = arith.constant 0 : i32
    return %c0_i32, %arg0 : i32, i32
  }
  func.func @transform_5(%arg0: i32) -> (i32, i32) {
    %c0_i32 = arith.constant 0 : i32
    %c0_i32_0 = arith.constant 0 : i32
    return %c0_i32, %arg0 : i32, i32
  }
  func.func @transform_6(%arg0: i32) -> (i32, i32) {
    %c0_i32 = arith.constant 0 : i32
    %c0_i32_0 = arith.constant 0 : i32
    return %c0_i32, %arg0 : i32, i32
  }
  func.func @transform_7(%arg0: i32) -> (i32, i32) {
    %c0_i32 = arith.constant 0 : i32
    %c0_i32_0 = arith.constant 0 : i32
    return %c0_i32, %arg0 : i32, i32
  }
  func.func @transform_8(%arg0: i32) -> (i32, i32) {
    %c0_i32 = arith.constant 0 : i32
    %c0_i32_0 = arith.constant 0 : i32
    return %c0_i32, %arg0 : i32, i32
  }
}

</mosaic_0001>

<bundles_post_ra>
// kernel: tile.23
= control target key start
LH: loop header
LB: loop body
LE: loop exit
PB: predicated region body
PF: predicated region fallthrough
CT: control target
= control target key end

     0   :  { %s22_s0 = inlined_call_operand.vmem [shape: f32[25], index: 0, kind: input, shape index: {}]   ;;  %s23_s1 = inlined_call_operand.vmem [shape: f32[2,25], index: 1, kind: output, shape index: {}]  }
   0x1   :  { %v4_v0 = vld [vmem:[%s22_s0] ss:$0 sm:$0xff] }
   0x2   :  { %5 = vst [vmem:[%s23_s1] sm:$0x3] %v4_v0 }

// kernel: tile.0
= control target key start
LH: loop header
LB: loop body
LE: loop exit
PB: predicated region body
PF: predicated region fallthrough
CT: control target
= control target key end

     0   :  { %s238_s8 = smov 127   ;;  %s239_s9 = smov 124   ;;  %vm7_vm0 = vcmask 7168   ;;  %s374_s0 = inlined_call_operand.vmem [shape: f32[2,25], index: 0, kind: input, shape index: {}]   ;;  %s375_s1 = inlined_call_operand.vmem [shape: f32[50,1], index: 1, kind: output, shape index: {}]  }
   0x1   :  { %v4_v0 = vld [vmem:[%s374_s0] sm:$0x3]  ;;  %s237_s0 = smov 125   ;;  %s240_s10 = smov 126  }
   0x2   :  { %5 = vst [vmem:[#allocation0] sm:$0x3] %v4_v0  ;;  %s54_s11 = smov 3  ;;  %s46_s12 = smov 3 }
   0x3   :  { %s241_s13 = smov 122   ;;  %s242_s14 = smov 123  }
   0x4   :  { %s70_s15 = smov 3  ;;  %s62_s16 = smov 3 }
   0x5   :  { %s243_s17 = smov 120   ;;  %s244_s18 = smov 121  }
   0x6   :  { %s86_s19 = smov 3  ;;  %s78_s20 = smov 3 }
   0x7   :  { %s245_s21 = smov 118   ;;  %s246_s22 = smov 119  }
   0x8   :  { %s102_s23 = smov 3  ;;  %s94_s24 = smov 3 }
   0x9   :  { %v21_v1 = vld [vmem:[#allocation0] sm:$0x3]   ;;  %s247_s25 = smov 116   ;;  %s248_s26 = smov 117  }
   0xa   :  { %v9_v2 = vld [vmem:[#allocation0] sm:$0x3]   ;;  %22 = vrot.lane.b32.xlu1 %v21_v1, %s237_s0  ;;  %s118_s27 = smov 3  ;;  %s110_s28 = smov 3 }
   0xb   :  { %10 = vrot.lane.b32.xlu0 %v9_v2, %s238_s8  ;;  %v27_v3 = vld [vmem:[#allocation0] sm:$0x3]   ;;  %s249_s29 = smov 114   ;;  %s250_s30 = smov 115  }
   0xc   :  { %v15_v4 = vld [vmem:[#allocation0] sm:$0x3]   ;;  %s134_s2 = smov 3  ;;  %s126_s3 = smov 3 }
   0xd   :  { %v39_v5 = vld [vmem:[#allocation0] sm:$0x3]   ;;  %s251_s4 = smov 112   ;;  %s252_s5 = smov 113  }
   0xe   :  { %28 = vrot.lane.b32.xlu1 %v27_v3, %s239_s9  ;;  %v33_v6 = vld [vmem:[#allocation0] sm:$0x3]   ;;  %s150_s6 = smov 3  ;;  %s142_s7 = smov 3 }
   0xf   :  { %16 = vrot.lane.b32.xlu0 %v15_v4, %s240_s10  ;;  %v55_v7 = vld [vmem:[#allocation0 + $0x1] ss:$-1 sm:%s54_s11]   ;;  %s253_s9 = smov 110   ;;  %s254_s10 = smov 111  }
  0x10   :  { %v47_v8 = vld [vmem:[#allocation0 + $0x1] ss:$-1 sm:%s46_s12]   ;;  %s166_s11 = smov 3  ;;  %s158_s12 = smov 3 }
  0x11   :  { %v71_v9 = vld [vmem:[#allocation0 + $0x1] ss:$-1 sm:%s70_s15]   ;;  %s182_s15 = smov 3 }
  0x12   :  { %40 = vrot.lane.b32.xlu1 %v39_v5, %s241_s13  ;;  %v63_v10 = vld [vmem:[#allocation0 + $0x1] ss:$-1 sm:%s62_s16]   ;;  %s255_s13 = smov 108   ;;  %s174_s16 = smov 3 }
  0x13   :  { %34 = vrot.lane.b32.xlu0 %v33_v6, %s242_s14  ;;  %v87_v11 = vld [vmem:[#allocation0 + $0x1] ss:$-1 sm:%s86_s19]   ;;  %s256_s14 = smov 109   ;;  %s259_s19 = smov 104  }
  0x14   :  { %v79_v12 = vld [vmem:[#allocation0 + $0x1] ss:$-1 sm:%s78_s20]   ;;  %s260_s20 = smov 105  }
  0x15   :  { %v103_v13 = vld [vmem:[#allocation0 + $0x1] ss:$-1 sm:%s102_s23]  }
  0x16   :  { %56 = vrot.lane.b32.xlu1 %v55_v7, %s243_s17  ;;  %v95_v14 = vld [vmem:[#allocation0 + $0x1] ss:$-1 sm:%s94_s24]   ;;  %s257_s17 = smov 106  }
  0x17   :  { %48 = vrot.lane.b32.xlu0 %v47_v8, %s244_s18  ;;  %v119_v15 = vld [vmem:[#allocation0 + $0x1] ss:$-1 sm:%s118_s27]   ;;  %s258_s18 = smov 107  }
  0x18   :  { %v111_v16 = vld [vmem:[#allocation0 + $0x1] ss:$-1 sm:%s110_s28]  }
  0x19   :  { %v135_v17 = vld [vmem:[#allocation0 + $0x1] ss:$-1 sm:%s134_s2]  }
  0x1a   :  { %72 = vrot.lane.b32.xlu1 %v71_v9, %s245_s21  ;;  %v127_v18 = vld [vmem:[#allocation0 + $0x1] ss:$-1 sm:%s126_s3]  }
  0x1b   :  { %64 = vrot.lane.b32.xlu0 %v63_v10, %s246_s22  ;;  %v6_v19 = vld [vmem:[#allocation0] sm:$0x3]  }
  0x1c   :  { %8 = vst.msk [vmem:[%s375_s1] ss:$25 sm:$0x3] %vm7_vm0, %v6_v19   ;;  %v151_v20 = vld [vmem:[#allocation0 + $0x1] ss:$-1 sm:%s150_s6]  }
  0x1d   :  { %v143_v21 = vld [vmem:[#allocation0 + $0x1] ss:$-1 sm:%s142_s7]  }
  0x1e   :  { %88 = vrot.lane.b32.xlu1 %v87_v11, %s247_s25  ;;  %v167_v22 = vld [vmem:[#allocation0 + $0x1] ss:$-1 sm:%s166_s11]  }
  0x1f   :  { %80 = vrot.lane.b32.xlu0 %v79_v12, %s248_s26  ;;  %v159_v23 = vld [vmem:[#allocation0 + $0x1] ss:$-1 sm:%s158_s12]  }
  0x20   :  { %v183_v24 = vld [vmem:[#allocation0 + $0x1] ss:$-1 sm:%s182_s15]  }
  0x21   :  { %v175_v25 = vld [vmem:[#allocation0 + $0x1] ss:$-1 sm:%s174_s16]  }
  0x22   :  { %104 = vrot.lane.b32.xlu1 %v103_v13, %s249_s29 }
  0x23   :  { %96 = vrot.lane.b32.xlu0 %v95_v14, %s250_s30 }
  0x26   :  { %120 = vrot.lane.b32.xlu1 %v119_v15, %s251_s4 }
  0x27   :  { %112 = vrot.lane.b32.xlu0 %v111_v16, %s252_s5 }
  0x2a   :  { %136 = vrot.lane.b32.xlu1 %v135_v17, %s253_s9 }
  0x2b   :  { %128 = vrot.lane.b32.xlu0 %v127_v18, %s254_s10 }
  0x2e   :  { %152 = vrot.lane.b32.xlu1 %v151_v20, %s255_s13 }
  0x2f   :  { %144 = vrot.lane.b32.xlu0 %v143_v21, %s256_s14 }
  0x32   :  { %168 = vrot.lane.b32.xlu1 %v167_v22, %s257_s17 }
  0x33   :  { %160 = vrot.lane.b32.xlu0 %v159_v23, %s258_s18 }
  0x36   :  { %184 = vrot.lane.b32.xlu1 %v183_v24, %s259_s19 }
  0x37   :  { %176 = vrot.lane.b32.xlu0 %v175_v25, %s260_s20 }
  0x7c   :  { %v23_v26 = vpop.permute.xlu1 %22  }
  0x7d   :  { %v11_v27 = vpop.permute.xlu0 %10   ;;  %191 = vst.msk [vmem:[%s375_s1 + $0x3] ss:$25 sm:$0x3] %vm7_vm0, %v23_v26  }
  0x7e   :  { %189 = vst.msk [vmem:[%s375_s1 + $0x1] ss:$25 sm:$0x3] %vm7_vm0, %v11_v27  }
  0x80   :  { %v29_v28 = vpop.permute.xlu1 %28  }
  0x81   :  { %v17_v29 = vpop.permute.xlu0 %16   ;;  %192 = vst.msk [vmem:[%s375_s1 + $0x4] ss:$25 sm:$0x3] %vm7_vm0, %v29_v28  }
  0x82   :  { %190 = vst.msk [vmem:[%s375_s1 + $0x2] ss:$25 sm:$0x3] %vm7_vm0, %v17_v29  }
  0x84   :  { %v41_v30 = vpop.permute.xlu1 %40  }
  0x85   :  { %v35_v31 = vpop.permute.xlu0 %34   ;;  %194 = vst.msk [vmem:[%s375_s1 + $0x6] ss:$25 sm:$0x3] %vm7_vm0, %v41_v30  }
  0x86   :  { %193 = vst.msk [vmem:[%s375_s1 + $0x5] ss:$25 sm:$0x3] %vm7_vm0, %v35_v31  }
  0x88   :  { %v57_v32 = vpop.permute.xlu1 %56  }
  0x89   :  { %v49_v33 = vpop.permute.xlu0 %48   ;;  %196 = vst.msk [vmem:[%s375_s1 + $0x21] ss:$-25 sm:$0x3] %vm7_vm0, %v57_v32  }
  0x8a   :  { %195 = vst.msk [vmem:[%s375_s1 + $0x20] ss:$-25 sm:$0x3] %vm7_vm0, %v49_v33  }
  0x8c   :  { %v73_v34 = vpop.permute.xlu1 %72  }
  0x8d   :  { %v65_v35 = vpop.permute.xlu0 %64   ;;  %198 = vst.msk [vmem:[%s375_s1 + $0x23] ss:$-25 sm:$0x3] %vm7_vm0, %v73_v34  }
  0x8e   :  { %197 = vst.msk [vmem:[%s375_s1 + $0x22] ss:$-25 sm:$0x3] %vm7_vm0, %v65_v35  }
  0x90   :  { %v89_v36 = vpop.permute.xlu1 %88  }
  0x91   :  { %v81_v37 = vpop.permute.xlu0 %80   ;;  %200 = vst.msk [vmem:[%s375_s1 + $0x25] ss:$-25 sm:$0x3] %vm7_vm0, %v89_v36  }
  0x92   :  { %199 = vst.msk [vmem:[%s375_s1 + $0x24] ss:$-25 sm:$0x3] %vm7_vm0, %v81_v37  }
  0x94   :  { %v105_v38 = vpop.permute.xlu1 %104  }
  0x95   :  { %v97_v39 = vpop.permute.xlu0 %96   ;;  %202 = vst.msk [vmem:[%s375_s1 + $0x27] ss:$-25 sm:$0x3] %vm7_vm0, %v105_v38  }
  0x96   :  { %201 = vst.msk [vmem:[%s375_s1 + $0x26] ss:$-25 sm:$0x3] %vm7_vm0, %v97_v39  }
  0x98   :  { %v121_v40 = vpop.permute.xlu1 %120  }
  0x99   :  { %v113_v41 = vpop.permute.xlu0 %112   ;;  %204 = vst.msk [vmem:[%s375_s1 + $0x29] ss:$-25 sm:$0x3] %vm7_vm0, %v121_v40  }
  0x9a   :  { %203 = vst.msk [vmem:[%s375_s1 + $0x28] ss:$-25 sm:$0x3] %vm7_vm0, %v113_v41  }
  0x9c   :  { %v137_v42 = vpop.permute.xlu1 %136  }
  0x9d   :  { %v129_v43 = vpop.permute.xlu0 %128   ;;  %206 = vst.msk [vmem:[%s375_s1 + $0x2b] ss:$-25 sm:$0x3] %vm7_vm0, %v137_v42  }
  0x9e   :  { %205 = vst.msk [vmem:[%s375_s1 + $0x2a] ss:$-25 sm:$0x3] %vm7_vm0, %v129_v43  }
  0xa0   :  { %v153_v44 = vpop.permute.xlu1 %152  }
  0xa1   :  { %v145_v45 = vpop.permute.xlu0 %144   ;;  %208 = vst.msk [vmem:[%s375_s1 + $0x2d] ss:$-25 sm:$0x3] %vm7_vm0, %v153_v44  }
  0xa2   :  { %207 = vst.msk [vmem:[%s375_s1 + $0x2c] ss:$-25 sm:$0x3] %vm7_vm0, %v145_v45  }
  0xa4   :  { %v169_v46 = vpop.permute.xlu1 %168  }
  0xa5   :  { %v161_v47 = vpop.permute.xlu0 %160   ;;  %210 = vst.msk [vmem:[%s375_s1 + $0x2f] ss:$-25 sm:$0x3] %vm7_vm0, %v169_v46  }
  0xa6   :  { %209 = vst.msk [vmem:[%s375_s1 + $0x2e] ss:$-25 sm:$0x3] %vm7_vm0, %v161_v47  }
  0xa8   :  { %v185_v48 = vpop.permute.xlu1 %184  }
  0xa9   :  { %v177_v49 = vpop.permute.xlu0 %176   ;;  %212 = vst.msk [vmem:[%s375_s1 + $0x31] ss:$-25 sm:$0x3] %vm7_vm0, %v185_v48  }
  0xaa   :  { %211 = vst.msk [vmem:[%s375_s1 + $0x30] ss:$-25 sm:$0x3] %vm7_vm0, %v177_v49  }

// kernel: tile.33
= control target key start
LH: loop header
LB: loop body
LE: loop exit
PB: predicated region body
PF: predicated region fallthrough
CT: control target
= control target key end

     0   :  { %s28_s0 = inlined_call_operand.vmem [shape: f32[128], index: 0, kind: input, shape index: {}]   ;;  %s29_s1 = inlined_call_operand.vmem [shape: f32[16,128], index: 1, kind: output, shape index: {}]  }
   0x1   :  { %v4_v0 = vld [vmem:[%s28_s0] ss:$0 sm:$0xff] }
   0x2   :  { %5 = vst [vmem:[%s29_s1] sm:$0xff] %v4_v0  ;;  %8 = vst [vmem:[%s29_s1 + $0x8] sm:$0xff] %v4_v0 }

// kernel: tile.38
= control target key start
LH: loop header
LB: loop body
LE: loop exit
PB: predicated region body
PF: predicated region fallthrough
CT: control target
= control target key end

     0   :  { %2 = vsyncpa [#allocation1], 0  ;;  %s47_s6 = smov [#allocation0]   ;;  %s76_s0 = inlined_call_operand.hbm [shape: f32[128], index: 0, kind: input, shape index: {}]   ;;  %s77_s1 = inlined_call_operand.vmem [shape: f32[16,128], index: 1, kind: output, shape index: {}]  }
   0x1   :  { %s9_s7 = sshll.u32 %s47_s6, 4  ;;  %s23_s10 = scalar_lea.hbm %s76_s0, 16  ;;  %s10_s7 = int_to_ptr.vmem [resolvable:$true] %s9_s7 }
   0x2   :  { %p24_p0 = scmp.ne.s32.totalorder %s76_s0, %s23_s10  ;;  %p27_p1 = scmp.lt.u32.totalorder %s23_s10, %s76_s0 }
   0x4   :  { %p29_p2 = pnand %p27_p1, %p24_p0 }
   0x6   :  { %32 = shalt.err (!%p29_p2)
}
   0x7   :  { %s33_s15 = scalar_lea.vmem %s10_s7, 16  ;;  %s37_s16 = scalar_lea.vmem %s10_s7, 32 }
   0x8   :  { %p34_p3 = scmp.ne.s32.totalorder %s10_s7, %s33_s15  ;;  %p38_p4 = scmp.lt.s32.totalorder %s10_s7, %s10_s7 }
   0x9   :  { %p39_p5 = scmp.lt.s32.totalorder %s37_s16, %s33_s15 }
   0xb   :  { %p40_p6 = por %p39_p5, %p38_p4 }
   0xd   :  { %p41_p7 = pnand %p40_p6, %p34_p3 }
   0xf   :  { %44 = shalt.err (!%p41_p7)
}
  0x10   :  { %12 = dma.hbm_to_vmem [thread:$0]  %s76_s0, 16, %s10_s7, [#allocation1]  }
  0x11   :  { %45 = dma.done.wait [#allocation1], 16  }
  0x12   :  { %46 = vsyncadd [#allocation1], 4294967280  ;;  %v16_v0 = vld [vmem:[#allocation0] ss:$0 sm:$0xff] }
  0x13   :  { %17 = vst [vmem:[%s77_s1] sm:$0xff] %v16_v0  ;;  %21 = vst [vmem:[%s77_s1 + $0x8] sm:$0xff] %v16_v0 }
  0x14   :  { %20 = vsyncpa [#allocation1], 1 }

// kernel: front_end_forward.2
= control target key start
LH: loop header
LB: loop body
LE: loop exit
PB: predicated region body
PF: predicated region fallthrough
CT: control target
= control target key end

     0   :  { %12 = vsyncpa [#allocation3], 0  ;;  %s1805_s0 = inlined_call_operand.vmem [shape: bf16[56,256], index: 0, kind: input, shape index: {}]   ;;  %s1806_s1 = inlined_call_operand.hbm [shape: bf16[1024,128], index: 1, kind: input, shape index: {}]   ;;  %s1807_s2 = inlined_call_operand.hbm [shape: f32[1,128], index: 2, kind: input, shape index: {}]   ;;  %s1808_s3 = inlined_call_operand.vmem [shape: f32[50,1], index: 3, kind: input, shape index: {}]   ;;  %s1809_s4 = inlined_call_operand.vmem [shape: f32[50,128], index: 4, kind: output, shape index: {0}]   ;;  %s1810_s5 = inlined_call_operand.vmem [shape: f32[1,128], index: 5, kind: output, shape index: {1}]   ;;  %s1811_s6 = inlined_call_operand.vmem [shape: f32[1,128], index: 6, kind: output, shape index: {2}]  }
   0x1   :  { %13 = vsyncpa [#allocation5], 0  ;;  %s1548_s21 = smov [#allocation2]   ;;  %s1500_s25 = scalar_lea.hbm %s1806_s1, 8192 }
   0x2   :  { %s21_s22 = sshll.u32 %s1548_s21, 4  ;;  %p1501_p0 = scmp.ne.s32.totalorder %s1806_s1, %s1500_s25  ;;  %s22_s22 = int_to_ptr.vmem [resolvable:$true] %s21_s22 }
   0x3   :  { %p1504_p1 = scmp.lt.u32.totalorder %s1500_s25, %s1806_s1 }
   0x5   :  { %p1506_p2 = pnand %p1504_p1, %p1501_p0 }
   0x7   :  { %1509 = shalt.err (!%p1506_p2)
}
   0x8   :  { %s1510_s30 = scalar_lea.vmem %s22_s22, 8192  ;;  %p1515_p4 = scmp.lt.s32.totalorder %s22_s22, %s22_s22 }
   0x9   :  { %p1511_p3 = scmp.ne.s32.totalorder %s22_s22, %s1510_s30  ;;  %p1516_p5 = scmp.lt.s32.totalorder %s1510_s30, %s1510_s30 }
   0xb   :  { %p1517_p6 = por %p1516_p5, %p1515_p4 }
   0xd   :  { %p1518_p7 = pnand %p1517_p6, %p1511_p3 }
   0xf   :  { %1521 = shalt.err (!%p1518_p7)
}
  0x10   :  { %s1549_s7 = smov 64   ;;  %s1550_s8 = smov 4  }
  0x11   :  { %27 = dma.hbm_to_vmem [thread:$0]  %s1806_s1, 8192, %s22_s22, [#allocation3], %s1549_s7, %s1549_s7, %s1550_s8  }
  0x12   :  { %s1551_s11 = smov [#allocation4]   ;;  %s1522_s15 = scalar_lea.hbm %s1807_s2, 16 }
  0x13   :  { %s34_s12 = sshll.u32 %s1551_s11, 4  ;;  %p1523_p8 = scmp.ne.s32.totalorder %s1807_s2, %s1522_s15  ;;  %s35_s12 = int_to_ptr.vmem [resolvable:$true] %s34_s12 }
  0x14   :  { %p1526_p9 = scmp.lt.u32.totalorder %s1522_s15, %s1807_s2 }
  0x16   :  { %p1528_p10 = pnand %p1526_p9, %p1523_p8 }
  0x18   :  { %1531 = shalt.err (!%p1528_p10)
}
  0x19   :  { %s1532_s20 = scalar_lea.vmem %s35_s12, 16  ;;  %s1536_s1 = scalar_lea.vmem %s35_s12, 32 }
  0x1a   :  { %p1533_p11 = scmp.ne.s32.totalorder %s35_s12, %s1532_s20  ;;  %p1537_p12 = scmp.lt.s32.totalorder %s35_s12, %s35_s12 }
  0x1b   :  { %p1538_p13 = scmp.lt.s32.totalorder %s1536_s1, %s1532_s20 }
  0x1d   :  { %p1539_p0 = por %p1538_p13, %p1537_p12 }
  0x1f   :  { %p1540_p1 = pnand %p1539_p0, %p1533_p11 }
  0x21   :  { %1543 = shalt.err (!%p1540_p1)
}
  0x22   :  { %37 = dma.hbm_to_vmem [thread:$0]  %s1807_s2, 16, %s35_s12, [#allocation5]  }
  0x23   :  { %1544 = dma.done.wait [#allocation3], 8192  }
  0x24   :  { %1545 = vsyncadd [#allocation3], 4294959104 }
  0x25   :  { %1546 = dma.done.wait [#allocation5], 16  }
  0x26   :  { %1547 = vsyncadd [#allocation5], 4294967280  ;;  %v1552_v0 = vmov 0   ;;  %v1418_v1 = vld [vmem:[#allocation2 + $0xc0] sm:$0xff]   ;;  %v1422_v5 = vld [vmem:[#allocation2 + $0xc8] sm:$0xff]   ;;  %vm860_vm1 = vcmask 1044480  }
  0x27   :  { %1416 = vset.pattern.permute.xlu0 %v1552_v0  ;;  %1417 = vset.pattern.permute.xlu1 %v1552_v0  ;;  %v1419_v2 = vld [vmem:[#allocation2 + $0x40] sm:$0xff]   ;;  %v1423_v6 = vld [vmem:[#allocation2 + $0x48] sm:$0xff]   ;;  %v1426_v9 = vld [vmem:[#allocation2 + $0xd0] sm:$0xff]   ;;  %vm148_vm0 = vsmask.f32 7424  ;;  %vm1125_vm3 = vcmask 1041408  }
  0x28   :  { %1251 = vmatprep.subr.bf16.mxu0 %v1418_v1  ;;  %v1420_v3 = vld [vmem:[#allocation2 + $0x80] sm:$0xff]   ;;  %1291 = vmatprep.subr.bf16.mxu1 %v1419_v2  ;;  %v1424_v7 = vld [vmem:[#allocation2 + $0x88] sm:$0xff]   ;;  %v1427_v10 = vld [vmem:[#allocation2 + $0x50] sm:$0xff]   ;;  %vm596_vm2 = vsmask.f32 5376 }
  0x29   :  { %v1421_v4 = vld [vmem:[#allocation2] sm:$0xff]   ;;  %1252 = vmatpush3.bf16.msra.mxu0 %v1420_v3  ;;  %v1425_v8 = vld [vmem:[#allocation2 + $0x8] sm:$0xff]   ;;  %v1428_v11 = vld [vmem:[#allocation2 + $0x90] sm:$0xff]  }
  0x2a   :  { %1292 = vmatpush3.bf16.msra.mxu1 %v1421_v4  ;;  %1253 = vmatprep.subr.bf16.mxu0 %v1422_v5  ;;  %v1429_v12 = vld [vmem:[#allocation2 + $0x10] sm:$0xff]   ;;  %v1430_v13 = vld [vmem:[#allocation2 + $0xd8] sm:$0xff]   ;;  %v1434_v17 = vld [vmem:[#allocation2 + $0xe0] sm:$0xff]  }
  0x2b   :  { %1293 = vmatprep.subr.bf16.mxu1 %v1423_v6  ;;  %v1431_v14 = vld [vmem:[#allocation2 + $0x58] sm:$0xff]   ;;  %v1435_v18 = vld [vmem:[#allocation2 + $0x60] sm:$0xff]   ;;  %v1438_v21 = vld [vmem:[#allocation2 + $0xe8] sm:$0xff]  }
  0x2c   :  { %v1432_v15 = vld [vmem:[#allocation2 + $0x98] sm:$0xff]   ;;  %v1436_v19 = vld [vmem:[#allocation2 + $0xa0] sm:$0xff]   ;;  %v1439_v22 = vld [vmem:[#allocation2 + $0x68] sm:$0xff]  }
  0x2d   :  { %1254 = vmatpush3.bf16.msra.mxu0 %v1424_v7  ;;  %v1433_v16 = vld [vmem:[#allocation2 + $0x18] sm:$0xff]   ;;  %v1437_v20 = vld [vmem:[#allocation2 + $0x20] sm:$0xff]   ;;  %v1440_v23 = vld [vmem:[#allocation2 + $0xa8] sm:$0xff]  }
  0x2e   :  { %1294 = vmatpush3.bf16.msra.mxu1 %v1425_v8  ;;  %1255 = vmatprep.subr.bf16.mxu0 %v1426_v9  ;;  %v1441_v24 = vld [vmem:[#allocation2 + $0x28] sm:$0xff]   ;;  %v1442_v25 = vld [vmem:[#allocation2 + $0xf0] sm:$0xff]   ;;  %v1446_v29 = vld [vmem:[#allocation2 + $0xf8] sm:$0xff]  }
  0x2f   :  { %1295 = vmatprep.subr.bf16.mxu1 %v1427_v10  ;;  %v1443_v26 = vld [vmem:[#allocation2 + $0x70] sm:$0xff]   ;;  %v1447_v30 = vld [vmem:[#allocation2 + $0x78] sm:$0xff]   ;;  %v47_v33 = vld [vmem:[%s1805_s0] sm:$0xff] }
  0x30   :  { %v1444_v27 = vld [vmem:[#allocation2 + $0xb0] sm:$0xff]   ;;  %v1448_v31 = vld [vmem:[#allocation2 + $0xb8] sm:$0xff]   ;;  %v1618_v34 = vld [vmem:[%s1805_s0 + $0x8] sm:$0xff] }
  0x31   :  { %1256 = vmatpush3.bf16.msra.mxu0 %v1428_v11  ;;  %v1445_v28 = vld [vmem:[#allocation2 + $0x30] sm:$0xff]   ;;  %v1449_v32 = vld [vmem:[#allocation2 + $0x38] sm:$0xff]   ;;  %v1171_v35 = vcombine.high %v47_v33, %v1618_v34  ;;  %v1170_v37 = vcombine.low %v47_v33, %v1618_v34  ;;  %v1455_v39 = vld [vmem:[#allocation2 + $0x140] sm:$0xff]  }
  0x32   :  { %1296 = vmatpush3.bf16.msra.mxu1 %v1429_v12  ;;  %1257 = vmatprep.subr.bf16.mxu0 %v1430_v13  ;;  %v1624_v36 = vld [vmem:[%s1805_s0 + $0x14] ss:$8 sps:$4 sm:$0xff]   ;;  %v1630_v38 = vld [vmem:[%s1805_s0 + $0x10] ss:$8 sps:$4 sm:$0xff]   ;;  %v1456_v46 = vld [vmem:[#allocation2 + $0x1c0] sm:$0xff]  }
  0x33   :  { %1297 = vmatprep.subr.bf16.mxu1 %v1431_v14  ;;  %v162_v40 = vshrl.u32 %v1171_v35, 16  ;;  %v164_v41 = vshll.u32 %v1171_v35, 16  ;;  %v169_v42 = vshll.u32 %v1624_v36, 16  ;;  %520 = vmatprep.mubr.bf16.mxu1 %v1171_v35  ;;  %v150_v43 = vshrl.u32 %v1170_v37, 16  ;;  %v1457_v51 = vld [vmem:[#allocation2 + $0x100] sm:$0xff]   ;;  %v1459_v55 = vld [vmem:[#allocation2 + $0x148] sm:$0xff]  }
  0x34   :  { %v152_v44 = vshll.u32 %v1170_v37, 16  ;;  %v157_v45 = vshll.u32 %v1630_v38, 16  ;;  %v1458_v52 = vld [vmem:[#allocation2 + $0x180] sm:$0xff]   ;;  %v1460_v57 = vld [vmem:[#allocation2 + $0x1c8] sm:$0xff]   ;;  %v181_v58 = vshrl.u32 %v1624_v36, 16  ;;  %v173_v61 = vshrl.u32 %v1630_v38, 16 }
  0x35   :  { %1258 = vmatpush3.bf16.msra.mxu0 %v1432_v15  ;;  %v166_v47 = vrot.slane %v164_v41, 1  ;;  %v171_v48 = vrot.slane %v169_v42, 1  ;;  %v1461_v60 = vld [vmem:[#allocation2 + $0x108] sm:$0xff]   ;;  %v1466_v1 = vld [vmem:[#allocation2 + $0x150] sm:$0xff]   ;;  %v1470_v11 = vld [vmem:[#allocation2 + $0x158] sm:$0xff]  }
  0x36   :  { %1298 = vmatpush3.bf16.msra.mxu1 %v1433_v16  ;;  %1259 = vmatprep.subr.bf16.mxu0 %v1434_v17  ;;  %v154_v49 = vrot.slane %v152_v44, 1  ;;  %v159_v50 = vrot.slane %v157_v45, 1  ;;  %v1462_v62 = vld [vmem:[#allocation2 + $0x188] sm:$0xff]   ;;  %v1467_v6 = vld [vmem:[#allocation2 + $0x1d0] sm:$0xff]   ;;  %v1471_v14 = vld [vmem:[#allocation2 + $0x1d8] sm:$0xff]   ;;  %v606_v41 = vrot.slane %v157_v45, 3 }
  0x37   :  { %1299 = vmatprep.subr.bf16.mxu1 %v1435_v18  ;;  %v167_v53 = vor.u32 %v166_v47, %v162_v40  ;;  %v1646_v63 = vld [vmem:[%s1805_s0 + $0x24] ss:$8 sps:$4 sm:$0xff]   ;;  %v1651_v0 = vld [vmem:[%s1805_s0 + $0x20] ss:$8 sps:$4 sm:$0xff]   ;;  %v183_v2 = vor.u32 %v181_v58, %v171_v48  ;;  %v1468_v7 = vld [vmem:[#allocation2 + $0x110] sm:$0xff]   ;;  %v605_v45 = vrot.slane %v173_v61, 2 }
  0x38   :  { %v155_v54 = vor.u32 %v154_v49, %v150_v43  ;;  %v185_v3 = vshll.u32 %v1646_v63, 16  ;;  %v175_v4 = vor.u32 %v173_v61, %v159_v50  ;;  %v177_v5 = vshll.u32 %v1651_v0, 16  ;;  %v1469_v10 = vld [vmem:[#allocation2 + $0x190] sm:$0xff]   ;;  %v1472_v16 = vld [vmem:[#allocation2 + $0x118] sm:$0xff]   ;;  %v1480_v33 = vld [vmem:[#allocation2 + $0x168] sm:$0xff]  }
  0x39   :  { %1260 = vmatpush3.bf16.msra.mxu0 %v1436_v19  ;;  %v172_v56 = vsel %vm148_vm0, %v167_v53, %v171_v48  ;;  %v197_v15 = vshrl.u32 %v1646_v63, 16  ;;  %v189_v17 = vshrl.u32 %v1651_v0, 16  ;;  %v1473_v18 = vld [vmem:[#allocation2 + $0x198] sm:$0xff]   ;;  %v86_v19 = vld [vmem:[%s1805_s0 + $0x30] sm:$0x33]  ;;  %v1482_v43 = vld [vmem:[#allocation2 + $0x128] sm:$0xff]  }
  0x3a   :  { %1300 = vmatpush3.bf16.msra.mxu1 %v1437_v20  ;;  %1261 = vmatprep.subr.bf16.mxu0 %v1438_v21  ;;  %v160_v59 = vsel %vm148_vm0, %v155_v54, %v159_v50  ;;  %v187_v8 = vrot.slane %v185_v3, 1  ;;  %v179_v9 = vrot.slane %v177_v5, 1  ;;  %v1177_v20 = vcombine.high %v86_v19, %v86_v19  ;;  %v1483_v44 = vld [vmem:[#allocation2 + $0x1a8] sm:$0xff]   ;;  %v1486_v50 = vld [vmem:[#allocation2 + $0x170] sm:$0xff]   ;;  %v1492_v61 = vld [vmem:[#allocation2 + $0x138] sm:$0xff]  }
  0x3b   :  { %1301 = vmatprep.subr.bf16.mxu1 %v1439_v22  ;;  %347 = vmatprep.mubr.bf16.mxu0 %v172_v56  ;;  %v1176_v21 = vcombine.low %v86_v19, %v86_v19  ;;  %v1476_v22 = vld [vmem:[#allocation2 + $0x160] sm:$0xff]   ;;  %v1488_v53 = vld [vmem:[#allocation2 + $0x130] sm:$0xff]   ;;  %v618_v54 = vrot.slane %v169_v42, 3 }
  0x3c   :  { %v188_v12 = vsel %vm148_vm0, %v183_v2, %v187_v8  ;;  %v180_v13 = vsel %vm148_vm0, %v175_v4, %v179_v9  ;;  %v1489_v56 = vld [vmem:[#allocation2 + $0x1b0] sm:$0xff]   ;;  %v552_v42 = vld [vmem:[%s1805_s0] sm:$0xcc]  ;;  %v865_v2 = vrot.slane %v1624_v36, 3  ;;  %v1694_v4 = vor.u32 %v606_v41, %v605_v45 }
  0x3d   :  { %1262 = vmatpush3.bf16.msra.mxu0 %v1440_v23  ;;  %v1477_v23 = vld [vmem:[#allocation2 + $0x1e0] sm:$0xff]   ;;  %v205_v47 = vshrl.u32 %v1176_v21, 16 }
  0x3e   :  { %1302 = vmatpush3.bf16.msra.mxu1 %v1441_v24  ;;  %1263 = vmatprep.subr.bf16.mxu0 %v1442_v25  ;;  %v199_v24 = vor.u32 %v197_v15, %v187_v8  ;;  %v201_v25 = vshll.u32 %v1177_v20, 16  ;;  %v862_v8 = vrot.slane %v1630_v38, 3  ;;  %v1075_v41 = vld [vmem:[%s1808_s3 + $0x20] sm:$0xff] }
  0x3f   :  { %1303 = vmatprep.subr.bf16.mxu1 %v1443_v26  ;;  %v191_v26 = vor.u32 %v189_v17, %v179_v9 }
  0x41   :  { %1264 = vmatpush3.bf16.msra.mxu0 %v1444_v27  ;;  %v193_v27 = vshll.u32 %v1176_v21, 16 }
  0x42   :  { %1304 = vmatpush3.bf16.msra.mxu1 %v1445_v28  ;;  %1265 = vmatprep.subr.bf16.mxu0 %v1446_v29  ;;  %v1478_v28 = vld [vmem:[#allocation2 + $0x120] sm:$0xff]   ;;  %v208_v29 = vshrl.u32 %v1177_v20, 16 }
  0x43   :  { %1305 = vmatprep.subr.bf16.mxu1 %v1447_v30  ;;  %v203_v30 = vrot.slane %v201_v25, 1 }
  0x45   :  { %1266 = vmatpush3.bf16.msra.mxu0 %v1448_v31  ;;  %v195_v31 = vrot.slane %v193_v27, 1  ;;  %v204_v35 = vsel %vm148_vm0, %v199_v24, %v203_v30  ;;  %v210_v40 = vor.u32 %v208_v29, %v203_v30  ;;  %v1074_v27 = vld [vmem:[%s1808_s3 + $0x18] sm:$0xff] }
  0x46   :  { %1306 = vmatpush3.bf16.msra.mxu1 %v1449_v32  ;;  %1331 = vmatprep.subr.bf16.mxu0 %v1455_v39  ;;  %v1479_v32 = vld [vmem:[#allocation2 + $0x1a0] sm:$0xff]   ;;  %v1481_v39 = vld [vmem:[#allocation2 + $0x1e8] sm:$0xff]  }
  0x47   :  { %1371 = vmatprep.subr.bf16.mxu1 %v1456_v46  ;;  %v53_v46 = vld [vmem:[%s1805_s0 + $0x30] sm:$0x11] }
  0x48   :  { %348 = vmatmul.mubr.bf16.vlgmr.msra.gmra.mrb[0].mxu0 %v160_v59  ;;  %v1195_v48 = vcombine.high %v53_v46, %v53_v46  ;;  %v1194_v49 = vcombine.low %v53_v46, %v53_v46  ;;  %v1490_v59 = vld [vmem:[#allocation2 + $0x178] sm:$0xff]  }
  0x49   :  { %521 = vmatmul.mubr.bf16.vlgmr.msra.gmra.mrb[0].mxu1 %v1170_v37  ;;  %1332 = vmatpush3.bf16.msra.mxu0 %v1457_v51  ;;  %v196_v37 = vsel %vm148_vm0, %v191_v26, %v195_v31  ;;  %v617_v51 = vrot.slane %v181_v58, 2  ;;  %v626_v58 = vrot.slane %v185_v3, 3  ;;  %v1212_v3 = vcombine.low %v552_v42, %v1618_v34 }
  0x4a   :  { %528 = vmatprep.mubr.bf16.mxu1 %v1624_v36  ;;  %1372 = vmatpush3.bf16.msra.mxu1 %v1458_v52  ;;  %v1487_v52 = vld [vmem:[#allocation2 + $0x1f0] sm:$0xff]   ;;  %v1071_v36 = vld [vmem:[%s1808_s3] sm:$0xff] }
  0x4b   :  { %1373 = vmatprep.subr.bf16.mxu1 %v1460_v57  ;;  %1333 = vmatprep.subr.bf16.mxu0 %v1459_v55  ;;  %v207_v55 = vor.u32 %v205_v47, %v195_v31  ;;  %v625_v57 = vrot.slane %v197_v15, 2  ;;  %v601_v19 = vshll.u32 %v1212_v3, 16 }
  0x4c   :  { %355 = vmatprep.mubr.bf16.mxu0 %v188_v12  ;;  %1080 = vperm.xlu0 %1416, %v1071_v36  }
  0x4d   :  { %1334 = vmatpush3.bf16.msra.mxu0 %v1461_v60  ;;  %v1491_v60 = vld [vmem:[#allocation2 + $0x1f8] sm:$0xff]   ;;  %v1702_v9 = vor.u32 %v626_v58, %v625_v57  ;;  %v603_v26 = vrot.slane %v601_v19, 3 }
  0x4e   :  { %1374 = vmatpush3.bf16.msra.mxu1 %v1462_v62  ;;  %1335 = vmatprep.subr.bf16.mxu0 %v1466_v1  ;;  %v1493_v62 = vld [vmem:[#allocation2 + $0x1b8] sm:$0xff]   ;;  %v619_v1 = vor.u32 %v618_v54, %v617_v51 }
  0x4f   :  { %1375 = vmatprep.subr.bf16.mxu1 %v1467_v6  ;;  %v1213_v6 = vcombine.high %v552_v42, %v1618_v34 }
  0x50   :  { %356 = vmatmul.mubr.bf16.gmra.mrb[4].mxu0 %v180_v13  ;;  %v869_v13 = vrot.slane %v1646_v63, 3 }
  0x51   :  { %529 = vmatmul.mubr.bf16.gmra.mrb[4].mxu1 %v1630_v38  ;;  %1336 = vmatpush3.bf16.msra.mxu0 %v1468_v7  ;;  %v822_v7 = vld [vmem:[%s1805_s0] sm:$0x88]  ;;  %v1073_v38 = vld [vmem:[%s1808_s3 + $0x10] sm:$0xff]  ;;  %v610_v15 = vshrl.u32 %v1213_v6, 16 }
  0x52   :  { %536 = vmatprep.mubr.bf16.mxu1 %v1646_v63  ;;  %1376 = vmatpush3.bf16.msra.mxu1 %v1469_v10  ;;  %v553_v10 = vld [vmem:[%s1805_s0 + $0x30] sm:$0xff]  ;;  %v1233_v12 = vcombine.high %v822_v7, %v1618_v34  ;;  %v1072_v63 = vld [vmem:[%s1808_s3 + $0x8] sm:$0xff]  ;;  %v870_v30 = vsel %vm860_vm1, %v865_v2, %v869_v13 }
  0x53   :  { %1377 = vmatprep.subr.bf16.mxu1 %v1471_v14  ;;  %1337 = vmatprep.subr.bf16.mxu0 %v1470_v11  ;;  %v1232_v11 = vcombine.low %v822_v7, %v1618_v34  ;;  %v1713_v14 = vcombine.high %v553_v10, %v553_v10 }
  0x54   :  { %363 = vmatprep.mubr.bf16.mxu0 %v204_v35  ;;  %1090 = vperm.xlu1 %1417, %v1073_v38   ;;  %v864_v21 = vrot.slane %v1233_v12, 3  ;;  %v621_v35 = vrot.slane %v189_v17, 2 }
  0x55   :  { %1338 = vmatpush3.bf16.msra.mxu0 %v1472_v16  ;;  %v613_v16 = vshll.u32 %v1213_v6, 16  ;;  %v861_v20 = vrot.slane %v1232_v11, 3  ;;  %v642_v34 = vshll.u32 %v1713_v14, 16  ;;  %1085 = vperm.xlu0 %1416, %v1072_v63  }
  0x56   :  { %1378 = vmatpush3.bf16.msra.mxu1 %v1473_v18  ;;  %1339 = vmatprep.subr.bf16.mxu0 %v1476_v22  ;;  %v598_v18 = vshrl.u32 %v1212_v3, 16  ;;  %v639_v22 = vshrl.u32 %v1713_v14, 16 }
  0x57   :  { %1379 = vmatprep.subr.bf16.mxu1 %v1477_v23  ;;  %v612_v23 = vrot.slane %v610_v15, 2  ;;  %v615_v24 = vrot.slane %v613_v16, 3  ;;  %v863_v29 = vsel %vm860_vm1, %v861_v20, %v862_v8  ;;  %v644_v47 = vrot.slane %v642_v34, 3 }
  0x58   :  { %364 = vmatmul.mubr.bf16.gmra.mrb[8].mxu0 %v196_v37  ;;  %v600_v25 = vrot.slane %v598_v18, 2  ;;  %v622_v37 = vrot.slane %v177_v5, 3  ;;  %1095 = vperm.xlu1 %1417, %v1074_v27   ;;  %v641_v46 = vrot.slane %v639_v22, 2  ;;  %v1076_v5 = vld [vmem:[%s1808_s3 + $0x28] sm:$0xff] }
  0x59   :  { %537 = vmatmul.mubr.bf16.gmra.mrb[8].mxu1 %v1651_v0  ;;  %1340 = vmatpush3.bf16.msra.mxu0 %v1478_v28  ;;  %v866_v28 = vsel %vm860_vm1, %v864_v21, %v865_v2  ;;  %v616_v31 = vor.u32 %v615_v24, %v612_v23 }
  0x5a   :  { %1380 = vmatpush3.bf16.msra.mxu1 %v1479_v32  ;;  %371 = vmatprep.mubr.bf16.mxu0 %v210_v40  ;;  %v604_v32 = vor.u32 %v603_v26, %v600_v25  ;;  %v1214_v40 = vcombine.low %v553_v10, %v553_v10  ;;  %v623_v17 = vor.u32 %v622_v37, %v621_v35 }
  0x5b   :  { %1381 = vmatprep.subr.bf16.mxu1 %v1481_v39  ;;  %1341 = vmatprep.subr.bf16.mxu0 %v1480_v33  ;;  %v628_v33 = vsel %vm596_vm2, %v619_v1, %v1702_v9  ;;  %v867_v39 = vrot.slane %v1651_v0, 3  ;;  %v873_v0 = vrot.slane %v1713_v14, 3  ;;  %v645_v45 = vor.u32 %v644_v47, %v641_v46 }
  0x5c   :  { %544 = vmatprep.mubr.bf16.mxu1 %v1195_v48  ;;  %1100 = vperm.xlu0 %1416, %v1075_v41   ;;  %v630_v48 = vshrl.u32 %v1214_v40, 16  ;;  %v871_v57 = vrot.slane %v1214_v40, 3 }
  0x5d   :  { %1342 = vmatpush3.bf16.msra.mxu0 %v1482_v43  ;;  %v620_v43 = vsel %vm596_vm2, %v616_v31, %v619_v1  ;;  %1105 = vperm.xlu1 %1417, %v1076_v5   ;;  %v868_v51 = vsel %vm860_vm1, %v862_v8, %v867_v39 }
  0x5e   :  { %1382 = vmatpush3.bf16.msra.mxu1 %v1483_v44  ;;  %1343 = vmatprep.subr.bf16.mxu0 %v1486_v50  ;;  %v608_v44 = vsel %vm596_vm2, %v604_v32, %v1694_v4  ;;  %v1077_v50 = vld [vmem:[%s1808_s3 + $0x30] sm:$0x3]  ;;  %v632_v54 = vrot.slane %v630_v48, 2  ;;  %v872_v58 = vsel %vm860_vm1, %v867_v39, %v871_v57 }
  0x5f   :  { %1383 = vmatprep.subr.bf16.mxu1 %v1487_v52  ;;  %v874_v52 = vsel %vm860_vm1, %v869_v13, %v873_v0 }
  0x60   :  { %372 = vmatmul.mubr.bf16.gmra.mrb[12].mxu0 %v207_v55  ;;  %1110 = vperm.xlu0 %1416, %v1077_v50  }
  0x61   :  { %545 = vmatmul.mubr.bf16.gmra.mrb[12].mxu1 %v1194_v49  ;;  %1344 = vmatpush3.bf16.msra.mxu0 %v1488_v53  ;;  %v633_v49 = vshll.u32 %v1214_v40, 16  ;;  %v624_v53 = vsel %vm596_vm2, %v1694_v4, %v623_v17 }
  0x62   :  { %1384 = vmatpush3.bf16.msra.mxu1 %v1489_v56  ;;  %1345 = vmatprep.subr.bf16.mxu0 %v1490_v59  ;;  %v646_v56 = vsel %vm596_vm2, %v1702_v9, %v645_v45 }
  0x63   :  { %1385 = vmatprep.subr.bf16.mxu1 %v1491_v60  ;;  %1011 = vmatprep.mubr.bf16.mxu1 %v866_v28  ;;  %v635_v55 = vrot.slane %v633_v49, 3 }
  0x64   :  { %783 = vmatprep.mubr.bf16.mxu0 %v620_v43 }
  0x65   :  { %1346 = vmatpush3.bf16.msra.mxu0 %v1492_v61  ;;  %v636_v59 = vor.u32 %v635_v55, %v632_v54 }
  0x66   :  { %1386 = vmatpush3.bf16.msra.mxu1 %v1493_v62 }
  0x67   :  { %v637_v60 = vsel %vm596_vm2, %v623_v17, %v636_v59 }
  0x68   :  { %784 = vmatmul.mubr.bf16.vlgmr.msra.gmra.mrb[16].mxu0 %v608_v44 }
  0x69   :  { %1012 = vmatmul.mubr.bf16.vlgmr.msra.gmra.mrb[16].mxu1 %v863_v29  ;;  %791 = vmatprep.mubr.bf16.mxu0 %v628_v33 }
  0x6a   :  { %1019 = vmatprep.mubr.bf16.mxu1 %v870_v30 }
  0x70   :  { %792 = vmatmul.mubr.bf16.gmra.mrb[20].mxu0 %v624_v53 }
  0x71   :  { %1020 = vmatmul.mubr.bf16.gmra.mrb[20].mxu1 %v868_v51  ;;  %799 = vmatprep.mubr.bf16.mxu0 %v646_v56 }
  0x72   :  { %1027 = vmatprep.mubr.bf16.mxu1 %v874_v52 }
  0x78   :  { %800 = vmatmul.mubr.bf16.gmra.mrb[24].mxu0 %v637_v60 }
  0x79   :  { %1028 = vmatmul.mubr.bf16.gmra.mrb[24].mxu1 %v872_v58  ;;  %807 = vmatprep.mubr.bf16.mxu0 %v645_v45 }
  0x7a   :  { %1035 = vmatprep.mubr.bf16.mxu1 %v873_v0 }
  0x80   :  { %808 = vmatmul.mubr.bf16.gmra.mrb[28].mxu0 %v636_v59 }
  0x81   :  { %1036 = vmatmul.mubr.bf16.gmra.mrb[28].mxu1 %v871_v57 }
 0x11b   :  { %v1267_v3 = vpop.f32.mrb[0].mxu0 }
 0x11c   :  { %v1307_v61 = vpop.f32.mrb[0].mxu1  ;;  %v1268_v6 = vpop.f32.mrb[1].mxu0 }
 0x11d   :  { %v1308_v62 = vpop.f32.mrb[1].mxu1  ;;  %v1269_v8 = vadd.f32 %v1268_v6, %v1267_v3  ;;  %v1270_v9 = vpop.f32.mrb[2].mxu0 }
 0x11e   :  { %v1309_v42 = vadd.f32 %v1308_v62, %v1307_v61  ;;  %v1310_v1 = vpop.f32.mrb[2].mxu1  ;;  %v1271_v36 = vpop.f32.mrb[3].mxu0 }
 0x11f   :  { %v1311_v2 = vpop.f32.mrb[3].mxu1  ;;  %v1272_v14 = vadd.f32 %v1271_v36, %v1270_v9  ;;  %v1081_v61 = vpop.permute.xlu0 %1080 }
 0x120   :  { %v1312_v4 = vadd.f32 %v1311_v2, %v1310_v1  ;;  %v523_v13 = vadd.f32 %v1309_v42, %v1269_v8  ;;  %v1765_v1 = vld [vmem:[#allocation4] ss:$0 sm:$0xff] }
 0x122   :  { %v526_v16 = vadd.f32 %v1312_v4, %v1272_v14 }
 0x123   :  { %v1273_v18 = vpop.f32.mrb[4].mxu0  ;;  %v1086_v14 = vpop.permute.xlu0 %1085 }
 0x124   :  { %v1313_v7 = vpop.f32.mrb[4].mxu1  ;;  %v1274_v19 = vpop.f32.mrb[5].mxu0 }
 0x125   :  { %v1314_v10 = vpop.f32.mrb[5].mxu1  ;;  %v1275_v21 = vadd.f32 %v1274_v19, %v1273_v18  ;;  %v1276_v22 = vpop.f32.mrb[6].mxu0 }
 0x126   :  { %v1315_v11 = vadd.f32 %v1314_v10, %v1313_v7  ;;  %v1316_v12 = vpop.f32.mrb[6].mxu1  ;;  %v1277_v63 = vpop.f32.mrb[7].mxu0 }
 0x127   :  { %v1317_v38 = vpop.f32.mrb[7].mxu1  ;;  %v1278_v26 = vadd.f32 %v1277_v63, %v1276_v22 }
 0x128   :  { %v1318_v15 = vadd.f32 %v1317_v38, %v1316_v12  ;;  %v531_v25 = vadd.f32 %v1315_v11, %v1275_v21 }
 0x12a   :  { %v1757_v29 = vadd.f32 %v1318_v15, %v1278_v26 }
 0x12b   :  { %v1279_v30 = vpop.f32.mrb[8].mxu0 }
 0x12c   :  { %v1319_v20 = vpop.f32.mrb[8].mxu1  ;;  %v1280_v31 = vpop.f32.mrb[9].mxu0 }
 0x12d   :  { %v1320_v34 = vpop.f32.mrb[9].mxu1  ;;  %v1281_v32 = vadd.f32 %v1280_v31, %v1279_v30  ;;  %v1282_v33 = vpop.f32.mrb[10].mxu0 }
 0x12e   :  { %v1321_v23 = vadd.f32 %v1320_v34, %v1319_v20  ;;  %v1322_v24 = vpop.f32.mrb[10].mxu1  ;;  %v1283_v35 = vpop.f32.mrb[11].mxu0 }
 0x12f   :  { %v1323_v27 = vpop.f32.mrb[11].mxu1  ;;  %v1284_v39 = vadd.f32 %v1283_v35, %v1282_v33  ;;  %v1091_v20 = vpop.permute.xlu1 %1090 }
 0x130   :  { %v1324_v28 = vadd.f32 %v1323_v27, %v1322_v24  ;;  %v1759_v37 = vadd.f32 %v1321_v23, %v1281_v32 }
 0x132   :  { %v1761_v43 = vadd.f32 %v1324_v28, %v1284_v39 }
 0x133   :  { %v1285_v5 = vpop.f32.mrb[12].mxu0 }
 0x134   :  { %v1325_v40 = vpop.f32.mrb[12].mxu1  ;;  %v1286_v0 = vpop.f32.mrb[13].mxu0 }
 0x135   :  { %v1326_v41 = vpop.f32.mrb[13].mxu1  ;;  %v1287_v17 = vadd.f32 %v1286_v0, %v1285_v5  ;;  %v1288_v48 = vpop.f32.mrb[14].mxu0 }
 0x136   :  { %v1327_v44 = vadd.f32 %v1326_v41, %v1325_v40  ;;  %v1328_v46 = vpop.f32.mrb[14].mxu1  ;;  %v1289_v49 = vpop.f32.mrb[15].mxu0 }
 0x137   :  { %v1329_v47 = vpop.f32.mrb[15].mxu1 }
 0x138   :  { %v1763_v50 = vadd.f32 %v1327_v44, %v1287_v17 }
 0x13b   :  { %v1347_v54 = vpop.f32.mrb[16].mxu0 }
 0x13c   :  { %v1387_v51 = vpop.f32.mrb[16].mxu1  ;;  %v1348_v56 = vpop.f32.mrb[17].mxu0 }
 0x13d   :  { %v1388_v45 = vpop.f32.mrb[17].mxu1  ;;  %v1349_v59 = vadd.f32 %v1348_v56, %v1347_v54  ;;  %v1350_v58 = vpop.f32.mrb[18].mxu0 }
 0x13e   :  { %v1389_v52 = vadd.f32 %v1388_v45, %v1387_v51  ;;  %v1390_v53 = vpop.f32.mrb[18].mxu1  ;;  %v1351_v60 = vpop.f32.mrb[19].mxu0 }
 0x13f   :  { %v1391_v55 = vpop.f32.mrb[19].mxu1  ;;  %v815_v62 = vadd.f32 %v1349_v59, %v523_v13  ;;  %v1352_v42 = vadd.f32 %v1351_v60, %v1350_v58 }
 0x140   :  { %v1392_v57 = vadd.f32 %v1391_v55, %v1390_v53 }
 0x141   :  { %v1043_v4 = vadd.f32 %v1389_v52, %v815_v62  ;;  %v816_v3 = vadd.f32 %v1352_v42, %v526_v16 }
 0x143   :  { %v1057_v9 = vadd.f32 %v1765_v1, %v1043_v4  ;;  %v1044_v10 = vadd.f32 %v1392_v57, %v816_v3  ;;  %v1353_v36 = vpop.f32.mrb[20].mxu0  ;;  %v1101_v3 = vpop.permute.xlu0 %1100 }
 0x144   :  { %v1393_v2 = vpop.f32.mrb[20].mxu1  ;;  %v1354_v12 = vpop.f32.mrb[21].mxu0 }
 0x145   :  { %v1394_v6 = vpop.f32.mrb[21].mxu1  ;;  %1064 = vst [vmem:[%s1809_s4] sm:$0xff] %v1057_v9  ;;  %v1058_v13 = vadd.f32 %v1765_v1, %v1044_v10  ;;  %v1113_v15 = vmul.f32 %v1081_v61, %v1057_v9  ;;  %v1355_v18 = vadd.f32 %v1354_v12, %v1353_v36  ;;  %v1356_v16 = vpop.f32.mrb[22].mxu0 }
 0x146   :  { %v1395_v7 = vadd.f32 %v1394_v6, %v1393_v2  ;;  %v1396_v8 = vpop.f32.mrb[22].mxu1  ;;  %v1357_v19 = vpop.f32.mrb[23].mxu0 }
 0x147   :  { %v1397_v11 = vpop.f32.mrb[23].mxu1  ;;  %1065 = vst [vmem:[%s1809_s4 + $0x8] sm:$0xff] %v1058_v13  ;;  %v817_v21 = vadd.f32 %v1355_v18, %v531_v25  ;;  %v1114_v22 = vmul.f32 %v1086_v14, %v1058_v13  ;;  %v1358_v34 = vadd.f32 %v1357_v19, %v1356_v16  ;;  %v1135_v63 = vmul.f32 %v1113_v15, %v1057_v9  ;;  %v1096_v25 = vpop.permute.xlu1 %1095 }
 0x148   :  { %v1398_v38 = vadd.f32 %v1397_v11, %v1396_v8 }
 0x149   :  { %v1045_v24 = vadd.f32 %v1395_v7, %v817_v21  ;;  %v1120_v26 = vadd.f32 %v1114_v22, %v1113_v15  ;;  %v1136_v27 = vmul.f32 %v1114_v22, %v1058_v13  ;;  %v818_v28 = vadd.f32 %v1358_v34, %v1757_v29 }
 0x14b   :  { %v1059_v33 = vadd.f32 %v1765_v1, %v1045_v24  ;;  %v1142_v35 = vadd.f32 %v1136_v27, %v1135_v63  ;;  %v1046_v39 = vadd.f32 %v1398_v38, %v818_v28  ;;  %v1359_v40 = vpop.f32.mrb[24].mxu0  ;;  %v1106_v36 = vpop.permute.xlu1 %1105 }
 0x14c   :  { %v1399_v23 = vpop.f32.mrb[24].mxu1  ;;  %v1360_v44 = vpop.f32.mrb[25].mxu0 }
 0x14d   :  { %v1400_v30 = vpop.f32.mrb[25].mxu1  ;;  %1066 = vst [vmem:[%s1809_s4 + $0x10] sm:$0xff] %v1059_v33  ;;  %v1060_v47 = vadd.f32 %v1765_v1, %v1046_v39  ;;  %v1115_v5 = vmul.f32 %v1091_v20, %v1059_v33  ;;  %v1361_v29 = vadd.f32 %v1360_v44, %v1359_v40  ;;  %v1362_v0 = vpop.f32.mrb[26].mxu0 }
 0x14e   :  { %v1401_v31 = vadd.f32 %v1400_v30, %v1399_v23  ;;  %v1402_v32 = vpop.f32.mrb[26].mxu1  ;;  %v1363_v17 = vpop.f32.mrb[27].mxu0 }
 0x14f   :  { %v1403_v41 = vpop.f32.mrb[27].mxu1  ;;  %1067 = vst [vmem:[%s1809_s4 + $0x18] sm:$0xff] %v1060_v47  ;;  %v1121_v48 = vadd.f32 %v1120_v26, %v1115_v5  ;;  %v1137_v49 = vmul.f32 %v1115_v5, %v1059_v33  ;;  %v819_v51 = vadd.f32 %v1361_v29, %v1759_v37  ;;  %v1116_v45 = vmul.f32 %v1096_v25, %v1060_v47  ;;  %v1111_v20 = vpop.permute.xlu0 %1110 }
 0x150   :  { %v1404_v46 = vadd.f32 %v1403_v41, %v1402_v32  ;;  %v1364_v52 = vadd.f32 %v1363_v17, %v1362_v0 }
 0x151   :  { %v1143_v54 = vadd.f32 %v1142_v35, %v1137_v49  ;;  %v1047_v55 = vadd.f32 %v1401_v31, %v819_v51  ;;  %v1122_v56 = vadd.f32 %v1121_v48, %v1116_v45  ;;  %v1138_v57 = vmul.f32 %v1116_v45, %v1060_v47 }
 0x152   :  { %v820_v58 = vadd.f32 %v1364_v52, %v1761_v43 }
 0x153   :  { %v1061_v62 = vadd.f32 %v1765_v1, %v1047_v55  ;;  %v1144_v42 = vadd.f32 %v1143_v54, %v1138_v57  ;;  %v1365_v2 = vpop.f32.mrb[28].mxu0 }
 0x154   :  { %v1405_v53 = vpop.f32.mrb[28].mxu1  ;;  %v1048_v6 = vadd.f32 %v1404_v46, %v820_v58  ;;  %v1366_v37 = vpop.f32.mrb[29].mxu0 }
 0x155   :  { %v1406_v59 = vpop.f32.mrb[29].mxu1  ;;  %1068 = vst [vmem:[%s1809_s4 + $0x20] sm:$0xff] %v1061_v62  ;;  %v1117_v7 = vmul.f32 %v1101_v3, %v1061_v62  ;;  %v1367_v8 = vadd.f32 %v1366_v37, %v1365_v2  ;;  %v1368_v9 = vpop.f32.mrb[30].mxu0 }
 0x156   :  { %v1407_v60 = vadd.f32 %v1406_v59, %v1405_v53  ;;  %v1408_v61 = vpop.f32.mrb[30].mxu1  ;;  %v1062_v10 = vadd.f32 %v1765_v1, %v1048_v6  ;;  %v1369_v43 = vpop.f32.mrb[31].mxu0 }
 0x157   :  { %v1409_v4 = vpop.f32.mrb[31].mxu1  ;;  %v1123_v11 = vadd.f32 %v1122_v56, %v1117_v7  ;;  %v1139_v12 = vmul.f32 %v1117_v7, %v1061_v62  ;;  %v821_v14 = vadd.f32 %v1367_v8, %v1763_v50 }
 0x158   :  { %1069 = vst [vmem:[%s1809_s4 + $0x28] sm:$0xff] %v1062_v10  ;;  %v1118_v38 = vmul.f32 %v1106_v36, %v1062_v10 }
 0x159   :  { %v1145_v13 = vadd.f32 %v1144_v42, %v1139_v12  ;;  %v1049_v15 = vadd.f32 %v1407_v60, %v821_v14 }
 0x15a   :  { %v1124_v18 = vadd.f32 %v1123_v11, %v1118_v38  ;;  %v1140_v16 = vmul.f32 %v1118_v38, %v1062_v10 }
 0x15b   :  { %v1063_v19 = vadd.f32 %v1765_v1, %v1049_v15 }
 0x15c   :  { %v1146_v21 = vadd.f32 %v1145_v13, %v1140_v16 }
 0x15d   :  { %1070 = vst [vmem:[%s1809_s4 + $0x30] sm:$0x3] %v1063_v19  ;;  %v1119_v22 = vmul.f32 %v1111_v20, %v1063_v19 }
 0x15f   :  { %v1126_v50 = vsel %vm1125_vm3, %v1119_v22, 0.0  ;;  %v1141_v34 = vmul.f32 %v1119_v22, %v1063_v19 }
 0x160   :  { %v1127_v63 = vadd.f32 %v1126_v50, %v1124_v18 }
 0x161   :  { %v1147_v23 = vsel %vm1125_vm3, %v1141_v34, 0.0 }
 0x162   :  { %v1128_v24 = vrot.slane %v1127_v63, 4  ;;  %v1148_v26 = vadd.f32 %v1147_v23, %v1146_v21 }
 0x164   :  { %v1129_v27 = vadd.f32 %v1128_v24, %v1127_v63  ;;  %v1149_v28 = vrot.slane %v1148_v26, 4 }
 0x166   :  { %v1130_v30 = vrot.slane %v1129_v27, 2  ;;  %v1150_v31 = vadd.f32 %v1149_v28, %v1148_v26 }
 0x168   :  { %v1131_v32 = vadd.f32 %v1130_v30, %v1129_v27  ;;  %v1151_v1 = vrot.slane %v1150_v31, 2 }
 0x16a   :  { %v1132_v33 = vrot.slane %v1131_v32, 1  ;;  %v1152_v35 = vadd.f32 %v1151_v1, %v1150_v31 }
 0x16c   :  { %v1133_v39 = vadd.f32 %v1132_v33, %v1131_v32  ;;  %v1153_v40 = vrot.slane %v1152_v35, 1 }
 0x16e   :  { %1134 = vst [vmem:[%s1810_s5] sm:$0x1] %v1133_v39  ;;  %v1154_v41 = vadd.f32 %v1153_v40, %v1152_v35 }
 0x170   :  { %1155 = vst [vmem:[%s1811_s6] sm:$0x1] %v1154_v41 }
 0x171   :  { %1168 = vsyncpa [#allocation3], 1 }
 0x172   :  { %1169 = vsyncpa [#allocation5], 1 }

// kernel: front_end_forward.3
= control target key start
LH: loop header
LB: loop body
LE: loop exit
PB: predicated region body
PF: predicated region fallthrough
CT: control target
= control target key end

     0   :  { %s7839_s0 = inlined_call_operand.vmem [shape: f32[2,2048], index: 0, kind: input, shape index: {}]   ;;  %s7840_s1 = inlined_call_operand.vmem [shape: f32[1,2048], index: 1, kind: input, shape index: {}]   ;;  %s7841_s2 = inlined_call_operand.vmem [shape: f32[1,2048], index: 2, kind: input, shape index: {}]   ;;  %s7842_s3 = inlined_call_operand.vmem [shape: f32[1,2048], index: 3, kind: input, shape index: {}]   ;;  %s7843_s4 = inlined_call_operand.hbm [shape: bf16[2048,1024], index: 4, kind: input, shape index: {}]   ;;  %s7844_s5 = inlined_call_operand.hbm [shape: f32[1,1024], index: 5, kind: input, shape index: {}]   ;;  %s7845_s6 = inlined_call_operand.hbm [shape: f32[1,1024], index: 6, kind: input, shape index: {}]   ;;  %s7846_s7 = inlined_call_operand.hbm [shape: f32[1,1024], index: 7, kind: input, shape index: {}]   ;;  %s7847_s8 = inlined_call_operand.hbm [shape: f32[2,1024], index: 8, kind: output, shape index: {}]  }
   0x1   :  { %7859 = sst [smem:[#allocation21_spill]] %s7843_s4 }
   0x2   :  { %7860 = sst [smem:[#allocation22_spill]] %s7844_s5 }
   0x3   :  { %7861 = sst [smem:[#allocation23_spill]] %s7847_s8 }
   0x4   :  { %13 = vsyncpa [#allocation3], 0 }
   0x5   :  { %15 = vsyncpa [#allocation3 + $0x1], 0 }
   0x6   :  { %16 = vsyncpa [#allocation6], 0 }
   0x7   :  { %18 = vsyncpa [#allocation6 + $0x1], 0 }
   0x8   :  { %19 = vsyncpa [#allocation9], 0 }
   0x9   :  { %21 = vsyncpa [#allocation9 + $0x1], 0 }
   0xa   :  { %22 = vsyncpa [#allocation4], 0 }
   0xb   :  { %24 = vsyncpa [#allocation4 + $0x1], 0  ;;  %s6761_s27 = smov 0   ;;  %s6763_s28 = smov 0  }
   0xc   :  { %s6765_s29 = smov 0   ;;  %s6767_s30 = smov 0  }
   0xd LB: > { %7862 = sst [smem:[#allocation15_spill]] %s6693_s27  ;;  %s6782_s9 = sadd.s32 4294967295, %s6705_s30   ;;  %s6705_s30 = sphi %s6767_s30, %s7888_s30   ;;  %s6701_s29 = sphi %s6765_s29, %s7890_s29   ;;  %s6697_s28 = sphi %s6763_s28, %s7892_s28   ;;  %s6693_s27 = sphi %s6761_s27, %s7891_s27  }
   0xe   : > { %7863 = sst [smem:[#allocation16_spill]] %s6701_s29  ;;  %s5066_s10 = sadd.s32 4294967294, %s6705_s30  }
   0xf   : > { %7864 = sst [smem:[#allocation17_spill]] %s6705_s30  ;;  %s6786_s11 = sadd.s32 1, %s6705_s30  }
  0x10   : > { %7865 = sst [smem:[#allocation18_spill]] %s6786_s11  ;;  %s121_s12 = sadd.s32 1, %s6701_s29 }
  0x11   : > { %s118_s13 = ssub.s32 %s6705_s30, %s6786_s11  ;;  %p128_p0 = scmp.ne.s32.totalorder %s6701_s29, %s6697_s28 }
  0x12   : > { %p119_p1 = scmp.eq.s32.totalorder %s118_s13, 0  ;;  %p129_p2 = scmp.eq.s32.totalorder %s6705_s30, 0 }
  0x13   : > { %p134_p3 = scmp.ne.s32.totalorder %s6697_s28, %s6693_s27  ;;  %p135_p4 = scmp.eq.s32.totalorder %s6782_s9, 0 }
  0x14   : > { %s6798_s14 = scalar_select %p119_p1, %s6701_s29, %s121_s12  }
  0x15   : > { %p130_p5 = por %p129_p2, %p128_p0  ;;  %p6800_p6 = por %p135_p4, %p134_p3 }
  0x16   : > { %7866 = sst [smem:[#allocation19_spill]] %s6798_s14  ;;  %p236_p7 = scmp.eq.s32.totalorder %s6782_s9, 1 }
  0x17   : > { %s7867_s15 = scalar_select %p6800_p6, 1, 0 }
  0x18   : > { %p242_p8 = scmp.eq.s32.totalorder %s5066_s10, 1  ;;  %p5696_p10 = scmp.lt.s32.totalorder %s6705_s30, 2 }
  0x19   : > { %p6807_p11 = por %p236_p7, %p128_p0  ;;  %s6816_s18 = sand.u32 1, %s6701_s29  }
  0x1a   : > { %p6811_p12 = por %p242_p8, %p134_p3  ;;  %p6818_p13 = pnand %p5696_p10, %p130_p5 }
  0x1b   : > { %s7868_s16 = scalar_select %p6807_p11, 1, 0 }
  0x1c   : > { %s7869_s17 = scalar_select %p6811_p12, 1, 0 }
  0x1d   : > { %s7871_s19 = scalar_select %p6818_p13, 1, 0 }
  0x1e   : > { %7870 = sst [smem:[#allocation20_spill]] %s7869_s17  ;;  %s295_s20 = sand.u32 1, %s6705_s30  }
  0x1f   : > { %s6824_s21 = sshll.u32 %s6816_s18, 2  ;;  %s6827_s22 = sshll.u32 %s6705_s30, 6 }
  0x20   : > { %s7872_s5 = sld [smem:[#allocation22_spill]]  ;;  %s299_s26 = scalar_lea.vmem [#allocation5], %s6824_s21 }
  0x21   : > { %s307_s10 = sshll.u32 %s299_s26, 4  ;;  %s6839_s12 = scalar_lea.sflag [#allocation6], %s295_s20  ;;  %s6836_s10 = int_to_ptr.vmem [resolvable:$true] %s307_s10 }
  0x22   : > { %p6845_p2 = pneg %p6818_p13 }
  0x26   : > { %s6833_s25 = scalar_lea.hbm %s7872_s5, %s6827_s22  ;;  %s6516_s26 = scalar_lea.hbm %s7872_s5, 128 }
  0x27   : > { %s6511_s13 = scalar_lea.hbm %s6833_s25, 64  ;;  %p6517_p5 = scmp.lt.u32.totalorder %s6833_s25, %s7872_s5 }
  0x28   : > { %p6512_p1 = scmp.ne.s32.totalorder %s6833_s25, %s6511_s13  ;;  %p6518_p7 = scmp.lt.u32.totalorder %s6516_s26, %s6511_s13 }
  0x29   : > { %p6520_p10 = scmp.lt.u32.totalorder %s6511_s13, %s6833_s25 }
  0x2a   : > { %p6514_p3 = pnand %p6845_p2, %p6512_p1  ;;  %p6519_p8 = por %p6518_p7, %p6517_p5 }
  0x2c   : > { %p6515_p4 = pneg %p6514_p3  ;;  %p6521_p9 = por %p6520_p10, %p6519_p8 }
  0x2e   : > { %p6522_p0 = pnand %p6521_p9, %p6515_p4 }
  0x30   : > { %6525 = shalt.err (!%p6522_p0)
}
  0x31   : > { %s6526_s20 = scalar_lea.vmem %s6836_s10, 64  ;;  %s6707_s23 = smov [#allocation5]  }
  0x32   : > { %p6527_p1 = scmp.ne.s32.totalorder %s6836_s10, %s6526_s20  ;;  %s6531_s24 = sshll.u32 %s6707_s23, 4  ;;  %s6532_s24 = int_to_ptr.vmem [resolvable:$false] %s6531_s24 }
  0x33   : > { %s6533_s29 = scalar_lea.vmem %s6532_s24, 128  ;;  %p6534_p11 = scmp.lt.s32.totalorder %s6836_s10, %s6532_s24 }
  0x34   : > { %p6529_p3 = pnand %p6527_p1, %p6845_p2  ;;  %p6535_p6 = scmp.lt.s32.totalorder %s6533_s29, %s6526_s20 }
  0x36   : > { %p6530_p12 = pneg %p6529_p3  ;;  %p6536_p5 = por %p6535_p6, %p6534_p11 }
  0x38   : > { %p6537_p7 = pnand %p6536_p5, %p6530_p12 }
  0x3a   : > { %6540 = shalt.err (!%p6537_p7)
}
  0x3b   : > { %5685 = dma.hbm_to_vmem [thread:$0]  (!%p6818_p13), %s6833_s25, 64, %s6836_s10, %s6839_s12  }
  0x3c   : > { %p350_p9 = scmp.lt.s32.totalorder %s6705_s30, 3  ;;  %s5069_s11 = sshll.u32 %s6816_s18, 12 }
  0x3d   : > { %s5604_s13 = sshll.u32 %s6705_s30, 8  ;;  %p7874_p0 = scmp.ge.s32.totalorder %s6705_s30, 1 }
  0x3e   : > { %s7876_s4 = sld [smem:[#allocation21_spill]]  ;;  %s278_s29 = scalar_lea.vmem [#allocation2], %s5069_s11 }
  0x3f   : > { %p6874_p4 = pnand %p7874_p0, %p350_p9  ;;  %s285_s5 = sshll.u32 %s278_s29, 4  ;;  %s6883_s5 = int_to_ptr.vmem [resolvable:$true] %s285_s5 }
  0x40   : > { %s275_s25 = scalar_lea.sflag [#allocation3], %s6816_s18 }
  0x41   : > { %s7875_s26 = scalar_select %p6874_p4, 1, 0 }
  0x44   : > { %s6881_s24 = scalar_lea.hbm %s7876_s4, %s5604_s13  ;;  %s6546_s20 = scalar_lea.hbm %s7876_s4, 131072 }
  0x45   : > { %s6541_s10 = scalar_lea.hbm %s6881_s24, 65536  ;;  %p6547_p8 = scmp.lt.u32.totalorder %s6881_s24, %s7876_s4 }
  0x46   : > { %p6542_p6 = scmp.ne.s32.totalorder %s6881_s24, %s6541_s10  ;;  %p6548_p10 = scmp.lt.u32.totalorder %s6546_s20, %s6541_s10 }
  0x47   : > { %p6550_p3 = scmp.lt.u32.totalorder %s6541_s10, %s6881_s24 }
  0x48   : > { %p6544_p11 = pnand %p6542_p6, %p6845_p2  ;;  %p6549_p1 = por %p6548_p10, %p6547_p8 }
  0x4a   : > { %p6545_p12 = pneg %p6544_p11  ;;  %p6551_p5 = por %p6550_p3, %p6549_p1 }
  0x4c   : > { %p6552_p7 = pnand %p6551_p5, %p6545_p12 }
  0x4e   : > { %6555 = shalt.err (!%p6552_p7)
}
  0x4f   : > { %s6556_s11 = scalar_lea.vmem %s6883_s5, 65536  ;;  %s6708_s30 = smov [#allocation2]  }
  0x50   : > { %p6557_p9 = scmp.ne.s32.totalorder %s6883_s5, %s6556_s11  ;;  %s6561_s17 = sshll.u32 %s6708_s30, 4  ;;  %s6562_s17 = int_to_ptr.vmem [resolvable:$false] %s6561_s17 }
  0x51   : > { %s6563_s29 = scalar_lea.vmem %s6562_s17, 131072  ;;  %p6564_p11 = scmp.lt.s32.totalorder %s6883_s5, %s6562_s17 }
  0x52   : > { %p6559_p0 = pnand %p6557_p9, %p6845_p2  ;;  %p6565_p4 = scmp.lt.s32.totalorder %s6563_s29, %s6556_s11 }
  0x54   : > { %p6560_p6 = pneg %p6559_p0  ;;  %p6566_p8 = por %p6565_p4, %p6564_p11 }
  0x56   : > { %p6567_p10 = pnand %p6566_p8, %p6560_p6 }
  0x58   : > { %6570 = shalt.err (!%p6567_p10)
}
  0x59   : > { %s6709_s10 = smov 512   ;;  %s6710_s20 = smov 256  }
  0x5a   : > { %s6711_s13 = smov 16   ;;  %s6913_s11 = scalar_lea.hbm %s7845_s6, %s6827_s22 }
  0x5b   : > { %5682 = dma.hbm_to_vmem [thread:$0]  (!%p6818_p13), %s6881_s24, 65536, %s6883_s5, %s275_s25, %s6709_s10, %s6710_s20, %s6711_s13  }
  0x5c   : > { %s318_s17 = scalar_lea.vmem [#allocation7], %s6824_s21  ;;  %s6571_s4 = scalar_lea.hbm %s6913_s11, 64 }
  0x5d   : > { %s326_s29 = sshll.u32 %s318_s17, 4  ;;  %p6572_p4 = scmp.ne.s32.totalorder %s6913_s11, %s6571_s4  ;;  %s327_s29 = int_to_ptr.vmem [resolvable:$true] %s326_s29 }
  0x5e   : > { %s6576_s5 = scalar_lea.hbm %s7845_s6, 128  ;;  %p6577_p3 = scmp.lt.u32.totalorder %s6913_s11, %s7845_s6 }
  0x5f   : > { %p6574_p12 = pnand %p6572_p4, %p6845_p2  ;;  %p6578_p5 = scmp.lt.u32.totalorder %s6576_s5, %s6571_s4 }
  0x60   : > { %p6580_p9 = scmp.lt.u32.totalorder %s6571_s4, %s6913_s11 }
  0x61   : > { %p6575_p1 = pneg %p6574_p12  ;;  %p6579_p7 = por %p6578_p5, %p6577_p3 }
  0x63   : > { %p6581_p0 = por %p6580_p9, %p6579_p7 }
  0x65   : > { %p6582_p6 = pnand %p6581_p0, %p6575_p1 }
  0x67   : > { %6585 = shalt.err (!%p6582_p6)
}
  0x68   : > { %s6586_s10 = scalar_lea.vmem %s327_s29, 64  ;;  %s6712_s20 = smov [#allocation7]  }
  0x69   : > { %p6587_p11 = scmp.ne.s32.totalorder %s327_s29, %s6586_s10  ;;  %s6591_s13 = sshll.u32 %s6712_s20, 4  ;;  %s6592_s13 = int_to_ptr.vmem [resolvable:$false] %s6591_s13 }
  0x6a   : > { %s6593_s8 = scalar_lea.vmem %s6592_s13, 128  ;;  %p6594_p4 = scmp.lt.s32.totalorder %s327_s29, %s6592_s13 }
  0x6b   : > { %p6589_p8 = pnand %p6587_p11, %p6845_p2  ;;  %p6595_p12 = scmp.lt.s32.totalorder %s6593_s8, %s6586_s10 }
  0x6d   : > { %p6590_p10 = pneg %p6589_p8  ;;  %p6596_p13 = por %p6595_p12, %p6594_p4 }
  0x6f   : > { %p6597_p3 = pnand %p6596_p13, %p6590_p10 }
  0x71   : > { %6600 = shalt.err (!%p6597_p3)
}
  0x72   : > { %p7877_p5 = scmp.ne.s32.totalorder %s7871_s19, 0  ;;  %s6938_s23 = scalar_lea.hbm %s7846_s7, %s6827_s22 }
  0x73   : > { %s337_s30 = scalar_lea.vmem [#allocation8], %s6824_s21  ;;  %s334_s5 = scalar_lea.sflag [#allocation9], %s6816_s18 }
  0x74   : > { %5688 = dma.hbm_to_vmem [thread:$0]  (!%p7877_p5), %s6913_s11, 64, %s327_s29, %s6839_s12  }
  0x75   : > { %s345_s17 = sshll.u32 %s337_s30, 4  ;;  %s6601_s24 = scalar_lea.hbm %s6938_s23, 64  ;;  %s346_s17 = int_to_ptr.vmem [resolvable:$true] %s345_s17 }
  0x76   : > { %p6602_p13 = scmp.ne.s32.totalorder %s6938_s23, %s6601_s24  ;;  %s6606_s11 = scalar_lea.hbm %s7846_s7, 128 }
  0x77   : > { %p6607_p9 = scmp.lt.u32.totalorder %s6938_s23, %s7846_s7  ;;  %p6608_p0 = scmp.lt.u32.totalorder %s6606_s11, %s6601_s24 }
  0x78   : > { %p6604_p1 = pnand %p6602_p13, %p6845_p2  ;;  %p6610_p11 = scmp.lt.u32.totalorder %s6601_s24, %s6938_s23 }
  0x79   : > { %p6609_p6 = por %p6608_p0, %p6607_p9 }
  0x7a   : > { %p6605_p7 = pneg %p6604_p1 }
  0x7b   : > { %p6611_p8 = por %p6610_p11, %p6609_p6 }
  0x7d   : > { %p6612_p10 = pnand %p6611_p8, %p6605_p7 }
  0x7f   : > { %6615 = shalt.err (!%p6612_p10)
}
  0x80   : > { %s6616_s18 = scalar_lea.vmem %s346_s17, 64  ;;  %s6713_s21 = smov [#allocation8]  }
  0x81   : > { %p6617_p4 = scmp.ne.s32.totalorder %s346_s17, %s6616_s18  ;;  %s6621_s10 = sshll.u32 %s6713_s21, 4  ;;  %s6622_s10 = int_to_ptr.vmem [resolvable:$false] %s6621_s10 }
  0x82   : > { %s6623_s20 = scalar_lea.vmem %s6622_s10, 128  ;;  %p6624_p13 = scmp.lt.s32.totalorder %s346_s17, %s6622_s10 }
  0x83   : > { %p6619_p12 = pnand %p6617_p4, %p6845_p2  ;;  %p6625_p1 = scmp.lt.s32.totalorder %s6623_s20, %s6616_s18 }
  0x85   : > { %p6620_p3 = pneg %p6619_p12  ;;  %p6626_p5 = por %p6625_p1, %p6624_p13 }
  0x87   : > { %p6627_p0 = pnand %p6626_p5, %p6620_p3 }
  0x89   : > { %6630 = shalt.err (!%p6627_p0)
}
  0x8a   : > { %p7878_p9 = scmp.ne.s32.totalorder %s7871_s19, 0  ;;  %p7879_p7 = scmp.ne.s32.totalorder %s7875_s26, 0 }
  0x8b   : > { %s6962_s14 = sand.u32 (!%p7879_p7), 1, %s6697_s28   ;;  %p7880_p2 = scmp.ne.s32.totalorder (!%p7879_p7), %s7867_s15, 0 }
  0x8c   : > { %5691 = dma.hbm_to_vmem [thread:$0]  (!%p7878_p9), %s6938_s23, 64, %s346_s17, %s334_s5  }
  0x8d   : > { %354 = sbr.rel (%p7879_p7) target bundleno = 961 (0x3c1), region = 52  ;;  %s5082_s13 = sshll.u32 (!%p7879_p7), %s6962_s14, 12 }
  0x8e   : > { %s357_s8 = scalar_lea.sflag (!%p7879_p7), [#allocation3], %s6962_s14  ;;  %s6966_s4 = scalar_lea.vmem (!%p7879_p7), [#allocation2], %s5082_s13 }
  0x94   : > { %6676 = dma.done.wait (%p7880_p2), %s357_s8, 65536  }
  0x95   : > { %6678 = vsyncadd (%p7880_p2), %s357_s8, 4294901760  ;;  %s365_s19 = sand.u32 1, %s6782_s9   ;;  %s6974_s26 = sshll.u32 %s6962_s14, 2 }
  0x96   : > { %s366_s27 = scalar_lea.sflag [#allocation6], %s365_s19  ;;  %s369_s23 = scalar_lea.vmem [#allocation5], %s6974_s26 }
  0x97   : > { %6680 = dma.done.wait (%p7880_p2), %s366_s27, 128  }
  0x98   : > { %6682 = vsyncadd (%p7880_p2), %s366_s27, 4294967168  ;;  %s378_s30 = scalar_lea.vmem [#allocation7], %s6974_s26  ;;  %s384_s17 = scalar_lea.sflag [#allocation9], %s6962_s14 }
  0x99   : > { %s387_s5 = scalar_lea.vmem [#allocation8], %s6974_s26 }
  0x9a   : > { %6684 = dma.done.wait (%p7880_p2), %s384_s17, 64  }
  0x9b   : > { %6686 = vsyncadd (%p7880_p2), %s384_s17, 4294967232  ;;  %v5734_v0 = vld [vmem:[%s6966_s4 + $0x4] ss:$16 sps:$4 sm:$0xff]   ;;  %v5736_v1 = vld [vmem:[%s6966_s4 + $0xc] ss:$16 sps:$4 sm:$0xff]   ;;  %v448_v36 = vlaneseq  ;;  %vm4742_vm4 = vcmask 1041408  }
  0x9c   : > { %4086 = vmatprep.subr.bf16.mxu0 %v5734_v0  ;;  %v5738_v2 = vld [vmem:[%s6966_s4] ss:$16 sps:$4 sm:$0xff]   ;;  %v5739_v3 = vld [vmem:[%s6966_s4 + $0x8] ss:$16 sps:$4 sm:$0xff]   ;;  %4414 = vmatprep.subr.bf16.mxu1 %v5736_v1  ;;  %v5740_v4 = vld [vmem:[%s6966_s4 + $0x24] ss:$16 sps:$4 sm:$0xff]  }
  0x9d   : > { %4087 = vmatpush1.bf16.msra.mxu0 %v5738_v2  ;;  %4415 = vmatpush1.bf16.msra.mxu1 %v5739_v3  ;;  %v5742_v5 = vld [vmem:[%s6966_s4 + $0x2c] ss:$16 sps:$4 sm:$0xff]   ;;  %v5744_v6 = vld [vmem:[%s6966_s4 + $0x20] ss:$16 sps:$4 sm:$0xff]   ;;  %v5745_v7 = vld [vmem:[%s6966_s4 + $0x28] ss:$16 sps:$4 sm:$0xff]  }
  0x9e   : > { %4088 = vmatprep.subr.bf16.mxu0 %v5740_v4  ;;  %4416 = vmatprep.subr.bf16.mxu1 %v5742_v5  ;;  %v5746_v8 = vld [vmem:[%s6966_s4 + $0x44] ss:$16 sps:$4 sm:$0xff]   ;;  %v5748_v9 = vld [vmem:[%s6966_s4 + $0x4c] ss:$16 sps:$4 sm:$0xff]   ;;  %v5750_v10 = vld [vmem:[%s6966_s4 + $0x40] ss:$16 sps:$4 sm:$0xff]  }
  0x9f   : > { %v5751_v11 = vld [vmem:[%s6966_s4 + $0x48] ss:$16 sps:$4 sm:$0xff]   ;;  %v5752_v12 = vld [vmem:[%s6966_s4 + $0x64] ss:$16 sps:$4 sm:$0xff]   ;;  %v5754_v13 = vld [vmem:[%s6966_s4 + $0x6c] ss:$16 sps:$4 sm:$0xff]  }
  0xa0   : > { %v5756_v14 = vld [vmem:[%s6966_s4 + $0x60] ss:$16 sps:$4 sm:$0xff]   ;;  %v5757_v15 = vld [vmem:[%s6966_s4 + $0x68] ss:$16 sps:$4 sm:$0xff]   ;;  %v5758_v16 = vld [vmem:[%s6966_s4 + $0x84] ss:$16 sps:$4 sm:$0xff]  }
  0xa1   : > { %4089 = vmatpush1.bf16.msra.mxu0 %v5744_v6  ;;  %4417 = vmatpush1.bf16.msra.mxu1 %v5745_v7  ;;  %v5760_v17 = vld [vmem:[%s6966_s4 + $0x8c] ss:$16 sps:$4 sm:$0xff]   ;;  %v5762_v18 = vld [vmem:[%s6966_s4 + $0x80] ss:$16 sps:$4 sm:$0xff]   ;;  %v5763_v19 = vld [vmem:[%s6966_s4 + $0x88] ss:$16 sps:$4 sm:$0xff]  }
  0xa2   : > { %4090 = vmatprep.subr.bf16.mxu0 %v5746_v8  ;;  %4418 = vmatprep.subr.bf16.mxu1 %v5748_v9  ;;  %v5764_v20 = vld [vmem:[%s6966_s4 + $0xa4] ss:$16 sps:$4 sm:$0xff]   ;;  %v5766_v21 = vld [vmem:[%s6966_s4 + $0xac] ss:$16 sps:$4 sm:$0xff]   ;;  %v5768_v22 = vld [vmem:[%s6966_s4 + $0xa0] ss:$16 sps:$4 sm:$0xff]  }
  0xa3   : > { %v5769_v23 = vld [vmem:[%s6966_s4 + $0xa8] ss:$16 sps:$4 sm:$0xff]   ;;  %v5770_v24 = vld [vmem:[%s6966_s4 + $0xc4] ss:$16 sps:$4 sm:$0xff]   ;;  %v5772_v25 = vld [vmem:[%s6966_s4 + $0xcc] ss:$16 sps:$4 sm:$0xff]  }
  0xa4   : > { %v5774_v26 = vld [vmem:[%s6966_s4 + $0xc0] ss:$16 sps:$4 sm:$0xff]   ;;  %v5775_v27 = vld [vmem:[%s6966_s4 + $0xc8] ss:$16 sps:$4 sm:$0xff]   ;;  %v5776_v28 = vld [vmem:[%s6966_s4 + $0xe4] ss:$16 sps:$4 sm:$0xff]  }
  0xa5   : > { %4091 = vmatpush1.bf16.msra.mxu0 %v5750_v10  ;;  %4419 = vmatpush1.bf16.msra.mxu1 %v5751_v11  ;;  %v5778_v29 = vld [vmem:[%s6966_s4 + $0xec] ss:$16 sps:$4 sm:$0xff]   ;;  %v5780_v30 = vld [vmem:[%s6966_s4 + $0xe0] ss:$16 sps:$4 sm:$0xff]   ;;  %v5781_v31 = vld [vmem:[%s6966_s4 + $0xe8] ss:$16 sps:$4 sm:$0xff]  }
  0xa6   : > { %4092 = vmatprep.subr.bf16.mxu0 %v5752_v12  ;;  %4420 = vmatprep.subr.bf16.mxu1 %v5754_v13  ;;  %v5782_v32 = vld [vmem:[%s6966_s4 + $0x104] ss:$16 sps:$4 sm:$0xff]   ;;  %v5784_v33 = vld [vmem:[%s6966_s4 + $0x10c] ss:$16 sps:$4 sm:$0xff]   ;;  %v5786_v34 = vld [vmem:[%s6966_s4 + $0x100] ss:$16 sps:$4 sm:$0xff]  }
  0xa7   : > { %v5787_v35 = vld [vmem:[%s6966_s4 + $0x108] ss:$16 sps:$4 sm:$0xff]   ;;  %v5788_v37 = vld [vmem:[%s6966_s4 + $0x124] ss:$16 sps:$4 sm:$0xff]   ;;  %v5790_v38 = vld [vmem:[%s6966_s4 + $0x12c] ss:$16 sps:$4 sm:$0xff]  }
  0xa8   : > { %v5792_v39 = vld [vmem:[%s6966_s4 + $0x120] ss:$16 sps:$4 sm:$0xff]   ;;  %v7027_v40 = vshrl.u32 %v448_v36, 7  ;;  %v6714_v41 = vmov 1983009808   ;;  %s5608_s26 = sshll.u32 %s6782_s9, 7 }
  0xa9   : > { %4093 = vmatpush1.bf16.msra.mxu0 %v5756_v14  ;;  %4421 = vmatpush1.bf16.msra.mxu1 %v5757_v15  ;;  %v515_v42 = vunpack.c.l.s4 %v6714_v41  ;;  %v5793_v43 = vld [vmem:[%s6966_s4 + $0x128] ss:$16 sps:$4 sm:$0xff]   ;;  %v5794_v44 = vld [vmem:[%s6966_s4 + $0x144] ss:$16 sps:$4 sm:$0xff]   ;;  %v5796_v45 = vld [vmem:[%s6966_s4 + $0x14c] ss:$16 sps:$4 sm:$0xff]  }
  0xaa   : > { %4094 = vmatprep.subr.bf16.mxu0 %v5758_v16  ;;  %4422 = vmatprep.subr.bf16.mxu1 %v5760_v17  ;;  %v5798_v46 = vld [vmem:[%s6966_s4 + $0x140] ss:$16 sps:$4 sm:$0xff]   ;;  %v5799_v47 = vld [vmem:[%s6966_s4 + $0x148] ss:$16 sps:$4 sm:$0xff]   ;;  %v7035_v48 = vsub.s32 0, %v7027_v40  ;;  %v7039_v51 = vsub.s32 1, %v7027_v40 }
  0xab   : > { %v516_v49 = vunpack.c.0.s8 %v515_v42  ;;  %v5800_v50 = vld [vmem:[%s6966_s4 + $0x164] ss:$16 sps:$4 sm:$0xff]   ;;  %v7042_v52 = vsub.s32 2, %v7027_v40  ;;  %v5802_v53 = vld [vmem:[%s6966_s4 + $0x16c] ss:$16 sps:$4 sm:$0xff]   ;;  %v7046_v54 = vsub.s32 3, %v7027_v40 }
  0xac   : > { %v5804_v55 = vld [vmem:[%s6966_s4 + $0x160] ss:$16 sps:$4 sm:$0xff]   ;;  %v5805_v56 = vld [vmem:[%s6966_s4 + $0x168] ss:$16 sps:$4 sm:$0xff]   ;;  %v5806_v61 = vld [vmem:[%s6966_s4 + $0x184] ss:$16 sps:$4 sm:$0xff]  }
  0xad   : > { %4095 = vmatpush1.bf16.msra.mxu0 %v5762_v18  ;;  %4423 = vmatpush1.bf16.msra.mxu1 %v5763_v19  ;;  %v7053_v57 = vld [vmem:[%s7840_s1] sm:$0xff]  ;;  %v7056_v58 = vsub.s32 %v516_v49, %v7027_v40  ;;  %v5808_v1 = vld [vmem:[%s6966_s4 + $0x18c] ss:$16 sps:$4 sm:$0xff]   ;;  %v5811_v10 = vld [vmem:[%s6966_s4 + $0x188] ss:$16 sps:$4 sm:$0xff]   ;;  %s7881_s18 = sld [smem:[#allocation23_spill]] }
  0xae   : > { %4096 = vmatprep.subr.bf16.mxu0 %v5764_v20  ;;  %4424 = vmatprep.subr.bf16.mxu1 %v5766_v21  ;;  %v7061_v59 = vld [vmem:[%s7841_s2] sm:$0xff]  ;;  %v451_v62 = vrot.slane %v7053_v57, %v7035_v48  ;;  %v455_v63 = vrot.slane %v7053_v57, %v7039_v51  ;;  %v459_v0 = vrot.slane %v7053_v57, %v7042_v52  ;;  %v5814_v19 = vld [vmem:[%s6966_s4 + $0x1ac] ss:$16 sps:$4 sm:$0xff]   ;;  %s4916_s10 = scalar_lea.sflag [#allocation4], %s6962_s14  ;;  %p7882_p6 = scmp.ne.s32.totalorder %s7868_s16, 0 }
  0xaf   : > { %v7066_v60 = vld [vmem:[%s7842_s3] sm:$0xff]  ;;  %v463_v2 = vrot.slane %v7053_v57, %v7046_v54  ;;  %v595_v3 = vrot.slane %v7061_v59, %v7035_v48  ;;  %v599_v4 = vrot.slane %v7061_v59, %v7039_v51  ;;  %v603_v6 = vrot.slane %v7061_v59, %v7042_v52  ;;  %v5826_v41 = vld [vmem:[%s6966_s4 + $0x1ec] ss:$16 sps:$4 sm:$0xff]   ;;  %s6715_s9 = smov [#allocation10]  }
  0xb0   : > { %v512_v5 = vcombine.low %v451_v62, %v455_v63  ;;  %v607_v7 = vrot.slane %v7061_v59, %v7046_v54  ;;  %v739_v8 = vrot.slane %v7066_v60, %v7035_v48  ;;  %v5810_v9 = vld [vmem:[%s6966_s4 + $0x180] ss:$16 sps:$4 sm:$0xff]   ;;  %v743_v13 = vrot.slane %v7066_v60, %v7039_v51  ;;  %v5812_v15 = vld [vmem:[%s6966_s4 + $0x1a4] ss:$16 sps:$4 sm:$0xff]   ;;  %v5835_v49 = vld [vmem:[%s6966_s4 + $0x20c] ss:$16 sps:$4 sm:$0xff]  }
  0xb1   : > { %4097 = vmatpush1.bf16.msra.mxu0 %v5768_v22  ;;  %4425 = vmatpush1.bf16.msra.mxu1 %v5769_v23  ;;  %v513_v11 = vcombine.low %v459_v0, %v463_v2  ;;  %v656_v12 = vcombine.low %v595_v3, %v599_v4  ;;  %v747_v14 = vrot.slane %v7066_v60, %v7042_v52  ;;  %v440_v23 = vld [vmem:[%s7839_s0] sm:$0xff]  ;;  %v5833_v0 = vld [vmem:[%s6966_s4 + $0x208] ss:$16 sps:$4 sm:$0xff]   ;;  %v5841_v3 = vld [vmem:[%s6966_s4 + $0x22c] ss:$16 sps:$4 sm:$0xff]   ;;  %s6635_s13 = sshll.u32 %s6715_s9, 4  ;;  %s6636_s13 = int_to_ptr.vmem [resolvable:$false] %s6635_s13 }
  0xb2   : > { %4098 = vmatprep.subr.bf16.mxu0 %v5770_v24  ;;  %4426 = vmatprep.subr.bf16.mxu1 %v5772_v25  ;;  %v520_v16 = vrot.slane %v512_v5, %v7056_v58  ;;  %v657_v17 = vcombine.low %v603_v6, %v607_v7  ;;  %v751_v18 = vrot.slane %v7066_v60, %v7046_v54  ;;  %v5822_v36 = vld [vmem:[%s6966_s4 + $0x1c0] ss:$16 sps:$4 sm:$0xff]   ;;  %v5839_v6 = vld [vmem:[%s6966_s4 + $0x228] ss:$16 sps:$4 sm:$0xff]   ;;  %v5844_v7 = vld [vmem:[%s6966_s4 + $0x244] ss:$16 sps:$4 sm:$0xff]  }
  0xb3   : > { %v527_v20 = vrot.slane %v513_v11, %v7056_v58  ;;  %v664_v21 = vrot.slane %v656_v12, %v7056_v58  ;;  %v800_v22 = vcombine.low %v739_v8, %v743_v13  ;;  %v5836_v5 = vld [vmem:[%s6966_s4 + $0x220] ss:$16 sps:$4 sm:$0xff]   ;;  %v5847_v8 = vld [vmem:[%s6966_s4 + $0x24c] ss:$16 sps:$4 sm:$0xff]   ;;  %v5850_v11 = vld [vmem:[%s6966_s4 + $0x264] ss:$16 sps:$4 sm:$0xff]   ;;  %s7795_s21 = scalar_lea.hbm %s7881_s18, %s5608_s26 }
  0xb4   : > { %v671_v24 = vrot.slane %v657_v17, %v7056_v58  ;;  %v801_v25 = vcombine.low %v747_v14, %v751_v18  ;;  %v5853_v12 = vld [vmem:[%s6966_s4 + $0x26c] ss:$16 sps:$4 sm:$0xff]   ;;  %v5848_v13 = vld [vmem:[%s6966_s4 + $0x260] ss:$16 sps:$4 sm:$0xff]   ;;  %v5851_v14 = vld [vmem:[%s6966_s4 + $0x268] ss:$16 sps:$4 sm:$0xff]  }
  0xb5   : > { %4099 = vmatpush1.bf16.msra.mxu0 %v5774_v26  ;;  %4427 = vmatpush1.bf16.msra.mxu1 %v5775_v27  ;;  %v5816_v26 = vld [vmem:[%s6966_s4 + $0x1a0] ss:$16 sps:$4 sm:$0xff]   ;;  %v5817_v27 = vld [vmem:[%s6966_s4 + $0x1a8] ss:$16 sps:$4 sm:$0xff]   ;;  %s6637_s8 = scalar_lea.vmem %s6636_s13, 256 }
  0xb6   : > { %4100 = vmatprep.subr.bf16.mxu0 %v5776_v28  ;;  %4428 = vmatprep.subr.bf16.mxu1 %v5778_v29  ;;  %v528_v28 = vcombine.low %v520_v16, %v527_v20  ;;  %v808_v29 = vrot.slane %v800_v22, %v7056_v58  ;;  %v5859_v16 = vld [vmem:[%s6966_s4 + $0x28c] ss:$16 sps:$4 sm:$0xff]   ;;  %v5854_v17 = vld [vmem:[%s6966_s4 + $0x280] ss:$16 sps:$4 sm:$0xff]   ;;  %v5857_v18 = vld [vmem:[%s6966_s4 + $0x288] ss:$16 sps:$4 sm:$0xff]  }
  0xb7   : > { %v5865_v20 = vld [vmem:[%s6966_s4 + $0x2ac] ss:$16 sps:$4 sm:$0xff]   ;;  %v5863_v22 = vld [vmem:[%s6966_s4 + $0x2a8] ss:$16 sps:$4 sm:$0xff]  }
  0xb9   : > { %4101 = vmatpush1.bf16.msra.mxu0 %v5780_v30  ;;  %4429 = vmatpush1.bf16.msra.mxu1 %v5781_v31  ;;  %v5818_v30 = vld [vmem:[%s6966_s4 + $0x1c4] ss:$16 sps:$4 sm:$0xff]   ;;  %v672_v31 = vcombine.low %v664_v21, %v671_v24  ;;  %v5860_v21 = vld [vmem:[%s6966_s4 + $0x2a0] ss:$16 sps:$4 sm:$0xff]   ;;  %v5871_v24 = vld [vmem:[%s6966_s4 + $0x2cc] ss:$16 sps:$4 sm:$0xff]  }
  0xba   : > { %4102 = vmatprep.subr.bf16.mxu0 %v5782_v32  ;;  %4430 = vmatprep.subr.bf16.mxu1 %v5784_v33  ;;  %v815_v32 = vrot.slane %v801_v25, %v7056_v58  ;;  %v5820_v33 = vld [vmem:[%s6966_s4 + $0x1cc] ss:$16 sps:$4 sm:$0xff]   ;;  %v5866_v25 = vld [vmem:[%s6966_s4 + $0x2c0] ss:$16 sps:$4 sm:$0xff]  }
  0xbd   : > { %4103 = vmatpush1.bf16.msra.mxu0 %v5786_v34  ;;  %4431 = vmatpush1.bf16.msra.mxu1 %v5787_v35  ;;  %v584_v34 = vsub.f32 %v440_v23, %v528_v28  ;;  %v816_v35 = vcombine.low %v808_v29, %v815_v32  ;;  %v5868_v23 = vld [vmem:[%s6966_s4 + $0x2c4] ss:$16 sps:$4 sm:$0xff]   ;;  %v5877_v28 = vld [vmem:[%s6966_s4 + $0x2ec] ss:$16 sps:$4 sm:$0xff]   ;;  %v5872_v29 = vld [vmem:[%s6966_s4 + $0x2e0] ss:$16 sps:$4 sm:$0xff]  }
  0xbe   : > { %4104 = vmatprep.subr.bf16.mxu0 %v5788_v37  ;;  %4432 = vmatprep.subr.bf16.mxu1 %v5790_v38  ;;  %v5823_v37 = vld [vmem:[%s6966_s4 + $0x1c8] ss:$16 sps:$4 sm:$0xff]   ;;  %v5883_v32 = vld [vmem:[%s6966_s4 + $0x30c] ss:$16 sps:$4 sm:$0xff]  }
  0xbf   : > { %v728_v38 = vmul.f32 %v672_v31, %v584_v34  ;;  %v5880_v31 = vld [vmem:[%s6966_s4 + $0x304] ss:$16 sps:$4 sm:$0xff]   ;;  %v5881_v34 = vld [vmem:[%s6966_s4 + $0x308] ss:$16 sps:$4 sm:$0xff]  }
  0xc1   : > { %4105 = vmatpush1.bf16.msra.mxu0 %v5792_v39  ;;  %4433 = vmatpush1.bf16.msra.mxu1 %v5793_v43  ;;  %v5824_v39 = vld [vmem:[%s6966_s4 + $0x1e4] ss:$16 sps:$4 sm:$0xff]   ;;  %v872_v42 = vadd.f32 %v816_v35, %v728_v38  ;;  %v5828_v43 = vld [vmem:[%s6966_s4 + $0x1e0] ss:$16 sps:$4 sm:$0xff]   ;;  %v5887_v38 = vld [vmem:[%s6966_s4 + $0x328] ss:$16 sps:$4 sm:$0xff]  }
  0xc2   : > { %4106 = vmatprep.subr.bf16.mxu0 %v5794_v44  ;;  %4434 = vmatprep.subr.bf16.mxu1 %v5796_v45  ;;  %v5829_v45 = vld [vmem:[%s6966_s4 + $0x1e8] ss:$16 sps:$4 sm:$0xff]   ;;  %v5886_v35 = vld [vmem:[%s6966_s4 + $0x324] ss:$16 sps:$4 sm:$0xff]  }
  0xc3   : > { %vm876_vm0 = vcmp.gt.f32.partialorder %v872_v42, 0.0  ;;  %v880_v44 = vmul.f32 0.2, %v872_v42 }
  0xc5   : > { %4107 = vmatpush1.bf16.msra.mxu0 %v5798_v46  ;;  %4435 = vmatpush1.bf16.msra.mxu1 %v5799_v47  ;;  %v884_v46 = vsel %vm876_vm0, %v872_v42, %v880_v44  ;;  %v5832_v47 = vld [vmem:[%s6966_s4 + $0x204] ss:$16 sps:$4 sm:$0xff]   ;;  %v5890_v42 = vld [vmem:[%s6966_s4 + $0x340] ss:$16 sps:$4 sm:$0xff]  }
  0xc6   : > { %4108 = vmatprep.subr.bf16.mxu0 %v5800_v50  ;;  %4436 = vmatprep.subr.bf16.mxu1 %v5802_v53  ;;  %v892_v50 = vcombine.high %v884_v46, %v884_v46  ;;  %v899_v53 = vrot.slane %v884_v46, %v7056_v58  ;;  %v5898_v44 = vld [vmem:[%s6966_s4 + $0x364] ss:$16 sps:$4 sm:$0xff]   ;;  %v7170_v46 = vsub.s32 4, %v7027_v40 }
  0xc8   : > { %v976_v62 = vpack.c.bf16 %v899_v53, %v899_v53 }
  0xc9   : > { %4109 = vmatpush1.bf16.msra.mxu0 %v5804_v55  ;;  %4437 = vmatpush1.bf16.msra.mxu1 %v5805_v56  ;;  %v907_v55 = vcombine.high %v899_v53, %v899_v53  ;;  %v7121_v56 = vrot.slane %v892_v50, %v7056_v58  ;;  %v7177_v50 = vsub.s32 6, %v7027_v40  ;;  %v7180_v53 = vsub.s32 7, %v7027_v40 }
  0xca   : > { %4110 = vmatprep.subr.bf16.mxu0 %v5806_v61  ;;  %4438 = vmatprep.subr.bf16.mxu1 %v5808_v1  ;;  %v5830_v61 = vld [vmem:[%s6966_s4 + $0x200] ss:$16 sps:$4 sm:$0xff]   ;;  %v5838_v1 = vld [vmem:[%s6966_s4 + $0x224] ss:$16 sps:$4 sm:$0xff]  }
  0xcb   : > { %v977_v63 = vpack.c.bf16 %v907_v55, %v907_v55  ;;  %v908_v2 = vcombine.high %v7121_v56, %v7121_v56  ;;  %v5899_v55 = vld [vmem:[%s6966_s4 + $0x368] ss:$16 sps:$4 sm:$0xff]  }
  0xcd   : > { %4111 = vmatpush1.bf16.msra.mxu0 %v5810_v9  ;;  %4439 = vmatpush1.bf16.msra.mxu1 %v5811_v10  ;;  %v979_v4 = vpack.c.bf16 %v908_v2, %v908_v2  ;;  %v5842_v9 = vld [vmem:[%s6966_s4 + $0x240] ss:$16 sps:$4 sm:$0xff]   ;;  %v5845_v10 = vld [vmem:[%s6966_s4 + $0x248] ss:$16 sps:$4 sm:$0xff]   ;;  %v479_v2 = vrot.slane %v7053_v57, %v7180_v53 }
  0xce   : > { %4112 = vmatprep.subr.bf16.mxu0 %v5812_v15  ;;  %4440 = vmatprep.subr.bf16.mxu1 %v5814_v19  ;;  %v5856_v15 = vld [vmem:[%s6966_s4 + $0x284] ss:$16 sps:$4 sm:$0xff]  }
  0xcf   : > { %4118 = vmatprep.mubr.bf16.mxu0 %v977_v63  ;;  %4446 = vmatprep.mubr.bf16.mxu1 %v977_v63  ;;  %v5862_v19 = vld [vmem:[%s6966_s4 + $0x2a4] ss:$16 sps:$4 sm:$0xff]   ;;  %v5902_v63 = vld [vmem:[%s6966_s4 + $0x380] ss:$16 sps:$4 sm:$0xff]  }
  0xd1   : > { %4113 = vmatpush1.bf16.msra.mxu0 %v5816_v26  ;;  %4441 = vmatpush1.bf16.msra.mxu1 %v5817_v27  ;;  %v5869_v26 = vld [vmem:[%s6966_s4 + $0x2c8] ss:$16 sps:$4 sm:$0xff]   ;;  %v5874_v27 = vld [vmem:[%s6966_s4 + $0x2e4] ss:$16 sps:$4 sm:$0xff]  }
  0xd2   : > { %4114 = vmatprep.subr.bf16.mxu0 %v5818_v30  ;;  %4442 = vmatprep.subr.bf16.mxu1 %v5820_v33  ;;  %v5875_v30 = vld [vmem:[%s6966_s4 + $0x2e8] ss:$16 sps:$4 sm:$0xff]   ;;  %v5878_v33 = vld [vmem:[%s6966_s4 + $0x300] ss:$16 sps:$4 sm:$0xff]  }
  0xd5   : > { %4115 = vmatpush1.bf16.msra.mxu0 %v5822_v36  ;;  %4443 = vmatpush1.bf16.msra.mxu1 %v5823_v37  ;;  %v5889_v36 = vld [vmem:[%s6966_s4 + $0x32c] ss:$16 sps:$4 sm:$0xff]   ;;  %v5884_v37 = vld [vmem:[%s6966_s4 + $0x320] ss:$16 sps:$4 sm:$0xff]  }
  0xd6   : > { %4116 = vmatprep.subr.bf16.mxu0 %v5824_v39  ;;  %4444 = vmatprep.subr.bf16.mxu1 %v5826_v41  ;;  %v5892_v39 = vld [vmem:[%s6966_s4 + $0x344] ss:$16 sps:$4 sm:$0xff]   ;;  %v5895_v41 = vld [vmem:[%s6966_s4 + $0x34c] ss:$16 sps:$4 sm:$0xff]  }
  0xd9   : > { %4117 = vmatpush1.bf16.msra.mxu0 %v5828_v43  ;;  %4445 = vmatpush1.bf16.msra.mxu1 %v5829_v45  ;;  %v5893_v43 = vld [vmem:[%s6966_s4 + $0x348] ss:$16 sps:$4 sm:$0xff]   ;;  %v5901_v45 = vld [vmem:[%s6966_s4 + $0x36c] ss:$16 sps:$4 sm:$0xff]  }
  0xda   : > { %4127 = vmatprep.subr.bf16.mxu0 %v5832_v47  ;;  %4455 = vmatprep.subr.bf16.mxu1 %v5835_v49  ;;  %v5896_v47 = vld [vmem:[%s6966_s4 + $0x360] ss:$16 sps:$4 sm:$0xff]   ;;  %v7174_v49 = vsub.s32 5, %v7027_v40  ;;  %v475_v40 = vrot.slane %v7053_v57, %v7177_v50 }
  0xdc   : > { %4119 = vmatmul.mubr.bf16.vlgmr.msra.gmra.mrb[0].mxu0 %v976_v62  ;;  %4447 = vmatmul.mubr.bf16.vlgmr.msra.gmra.mrb[0].mxu1 %v976_v62  ;;  %v5907_v62 = vld [vmem:[%s6966_s4 + $0x38c] ss:$16 sps:$4 sm:$0xff]  }
  0xdd   : > { %4128 = vmatpush1.bf16.msra.mxu0 %v5830_v61  ;;  %4456 = vmatpush1.bf16.msra.mxu1 %v5833_v0  ;;  %v5904_v61 = vld [vmem:[%s6966_s4 + $0x384] ss:$16 sps:$4 sm:$0xff]   ;;  %v467_v0 = vrot.slane %v7053_v57, %v7170_v46 }
  0xde   : > { %4129 = vmatprep.subr.bf16.mxu0 %v5838_v1  ;;  %4457 = vmatprep.subr.bf16.mxu1 %v5841_v3  ;;  %v471_v1 = vrot.slane %v7053_v57, %v7174_v49  ;;  %v5905_v3 = vld [vmem:[%s6966_s4 + $0x388] ss:$16 sps:$4 sm:$0xff]   ;;  %v623_v57 = vrot.slane %v7061_v59, %v7180_v53 }
  0xdf   : > { %4159 = vmatprep.mubr.bf16.mxu0 %v979_v4  ;;  %4487 = vmatprep.mubr.bf16.mxu1 %v979_v4  ;;  %v5910_v4 = vld [vmem:[%s6966_s4 + $0x3a4] ss:$16 sps:$4 sm:$0xff]  }
  0xe1   : > { %4130 = vmatpush1.bf16.msra.mxu0 %v5836_v5  ;;  %4458 = vmatpush1.bf16.msra.mxu1 %v5839_v6  ;;  %v5913_v5 = vld [vmem:[%s6966_s4 + $0x3ac] ss:$16 sps:$4 sm:$0xff]   ;;  %v611_v6 = vrot.slane %v7061_v59, %v7170_v46 }
  0xe2   : > { %4131 = vmatprep.subr.bf16.mxu0 %v5844_v7  ;;  %4459 = vmatprep.subr.bf16.mxu1 %v5847_v8  ;;  %v615_v7 = vrot.slane %v7061_v59, %v7174_v49  ;;  %v619_v8 = vrot.slane %v7061_v59, %v7177_v50  ;;  %v767_v59 = vrot.slane %v7066_v60, %v7180_v53 }
  0xe5   : > { %4132 = vmatpush1.bf16.msra.mxu0 %v5842_v9  ;;  %4460 = vmatpush1.bf16.msra.mxu1 %v5845_v10  ;;  %v5908_v9 = vld [vmem:[%s6966_s4 + $0x3a0] ss:$16 sps:$4 sm:$0xff]   ;;  %v529_v10 = vcombine.low %v467_v0, %v471_v1 }
  0xe6   : > { %4133 = vmatprep.subr.bf16.mxu0 %v5850_v11  ;;  %4461 = vmatprep.subr.bf16.mxu1 %v5853_v12  ;;  %v530_v11 = vcombine.low %v475_v40, %v479_v2  ;;  %v755_v12 = vrot.slane %v7066_v60, %v7170_v46  ;;  %v5938_v1 = vld [vmem:[%s6966_s4 + $0x440] ss:$16 sps:$4 sm:$0xff]   ;;  %v5941_v40 = vld [vmem:[%s6966_s4 + $0x448] ss:$16 sps:$4 sm:$0xff]  }
  0xe9   : > { %4134 = vmatpush1.bf16.msra.mxu0 %v5848_v13  ;;  %4462 = vmatpush1.bf16.msra.mxu1 %v5851_v14  ;;  %v5911_v13 = vld [vmem:[%s6966_s4 + $0x3a8] ss:$16 sps:$4 sm:$0xff]   ;;  %v5916_v14 = vld [vmem:[%s6966_s4 + $0x3c4] ss:$16 sps:$4 sm:$0xff]  }
  0xea   : > { %4135 = vmatprep.subr.bf16.mxu0 %v5856_v15  ;;  %4463 = vmatprep.subr.bf16.mxu1 %v5859_v16  ;;  %v759_v15 = vrot.slane %v7066_v60, %v7174_v49  ;;  %v763_v16 = vrot.slane %v7066_v60, %v7177_v50 }
  0xec   : > { %v818_v60 = vcombine.low %v763_v16, %v767_v59  ;;  %v5959_v16 = vld [vmem:[%s6966_s4 + $0x4a8] ss:$16 sps:$4 sm:$0xff]   ;;  %v5964_v59 = vld [vmem:[%s6966_s4 + $0x4c4] ss:$16 sps:$4 sm:$0xff]  }
  0xed   : > { %4136 = vmatpush1.bf16.msra.mxu0 %v5854_v17  ;;  %4464 = vmatpush1.bf16.msra.mxu1 %v5857_v18  ;;  %v5919_v17 = vld [vmem:[%s6966_s4 + $0x3cc] ss:$16 sps:$4 sm:$0xff]   ;;  %v673_v18 = vcombine.low %v611_v6, %v615_v7  ;;  %v5944_v6 = vld [vmem:[%s6966_s4 + $0x460] ss:$16 sps:$4 sm:$0xff]  }
  0xee   : > { %4137 = vmatprep.subr.bf16.mxu0 %v5862_v19  ;;  %4465 = vmatprep.subr.bf16.mxu1 %v5865_v20  ;;  %v674_v19 = vcombine.low %v619_v8, %v623_v57  ;;  %v5914_v20 = vld [vmem:[%s6966_s4 + $0x3c0] ss:$16 sps:$4 sm:$0xff]   ;;  %v5947_v8 = vld [vmem:[%s6966_s4 + $0x468] ss:$16 sps:$4 sm:$0xff]   ;;  %v5952_v57 = vld [vmem:[%s6966_s4 + $0x484] ss:$16 sps:$4 sm:$0xff]  }
  0xf1   : > { %4138 = vmatpush1.bf16.msra.mxu0 %v5860_v21  ;;  %4466 = vmatpush1.bf16.msra.mxu1 %v5863_v22  ;;  %v537_v21 = vrot.slane %v529_v10, %v7056_v58  ;;  %v5917_v22 = vld [vmem:[%s6966_s4 + $0x3c8] ss:$16 sps:$4 sm:$0xff]  }
  0xf2   : > { %4139 = vmatprep.subr.bf16.mxu0 %v5868_v23  ;;  %4467 = vmatprep.subr.bf16.mxu1 %v5871_v24  ;;  %v5922_v23 = vld [vmem:[%s6966_s4 + $0x3e4] ss:$16 sps:$4 sm:$0xff]   ;;  %v544_v24 = vrot.slane %v530_v11, %v7056_v58  ;;  %v5950_v11 = vld [vmem:[%s6966_s4 + $0x480] ss:$16 sps:$4 sm:$0xff]  }
  0xf5   : > { %4140 = vmatpush1.bf16.msra.mxu0 %v5866_v25  ;;  %4468 = vmatpush1.bf16.msra.mxu1 %v5869_v26  ;;  %v817_v25 = vcombine.low %v755_v12, %v759_v15  ;;  %v5925_v26 = vld [vmem:[%s6966_s4 + $0x3ec] ss:$16 sps:$4 sm:$0xff]   ;;  %v5953_v12 = vld [vmem:[%s6966_s4 + $0x488] ss:$16 sps:$4 sm:$0xff]   ;;  %v5956_v15 = vld [vmem:[%s6966_s4 + $0x4a0] ss:$16 sps:$4 sm:$0xff]  }
  0xf6   : > { %4141 = vmatprep.subr.bf16.mxu0 %v5874_v27  ;;  %4469 = vmatprep.subr.bf16.mxu1 %v5877_v28  ;;  %v681_v27 = vrot.slane %v673_v18, %v7056_v58  ;;  %v688_v28 = vrot.slane %v674_v19, %v7056_v58  ;;  %v5962_v18 = vld [vmem:[%s6966_s4 + $0x4c0] ss:$16 sps:$4 sm:$0xff]   ;;  %v5965_v19 = vld [vmem:[%s6966_s4 + $0x4c8] ss:$16 sps:$4 sm:$0xff]  }
  0xf9   : > { %4142 = vmatpush1.bf16.msra.mxu0 %v5872_v29  ;;  %4470 = vmatpush1.bf16.msra.mxu1 %v5875_v30  ;;  %v5920_v29 = vld [vmem:[%s6966_s4 + $0x3e0] ss:$16 sps:$4 sm:$0xff]   ;;  %v5923_v30 = vld [vmem:[%s6966_s4 + $0x3e8] ss:$16 sps:$4 sm:$0xff]  }
  0xfa   : > { %4143 = vmatprep.subr.bf16.mxu0 %v5880_v31  ;;  %4471 = vmatprep.subr.bf16.mxu1 %v5883_v32  ;;  %v5928_v31 = vld [vmem:[%s6966_s4 + $0x404] ss:$16 sps:$4 sm:$0xff]   ;;  %v545_v32 = vcombine.low %v537_v21, %v544_v24  ;;  %v5973_v21 = vld [vmem:[%s6966_s4 + $0x4ec] ss:$16 sps:$4 sm:$0xff]  }
  0xfb   : > { %v5976_v24 = vld [vmem:[%s6966_s4 + $0x504] ss:$16 sps:$4 sm:$0xff]  }
  0xfd   : > { %4144 = vmatpush1.bf16.msra.mxu0 %v5878_v33  ;;  %4472 = vmatpush1.bf16.msra.mxu1 %v5881_v34  ;;  %v825_v33 = vrot.slane %v817_v25, %v7056_v58  ;;  %v832_v34 = vrot.slane %v818_v60, %v7056_v58  ;;  %v5979_v25 = vld [vmem:[%s6966_s4 + $0x50c] ss:$16 sps:$4 sm:$0xff]   ;;  %v5974_v60 = vld [vmem:[%s6966_s4 + $0x500] ss:$16 sps:$4 sm:$0xff]  }
  0xfe   : > { %4145 = vmatprep.subr.bf16.mxu0 %v5886_v35  ;;  %4473 = vmatprep.subr.bf16.mxu1 %v5889_v36  ;;  %v5931_v35 = vld [vmem:[%s6966_s4 + $0x40c] ss:$16 sps:$4 sm:$0xff]   ;;  %v689_v36 = vcombine.low %v681_v27, %v688_v28  ;;  %v5982_v27 = vld [vmem:[%s6966_s4 + $0x524] ss:$16 sps:$4 sm:$0xff]  }
  0xff   : > { %v5985_v28 = vld [vmem:[%s6966_s4 + $0x52c] ss:$16 sps:$4 sm:$0xff]  }
 0x101   : > { %4146 = vmatpush1.bf16.msra.mxu0 %v5884_v37  ;;  %4474 = vmatpush1.bf16.msra.mxu1 %v5887_v38  ;;  %v5926_v37 = vld [vmem:[%s6966_s4 + $0x400] ss:$16 sps:$4 sm:$0xff]   ;;  %v5929_v38 = vld [vmem:[%s6966_s4 + $0x408] ss:$16 sps:$4 sm:$0xff]  }
 0x102   : > { %4147 = vmatprep.subr.bf16.mxu0 %v5892_v39  ;;  %4475 = vmatprep.subr.bf16.mxu1 %v5895_v41  ;;  %v978_v39 = vpack.c.bf16 %v7121_v56, %v7121_v56  ;;  %v441_v41 = vld [vmem:[%s7839_s0 + $0x8] sm:$0xff]  ;;  %v5932_v56 = vld [vmem:[%s6966_s4 + $0x420] ss:$16 sps:$4 sm:$0xff]  }
 0x105   : > { %4148 = vmatpush1.bf16.msra.mxu0 %v5890_v42  ;;  %4476 = vmatpush1.bf16.msra.mxu1 %v5893_v43  ;;  %v5934_v42 = vld [vmem:[%s6966_s4 + $0x424] ss:$16 sps:$4 sm:$0xff]   ;;  %v585_v43 = vsub.f32 %v441_v41, %v545_v32  ;;  %v5991_v32 = vld [vmem:[%s6966_s4 + $0x54c] ss:$16 sps:$4 sm:$0xff]  }
 0x106   : > { %4149 = vmatprep.subr.bf16.mxu0 %v5898_v44  ;;  %4477 = vmatprep.subr.bf16.mxu1 %v5901_v45  ;;  %v833_v44 = vcombine.low %v825_v33, %v832_v34  ;;  %v5937_v45 = vld [vmem:[%s6966_s4 + $0x42c] ss:$16 sps:$4 sm:$0xff]   ;;  %v5986_v33 = vld [vmem:[%s6966_s4 + $0x540] ss:$16 sps:$4 sm:$0xff]   ;;  %v5989_v34 = vld [vmem:[%s6966_s4 + $0x548] ss:$16 sps:$4 sm:$0xff]  }
 0x107   : > { %v6003_v41 = vld [vmem:[%s6966_s4 + $0x58c] ss:$16 sps:$4 sm:$0xff]  }
 0x109   : > { %4150 = vmatpush1.bf16.msra.mxu0 %v5896_v47  ;;  %4478 = vmatpush1.bf16.msra.mxu1 %v5899_v55  ;;  %v729_v47 = vmul.f32 %v689_v36, %v585_v43  ;;  %v5935_v55 = vld [vmem:[%s6966_s4 + $0x428] ss:$16 sps:$4 sm:$0xff]   ;;  %v5997_v36 = vld [vmem:[%s6966_s4 + $0x56c] ss:$16 sps:$4 sm:$0xff]  }
 0x10a   : > { %4151 = vmatprep.subr.bf16.mxu0 %v5904_v61  ;;  %4479 = vmatprep.subr.bf16.mxu1 %v5907_v62  ;;  %v5940_v61 = vld [vmem:[%s6966_s4 + $0x444] ss:$16 sps:$4 sm:$0xff]   ;;  %v6001_v43 = vld [vmem:[%s6966_s4 + $0x588] ss:$16 sps:$4 sm:$0xff]  }
 0x10b   : > { %v873_v62 = vadd.f32 %v833_v44, %v729_v47  ;;  %v6006_v44 = vld [vmem:[%s6966_s4 + $0x5a4] ss:$16 sps:$4 sm:$0xff]   ;;  %v6004_v47 = vld [vmem:[%s6966_s4 + $0x5a0] ss:$16 sps:$4 sm:$0xff]  }
 0x10d   : > { %4152 = vmatpush1.bf16.msra.mxu0 %v5902_v63  ;;  %4480 = vmatpush1.bf16.msra.mxu1 %v5905_v3  ;;  %v5943_v63 = vld [vmem:[%s6966_s4 + $0x44c] ss:$16 sps:$4 sm:$0xff]   ;;  %vm877_vm1 = vcmp.gt.f32.partialorder %v873_v62, 0.0  ;;  %v881_v0 = vmul.f32 0.2, %v873_v62 }
 0x10e   : > { %4153 = vmatprep.subr.bf16.mxu0 %v5910_v4  ;;  %4481 = vmatprep.subr.bf16.mxu1 %v5913_v5  ;;  %v5946_v3 = vld [vmem:[%s6966_s4 + $0x464] ss:$16 sps:$4 sm:$0xff]   ;;  %v5949_v4 = vld [vmem:[%s6966_s4 + $0x46c] ss:$16 sps:$4 sm:$0xff]  }
 0x10f   : > { %v7246_v2 = vsel %vm877_vm1, %v873_v62, %v881_v0  ;;  %v6013_v0 = vld [vmem:[%s6966_s4 + $0x5c8] ss:$16 sps:$4 sm:$0xff]  }
 0x110   : > { %v7252_v5 = vrot.slane %v7246_v2, %v7056_v58  ;;  %v909_v62 = vcombine.high %v7246_v2, %v7246_v2  ;;  %v6019_v2 = vld [vmem:[%s6966_s4 + $0x5e8] ss:$16 sps:$4 sm:$0xff]  }
 0x111   : > { %4154 = vmatpush1.bf16.msra.mxu0 %v5908_v9  ;;  %4482 = vmatpush1.bf16.msra.mxu1 %v5911_v13  ;;  %v5955_v9 = vld [vmem:[%s6966_s4 + $0x48c] ss:$16 sps:$4 sm:$0xff]   ;;  %v5958_v13 = vld [vmem:[%s6966_s4 + $0x4a4] ss:$16 sps:$4 sm:$0xff]  }
 0x112   : > { %4155 = vmatprep.subr.bf16.mxu0 %v5916_v14  ;;  %4483 = vmatprep.subr.bf16.mxu1 %v5919_v17  ;;  %v924_v7 = vcombine.high %v7252_v5, %v7252_v5  ;;  %v5961_v14 = vld [vmem:[%s6966_s4 + $0x4ac] ss:$16 sps:$4 sm:$0xff]  }
 0x113   : > { %v5967_v17 = vld [vmem:[%s6966_s4 + $0x4cc] ss:$16 sps:$4 sm:$0xff]  }
 0x114   : > { %v981_v10 = vpack.c.bf16 %v924_v7, %v924_v7  ;;  %v6027_v7 = vld [vmem:[%s6966_s4 + $0x60c] ss:$16 sps:$4 sm:$0xff]  }
 0x115   : > { %4156 = vmatpush1.bf16.msra.mxu0 %v5914_v20  ;;  %4484 = vmatpush1.bf16.msra.mxu1 %v5917_v22  ;;  %v5970_v20 = vld [vmem:[%s6966_s4 + $0x4e4] ss:$16 sps:$4 sm:$0xff]   ;;  %v5968_v22 = vld [vmem:[%s6966_s4 + $0x4e0] ss:$16 sps:$4 sm:$0xff]  }
 0x116   : > { %4157 = vmatprep.subr.bf16.mxu0 %v5922_v23  ;;  %4485 = vmatprep.subr.bf16.mxu1 %v5925_v26  ;;  %v5971_v23 = vld [vmem:[%s6966_s4 + $0x4e8] ss:$16 sps:$4 sm:$0xff]  }
 0x117   : > { %v5977_v26 = vld [vmem:[%s6966_s4 + $0x508] ss:$16 sps:$4 sm:$0xff]  }
 0x119   : > { %4158 = vmatpush1.bf16.msra.mxu0 %v5920_v29  ;;  %4486 = vmatpush1.bf16.msra.mxu1 %v5923_v30  ;;  %v5980_v29 = vld [vmem:[%s6966_s4 + $0x520] ss:$16 sps:$4 sm:$0xff]   ;;  %v5983_v30 = vld [vmem:[%s6966_s4 + $0x528] ss:$16 sps:$4 sm:$0xff]  }
 0x11a   : > { %4168 = vmatprep.subr.bf16.mxu0 %v5928_v31  ;;  %4496 = vmatprep.subr.bf16.mxu1 %v5931_v35  ;;  %v5988_v31 = vld [vmem:[%s6966_s4 + $0x544] ss:$16 sps:$4 sm:$0xff]  }
 0x11b   : > { %v5994_v35 = vld [vmem:[%s6966_s4 + $0x564] ss:$16 sps:$4 sm:$0xff]  }
 0x11c   : > { %4160 = vmatmul.mubr.bf16.vlgmr.msra.gmra.mrb[0].mxu0 %v978_v39  ;;  %4488 = vmatmul.mubr.bf16.vlgmr.msra.gmra.mrb[0].mxu1 %v978_v39  ;;  %v6000_v39 = vld [vmem:[%s6966_s4 + $0x584] ss:$16 sps:$4 sm:$0xff]  }
 0x11d   : > { %4169 = vmatpush1.bf16.msra.mxu0 %v5926_v37  ;;  %4497 = vmatpush1.bf16.msra.mxu1 %v5929_v38  ;;  %v5992_v37 = vld [vmem:[%s6966_s4 + $0x560] ss:$16 sps:$4 sm:$0xff]   ;;  %v5995_v38 = vld [vmem:[%s6966_s4 + $0x568] ss:$16 sps:$4 sm:$0xff]  }
 0x11e   : > { %4170 = vmatprep.subr.bf16.mxu0 %v5934_v42  ;;  %4498 = vmatprep.subr.bf16.mxu1 %v5937_v45  ;;  %v5998_v42 = vld [vmem:[%s6966_s4 + $0x580] ss:$16 sps:$4 sm:$0xff]   ;;  %v6009_v45 = vld [vmem:[%s6966_s4 + $0x5ac] ss:$16 sps:$4 sm:$0xff]  }
 0x11f   : > { %4200 = vmatprep.mubr.bf16.mxu0 %v981_v10  ;;  %4528 = vmatprep.mubr.bf16.mxu1 %v981_v10  ;;  %v6025_v10 = vld [vmem:[%s6966_s4 + $0x608] ss:$16 sps:$4 sm:$0xff]  }
 0x121   : > { %4171 = vmatpush1.bf16.msra.mxu0 %v5932_v56  ;;  %4499 = vmatpush1.bf16.msra.mxu1 %v5935_v55  ;;  %v6007_v56 = vld [vmem:[%s6966_s4 + $0x5a8] ss:$16 sps:$4 sm:$0xff]   ;;  %v6012_v55 = vld [vmem:[%s6966_s4 + $0x5c4] ss:$16 sps:$4 sm:$0xff]  }
 0x122   : > { %4172 = vmatprep.subr.bf16.mxu0 %v5940_v61  ;;  %4500 = vmatprep.subr.bf16.mxu1 %v5943_v63  ;;  %v6015_v61 = vld [vmem:[%s6966_s4 + $0x5cc] ss:$16 sps:$4 sm:$0xff]   ;;  %v6010_v63 = vld [vmem:[%s6966_s4 + $0x5c0] ss:$16 sps:$4 sm:$0xff]  }
 0x125   : > { %4173 = vmatpush1.bf16.msra.mxu0 %v5938_v1  ;;  %4501 = vmatpush1.bf16.msra.mxu1 %v5941_v40  ;;  %v6018_v1 = vld [vmem:[%s6966_s4 + $0x5e4] ss:$16 sps:$4 sm:$0xff]   ;;  %v6021_v40 = vld [vmem:[%s6966_s4 + $0x5ec] ss:$16 sps:$4 sm:$0xff]  }
 0x126   : > { %4174 = vmatprep.subr.bf16.mxu0 %v5946_v3  ;;  %4502 = vmatprep.subr.bf16.mxu1 %v5949_v4  ;;  %v7307_v3 = vrot.slane %v909_v62, %v7056_v58  ;;  %v6016_v4 = vld [vmem:[%s6966_s4 + $0x5e0] ss:$16 sps:$4 sm:$0xff]   ;;  %v6067_v62 = vld [vmem:[%s6966_s4 + $0x6e8] ss:$16 sps:$4 sm:$0xff]  }
 0x129   : > { %4175 = vmatpush1.bf16.msra.mxu0 %v5944_v6  ;;  %4503 = vmatpush1.bf16.msra.mxu1 %v5947_v8  ;;  %v6024_v6 = vld [vmem:[%s6966_s4 + $0x604] ss:$16 sps:$4 sm:$0xff]   ;;  %v925_v8 = vcombine.high %v7307_v3, %v7307_v3 }
 0x12a   : > { %4176 = vmatprep.subr.bf16.mxu0 %v5952_v57  ;;  %4504 = vmatprep.subr.bf16.mxu1 %v5955_v9  ;;  %v6022_v57 = vld [vmem:[%s6966_s4 + $0x600] ss:$16 sps:$4 sm:$0xff]   ;;  %v980_v9 = vpack.c.bf16 %v7252_v5, %v7252_v5  ;;  %v6031_v5 = vld [vmem:[%s6966_s4 + $0x628] ss:$16 sps:$4 sm:$0xff]  }
 0x12d   : > { %4177 = vmatpush1.bf16.msra.mxu0 %v5950_v11  ;;  %4505 = vmatpush1.bf16.msra.mxu1 %v5953_v12  ;;  %v6030_v11 = vld [vmem:[%s6966_s4 + $0x624] ss:$16 sps:$4 sm:$0xff]   ;;  %v6033_v12 = vld [vmem:[%s6966_s4 + $0x62c] ss:$16 sps:$4 sm:$0xff]  }
 0x12e   : > { %4178 = vmatprep.subr.bf16.mxu0 %v5958_v13  ;;  %4506 = vmatprep.subr.bf16.mxu1 %v5961_v14  ;;  %v983_v13 = vpack.c.bf16 %v925_v8, %v925_v8  ;;  %v6028_v14 = vld [vmem:[%s6966_s4 + $0x620] ss:$16 sps:$4 sm:$0xff]  }
 0x131   : > { %4179 = vmatpush1.bf16.msra.mxu0 %v5956_v15  ;;  %4507 = vmatpush1.bf16.msra.mxu1 %v5959_v16  ;;  %v6036_v15 = vld [vmem:[%s6966_s4 + $0x644] ss:$16 sps:$4 sm:$0xff]   ;;  %v6039_v16 = vld [vmem:[%s6966_s4 + $0x64c] ss:$16 sps:$4 sm:$0xff]  }
 0x132   : > { %4180 = vmatprep.subr.bf16.mxu0 %v5964_v59  ;;  %4508 = vmatprep.subr.bf16.mxu1 %v5967_v17  ;;  %v6034_v59 = vld [vmem:[%s6966_s4 + $0x640] ss:$16 sps:$4 sm:$0xff]   ;;  %v6037_v17 = vld [vmem:[%s6966_s4 + $0x648] ss:$16 sps:$4 sm:$0xff]  }
 0x135   : > { %4181 = vmatpush1.bf16.msra.mxu0 %v5962_v18  ;;  %4509 = vmatpush1.bf16.msra.mxu1 %v5965_v19  ;;  %v6042_v18 = vld [vmem:[%s6966_s4 + $0x664] ss:$16 sps:$4 sm:$0xff]   ;;  %v6045_v19 = vld [vmem:[%s6966_s4 + $0x66c] ss:$16 sps:$4 sm:$0xff]  }
 0x136   : > { %4182 = vmatprep.subr.bf16.mxu0 %v5970_v20  ;;  %4510 = vmatprep.subr.bf16.mxu1 %v5973_v21  ;;  %v6040_v20 = vld [vmem:[%s6966_s4 + $0x660] ss:$16 sps:$4 sm:$0xff]   ;;  %v6043_v21 = vld [vmem:[%s6966_s4 + $0x668] ss:$16 sps:$4 sm:$0xff]  }
 0x139   : > { %4183 = vmatpush1.bf16.msra.mxu0 %v5968_v22  ;;  %4511 = vmatpush1.bf16.msra.mxu1 %v5971_v23  ;;  %v6048_v22 = vld [vmem:[%s6966_s4 + $0x684] ss:$16 sps:$4 sm:$0xff]   ;;  %v6051_v23 = vld [vmem:[%s6966_s4 + $0x68c] ss:$16 sps:$4 sm:$0xff]  }
 0x13a   : > { %4184 = vmatprep.subr.bf16.mxu0 %v5976_v24  ;;  %4512 = vmatprep.subr.bf16.mxu1 %v5979_v25  ;;  %v6046_v24 = vld [vmem:[%s6966_s4 + $0x680] ss:$16 sps:$4 sm:$0xff]   ;;  %v6049_v25 = vld [vmem:[%s6966_s4 + $0x688] ss:$16 sps:$4 sm:$0xff]  }
 0x13d   : > { %4185 = vmatpush1.bf16.msra.mxu0 %v5974_v60  ;;  %4513 = vmatpush1.bf16.msra.mxu1 %v5977_v26  ;;  %v6054_v60 = vld [vmem:[%s6966_s4 + $0x6a4] ss:$16 sps:$4 sm:$0xff]   ;;  %v6057_v26 = vld [vmem:[%s6966_s4 + $0x6ac] ss:$16 sps:$4 sm:$0xff]  }
 0x13e   : > { %4186 = vmatprep.subr.bf16.mxu0 %v5982_v27  ;;  %4514 = vmatprep.subr.bf16.mxu1 %v5985_v28  ;;  %v6052_v27 = vld [vmem:[%s6966_s4 + $0x6a0] ss:$16 sps:$4 sm:$0xff]   ;;  %v6055_v28 = vld [vmem:[%s6966_s4 + $0x6a8] ss:$16 sps:$4 sm:$0xff]  }
 0x141   : > { %4187 = vmatpush1.bf16.msra.mxu0 %v5980_v29  ;;  %4515 = vmatpush1.bf16.msra.mxu1 %v5983_v30  ;;  %v6060_v29 = vld [vmem:[%s6966_s4 + $0x6c4] ss:$16 sps:$4 sm:$0xff]   ;;  %v6063_v30 = vld [vmem:[%s6966_s4 + $0x6cc] ss:$16 sps:$4 sm:$0xff]  }
 0x142   : > { %4188 = vmatprep.subr.bf16.mxu0 %v5988_v31  ;;  %4516 = vmatprep.subr.bf16.mxu1 %v5991_v32  ;;  %v6058_v31 = vld [vmem:[%s6966_s4 + $0x6c0] ss:$16 sps:$4 sm:$0xff]   ;;  %v7345_v32 = vld [vmem:[%s7840_s1 + $0x8] sm:$0xff] }
 0x145   : > { %4189 = vmatpush1.bf16.msra.mxu0 %v5986_v33  ;;  %4517 = vmatpush1.bf16.msra.mxu1 %v5989_v34  ;;  %v483_v33 = vrot.slane %v7345_v32, %v7035_v48  ;;  %v487_v34 = vrot.slane %v7345_v32, %v7039_v51 }
 0x146   : > { %4190 = vmatprep.subr.bf16.mxu0 %v5994_v35  ;;  %4518 = vmatprep.subr.bf16.mxu1 %v5997_v36  ;;  %v491_v35 = vrot.slane %v7345_v32, %v7042_v52  ;;  %v495_v36 = vrot.slane %v7345_v32, %v7046_v54 }
 0x149   : > { %4191 = vmatpush1.bf16.msra.mxu0 %v5992_v37  ;;  %4519 = vmatpush1.bf16.msra.mxu1 %v5995_v38  ;;  %v7358_v37 = vld [vmem:[%s7841_s2 + $0x8] sm:$0xff] }
 0x14a   : > { %4192 = vmatprep.subr.bf16.mxu0 %v6000_v39  ;;  %4520 = vmatprep.subr.bf16.mxu1 %v6003_v41  ;;  %v6061_v38 = vld [vmem:[%s6966_s4 + $0x6c8] ss:$16 sps:$4 sm:$0xff]   ;;  %v6066_v39 = vld [vmem:[%s6966_s4 + $0x6e4] ss:$16 sps:$4 sm:$0xff]   ;;  %v6069_v41 = vld [vmem:[%s6966_s4 + $0x6ec] ss:$16 sps:$4 sm:$0xff]  }
 0x14d   : > { %4193 = vmatpush1.bf16.msra.mxu0 %v5998_v42  ;;  %4521 = vmatpush1.bf16.msra.mxu1 %v6001_v43  ;;  %v6064_v42 = vld [vmem:[%s6966_s4 + $0x6e0] ss:$16 sps:$4 sm:$0xff]   ;;  %v627_v43 = vrot.slane %v7358_v37, %v7035_v48 }
 0x14e   : > { %4194 = vmatprep.subr.bf16.mxu0 %v6006_v44  ;;  %4522 = vmatprep.subr.bf16.mxu1 %v6009_v45  ;;  %v631_v44 = vrot.slane %v7358_v37, %v7039_v51  ;;  %v546_v45 = vcombine.low %v483_v33, %v487_v34  ;;  %v6096_v33 = vld [vmem:[%s6966_s4 + $0x784] ss:$16 sps:$4 sm:$0xff]   ;;  %v6099_v34 = vld [vmem:[%s6966_s4 + $0x78c] ss:$16 sps:$4 sm:$0xff]  }
 0x151   : > { %4195 = vmatpush1.bf16.msra.mxu0 %v6004_v47  ;;  %4523 = vmatpush1.bf16.msra.mxu1 %v6007_v56  ;;  %v547_v47 = vcombine.low %v491_v35, %v495_v36  ;;  %v635_v56 = vrot.slane %v7358_v37, %v7042_v52  ;;  %v6094_v36 = vld [vmem:[%s6966_s4 + $0x780] ss:$16 sps:$4 sm:$0xff]  }
 0x152   : > { %4196 = vmatprep.subr.bf16.mxu0 %v6012_v55  ;;  %4524 = vmatprep.subr.bf16.mxu1 %v6015_v61  ;;  %v639_v55 = vrot.slane %v7358_v37, %v7046_v54  ;;  %v7375_v61 = vld [vmem:[%s7842_s3 + $0x8] sm:$0xff] }
 0x153   : > { %v561_v8 = vrot.slane %v547_v47, %v7056_v58  ;;  %v6111_v47 = vld [vmem:[%s6966_s4 + $0x7cc] ss:$16 sps:$4 sm:$0xff]  }
 0x155   : > { %4197 = vmatpush1.bf16.msra.mxu0 %v6010_v63  ;;  %4525 = vmatpush1.bf16.msra.mxu1 %v6013_v0  ;;  %v6072_v63 = vld [vmem:[%s6966_s4 + $0x704] ss:$16 sps:$4 sm:$0xff]   ;;  %v6075_v0 = vld [vmem:[%s6966_s4 + $0x70c] ss:$16 sps:$4 sm:$0xff]  }
 0x156   : > { %4198 = vmatprep.subr.bf16.mxu0 %v6018_v1  ;;  %4526 = vmatprep.subr.bf16.mxu1 %v6021_v40  ;;  %v690_v1 = vcombine.low %v627_v43, %v631_v44  ;;  %v771_v40 = vrot.slane %v7375_v61, %v7035_v48  ;;  %v6100_v43 = vld [vmem:[%s6966_s4 + $0x7a0] ss:$16 sps:$4 sm:$0xff]   ;;  %v6103_v44 = vld [vmem:[%s6966_s4 + $0x7a8] ss:$16 sps:$4 sm:$0xff]  }
 0x159   : > { %4199 = vmatpush1.bf16.msra.mxu0 %v6016_v4  ;;  %4527 = vmatpush1.bf16.msra.mxu1 %v6019_v2  ;;  %v775_v4 = vrot.slane %v7375_v61, %v7039_v51  ;;  %v779_v2 = vrot.slane %v7375_v61, %v7042_v52 }
 0x15a   : > { %4209 = vmatprep.subr.bf16.mxu0 %v6024_v6  ;;  %4537 = vmatprep.subr.bf16.mxu1 %v6027_v7  ;;  %v6070_v6 = vld [vmem:[%s6966_s4 + $0x700] ss:$16 sps:$4 sm:$0xff]   ;;  %v554_v7 = vrot.slane %v546_v45, %v7056_v58  ;;  %v6108_v45 = vld [vmem:[%s6966_s4 + $0x7c4] ss:$16 sps:$4 sm:$0xff]  }
 0x15c   : > { %4201 = vmatmul.mubr.bf16.vlgmr.msra.gmra.mrb[0].mxu0 %v980_v9  ;;  %4529 = vmatmul.mubr.bf16.vlgmr.msra.gmra.mrb[0].mxu1 %v980_v9  ;;  %v783_v9 = vrot.slane %v7375_v61, %v7046_v54 }
 0x15d   : > { %4210 = vmatpush1.bf16.msra.mxu0 %v6022_v57  ;;  %4538 = vmatpush1.bf16.msra.mxu1 %v6025_v10  ;;  %v691_v57 = vcombine.low %v635_v56, %v639_v55  ;;  %v6073_v10 = vld [vmem:[%s6966_s4 + $0x708] ss:$16 sps:$4 sm:$0xff]   ;;  %v6106_v55 = vld [vmem:[%s6966_s4 + $0x7c0] ss:$16 sps:$4 sm:$0xff]  }
 0x15e   : > { %4211 = vmatprep.subr.bf16.mxu0 %v6030_v11  ;;  %4539 = vmatprep.subr.bf16.mxu1 %v6033_v12  ;;  %v6078_v11 = vld [vmem:[%s6966_s4 + $0x724] ss:$16 sps:$4 sm:$0xff]   ;;  %v6081_v12 = vld [vmem:[%s6966_s4 + $0x72c] ss:$16 sps:$4 sm:$0xff]  }
 0x15f   : > { %4241 = vmatprep.mubr.bf16.mxu0 %v983_v13  ;;  %4569 = vmatprep.mubr.bf16.mxu1 %v983_v13  ;;  %v6076_v13 = vld [vmem:[%s6966_s4 + $0x720] ss:$16 sps:$4 sm:$0xff]  }
 0x161   : > { %4212 = vmatpush1.bf16.msra.mxu0 %v6028_v14  ;;  %4540 = vmatpush1.bf16.msra.mxu1 %v6031_v5  ;;  %v698_v14 = vrot.slane %v690_v1, %v7056_v58  ;;  %v6079_v5 = vld [vmem:[%s6966_s4 + $0x728] ss:$16 sps:$4 sm:$0xff]  }
 0x162   : > { %4213 = vmatprep.subr.bf16.mxu0 %v6036_v15  ;;  %4541 = vmatprep.subr.bf16.mxu1 %v6039_v16  ;;  %v562_v15 = vcombine.low %v554_v7, %v561_v8  ;;  %v705_v16 = vrot.slane %v691_v57, %v7056_v58  ;;  %v982_v8 = vpack.c.bf16 %v7307_v3, %v7307_v3  ;;  %v6118_v57 = vld [vmem:[%s6966_s4 + $0x800] ss:$16 sps:$4 sm:$0xff]  }
 0x163   : > { %v6124_v3 = vld [vmem:[%s6966_s4 + $0x820] ss:$16 sps:$4 sm:$0xff]  }
 0x165   : > { %4214 = vmatpush1.bf16.msra.mxu0 %v6034_v59  ;;  %4542 = vmatpush1.bf16.msra.mxu1 %v6037_v17  ;;  %v834_v59 = vcombine.low %v771_v40, %v775_v4  ;;  %v835_v17 = vcombine.low %v779_v2, %v783_v9  ;;  %v6112_v40 = vld [vmem:[%s6966_s4 + $0x7e0] ss:$16 sps:$4 sm:$0xff]   ;;  %v6115_v4 = vld [vmem:[%s6966_s4 + $0x7e8] ss:$16 sps:$4 sm:$0xff]   ;;  %v6120_v2 = vld [vmem:[%s6966_s4 + $0x804] ss:$16 sps:$4 sm:$0xff]  }
 0x166   : > { %4215 = vmatprep.subr.bf16.mxu0 %v6042_v18  ;;  %4543 = vmatprep.subr.bf16.mxu1 %v6045_v19  ;;  %v442_v18 = vld [vmem:[%s7839_s0 + $0x10] sm:$0xff]  ;;  %v6121_v9 = vld [vmem:[%s6966_s4 + $0x808] ss:$16 sps:$4 sm:$0xff]  }
 0x167   : > { %v6084_v19 = vld [vmem:[%s6966_s4 + $0x744] ss:$16 sps:$4 sm:$0xff]  }
 0x169   : > { %4216 = vmatpush1.bf16.msra.mxu0 %v6040_v20  ;;  %4544 = vmatpush1.bf16.msra.mxu1 %v6043_v21  ;;  %v6087_v20 = vld [vmem:[%s6966_s4 + $0x74c] ss:$16 sps:$4 sm:$0xff]   ;;  %v586_v21 = vsub.f32 %v442_v18, %v562_v15  ;;  %v6130_v15 = vld [vmem:[%s6966_s4 + $0x840] ss:$16 sps:$4 sm:$0xff]  }
 0x16a   : > { %4217 = vmatprep.subr.bf16.mxu0 %v6048_v22  ;;  %4545 = vmatprep.subr.bf16.mxu1 %v6051_v23  ;;  %v706_v22 = vcombine.low %v698_v14, %v705_v16  ;;  %v842_v23 = vrot.slane %v834_v59, %v7056_v58  ;;  %v6132_v14 = vld [vmem:[%s6966_s4 + $0x844] ss:$16 sps:$4 sm:$0xff]   ;;  %v6133_v16 = vld [vmem:[%s6966_s4 + $0x848] ss:$16 sps:$4 sm:$0xff]   ;;  %v6136_v18 = vld [vmem:[%s6966_s4 + $0x860] ss:$16 sps:$4 sm:$0xff]  }
 0x16b   : > { %v6138_v59 = vld [vmem:[%s6966_s4 + $0x864] ss:$16 sps:$4 sm:$0xff]  }
 0x16d   : > { %4218 = vmatpush1.bf16.msra.mxu0 %v6046_v24  ;;  %4546 = vmatpush1.bf16.msra.mxu1 %v6049_v25  ;;  %v849_v24 = vrot.slane %v835_v17, %v7056_v58  ;;  %v6082_v25 = vld [vmem:[%s6966_s4 + $0x740] ss:$16 sps:$4 sm:$0xff]   ;;  %v6141_v17 = vld [vmem:[%s6966_s4 + $0x86c] ss:$16 sps:$4 sm:$0xff]  }
 0x16e   : > { %4219 = vmatprep.subr.bf16.mxu0 %v6054_v60  ;;  %4547 = vmatprep.subr.bf16.mxu1 %v6057_v26  ;;  %v6085_v60 = vld [vmem:[%s6966_s4 + $0x748] ss:$16 sps:$4 sm:$0xff]   ;;  %v6090_v26 = vld [vmem:[%s6966_s4 + $0x764] ss:$16 sps:$4 sm:$0xff]  }
 0x171   : > { %4220 = vmatpush1.bf16.msra.mxu0 %v6052_v27  ;;  %4548 = vmatpush1.bf16.msra.mxu1 %v6055_v28  ;;  %v6093_v27 = vld [vmem:[%s6966_s4 + $0x76c] ss:$16 sps:$4 sm:$0xff]   ;;  %v730_v28 = vmul.f32 %v706_v22, %v586_v21  ;;  %v6142_v22 = vld [vmem:[%s6966_s4 + $0x880] ss:$16 sps:$4 sm:$0xff]  }
 0x172   : > { %4221 = vmatprep.subr.bf16.mxu0 %v6060_v29  ;;  %4549 = vmatprep.subr.bf16.mxu1 %v6063_v30  ;;  %v850_v29 = vcombine.low %v842_v23, %v849_v24  ;;  %v6088_v30 = vld [vmem:[%s6966_s4 + $0x760] ss:$16 sps:$4 sm:$0xff]   ;;  %v6147_v21 = vld [vmem:[%s6966_s4 + $0x88c] ss:$16 sps:$4 sm:$0xff]   ;;  %v6145_v23 = vld [vmem:[%s6966_s4 + $0x888] ss:$16 sps:$4 sm:$0xff]  }
 0x173   : > { %v6150_v24 = vld [vmem:[%s6966_s4 + $0x8a4] ss:$16 sps:$4 sm:$0xff]  }
 0x174   : > { %v874_v35 = vadd.f32 %v850_v29, %v730_v28  ;;  %v6159_v28 = vld [vmem:[%s6966_s4 + $0x8cc] ss:$16 sps:$4 sm:$0xff]   ;;  %v6154_v29 = vld [vmem:[%s6966_s4 + $0x8c0] ss:$16 sps:$4 sm:$0xff]  }
 0x175   : > { %4222 = vmatpush1.bf16.msra.mxu0 %v6058_v31  ;;  %4550 = vmatpush1.bf16.msra.mxu1 %v6061_v38  ;;  %v6091_v31 = vld [vmem:[%s6966_s4 + $0x768] ss:$16 sps:$4 sm:$0xff]  }
 0x176   : > { %4223 = vmatprep.subr.bf16.mxu0 %v6066_v39  ;;  %4551 = vmatprep.subr.bf16.mxu1 %v6069_v41  ;;  %v6097_v38 = vld [vmem:[%s6966_s4 + $0x788] ss:$16 sps:$4 sm:$0xff]   ;;  %v6102_v39 = vld [vmem:[%s6966_s4 + $0x7a4] ss:$16 sps:$4 sm:$0xff]   ;;  %v6105_v41 = vld [vmem:[%s6966_s4 + $0x7ac] ss:$16 sps:$4 sm:$0xff]  }
 0x177   : > { %vm878_vm2 = vcmp.gt.f32.partialorder %v874_v35, 0.0 }
 0x179   : > { %4224 = vmatpush1.bf16.msra.mxu0 %v6064_v42  ;;  %4552 = vmatpush1.bf16.msra.mxu1 %v6067_v62  ;;  %v882_v42 = vmul.f32 0.2, %v874_v35  ;;  %v6109_v62 = vld [vmem:[%s6966_s4 + $0x7c8] ss:$16 sps:$4 sm:$0xff]  }
 0x17a   : > { %4225 = vmatprep.subr.bf16.mxu0 %v6072_v63  ;;  %4553 = vmatprep.subr.bf16.mxu1 %v6075_v0  ;;  %v6114_v63 = vld [vmem:[%s6966_s4 + $0x7e4] ss:$16 sps:$4 sm:$0xff]   ;;  %v6117_v0 = vld [vmem:[%s6966_s4 + $0x7ec] ss:$16 sps:$4 sm:$0xff]  }
 0x17b   : > { %v7421_v56 = vsel %vm878_vm2, %v874_v35, %v882_v42  ;;  %v6163_v35 = vld [vmem:[%s6966_s4 + $0x8e8] ss:$16 sps:$4 sm:$0xff]   ;;  %v6174_v42 = vld [vmem:[%s6966_s4 + $0x924] ss:$16 sps:$4 sm:$0xff]  }
 0x17c   : > { %v7429_v1 = vrot.slane %v7421_v56, %v7056_v58 }
 0x17d   : > { %4226 = vmatpush1.bf16.msra.mxu0 %v6070_v6  ;;  %4554 = vmatpush1.bf16.msra.mxu1 %v6073_v10  ;;  %v6123_v6 = vld [vmem:[%s6966_s4 + $0x80c] ss:$16 sps:$4 sm:$0xff]   ;;  %v6126_v10 = vld [vmem:[%s6966_s4 + $0x824] ss:$16 sps:$4 sm:$0xff]  }
 0x17e   : > { %4227 = vmatprep.subr.bf16.mxu0 %v6078_v11  ;;  %4555 = vmatprep.subr.bf16.mxu1 %v6081_v12  ;;  %v941_v7 = vcombine.high %v7429_v1, %v7429_v1  ;;  %v6129_v11 = vld [vmem:[%s6966_s4 + $0x82c] ss:$16 sps:$4 sm:$0xff]  }
 0x180   : > { %v985_v12 = vpack.c.bf16 %v941_v7, %v941_v7  ;;  %v6195_v7 = vld [vmem:[%s6966_s4 + $0x98c] ss:$16 sps:$4 sm:$0xff]  }
 0x181   : > { %4228 = vmatpush1.bf16.msra.mxu0 %v6076_v13  ;;  %4556 = vmatpush1.bf16.msra.mxu1 %v6079_v5  ;;  %v6127_v13 = vld [vmem:[%s6966_s4 + $0x828] ss:$16 sps:$4 sm:$0xff]   ;;  %v6135_v5 = vld [vmem:[%s6966_s4 + $0x84c] ss:$16 sps:$4 sm:$0xff]  }
 0x182   : > { %4229 = vmatprep.subr.bf16.mxu0 %v6084_v19  ;;  %4557 = vmatprep.subr.bf16.mxu1 %v6087_v20  ;;  %v6139_v19 = vld [vmem:[%s6966_s4 + $0x868] ss:$16 sps:$4 sm:$0xff]   ;;  %v6144_v20 = vld [vmem:[%s6966_s4 + $0x884] ss:$16 sps:$4 sm:$0xff]  }
 0x185   : > { %4230 = vmatpush1.bf16.msra.mxu0 %v6082_v25  ;;  %4558 = vmatpush1.bf16.msra.mxu1 %v6085_v60  ;;  %v6153_v25 = vld [vmem:[%s6966_s4 + $0x8ac] ss:$16 sps:$4 sm:$0xff]   ;;  %v6148_v60 = vld [vmem:[%s6966_s4 + $0x8a0] ss:$16 sps:$4 sm:$0xff]  }
 0x186   : > { %4231 = vmatprep.subr.bf16.mxu0 %v6090_v26  ;;  %4559 = vmatprep.subr.bf16.mxu1 %v6093_v27  ;;  %v6151_v26 = vld [vmem:[%s6966_s4 + $0x8a8] ss:$16 sps:$4 sm:$0xff]   ;;  %v6156_v27 = vld [vmem:[%s6966_s4 + $0x8c4] ss:$16 sps:$4 sm:$0xff]  }
 0x189   : > { %4232 = vmatpush1.bf16.msra.mxu0 %v6088_v30  ;;  %4560 = vmatpush1.bf16.msra.mxu1 %v6091_v31  ;;  %v6157_v30 = vld [vmem:[%s6966_s4 + $0x8c8] ss:$16 sps:$4 sm:$0xff]   ;;  %v6162_v31 = vld [vmem:[%s6966_s4 + $0x8e4] ss:$16 sps:$4 sm:$0xff]  }
 0x18a   : > { %4233 = vmatprep.subr.bf16.mxu0 %v6096_v33  ;;  %4561 = vmatprep.subr.bf16.mxu1 %v6099_v34  ;;  %v6165_v33 = vld [vmem:[%s6966_s4 + $0x8ec] ss:$16 sps:$4 sm:$0xff]   ;;  %v6160_v34 = vld [vmem:[%s6966_s4 + $0x8e0] ss:$16 sps:$4 sm:$0xff]  }
 0x18d   : > { %4234 = vmatpush1.bf16.msra.mxu0 %v6094_v36  ;;  %4562 = vmatpush1.bf16.msra.mxu1 %v6097_v38  ;;  %v6168_v36 = vld [vmem:[%s6966_s4 + $0x904] ss:$16 sps:$4 sm:$0xff]   ;;  %v6171_v38 = vld [vmem:[%s6966_s4 + $0x90c] ss:$16 sps:$4 sm:$0xff]  }
 0x18e   : > { %4235 = vmatprep.subr.bf16.mxu0 %v6102_v39  ;;  %4563 = vmatprep.subr.bf16.mxu1 %v6105_v41  ;;  %v6166_v39 = vld [vmem:[%s6966_s4 + $0x900] ss:$16 sps:$4 sm:$0xff]   ;;  %v6169_v41 = vld [vmem:[%s6966_s4 + $0x908] ss:$16 sps:$4 sm:$0xff]  }
 0x191   : > { %4236 = vmatpush1.bf16.msra.mxu0 %v6100_v43  ;;  %4564 = vmatpush1.bf16.msra.mxu1 %v6103_v44  ;;  %v6177_v43 = vld [vmem:[%s6966_s4 + $0x92c] ss:$16 sps:$4 sm:$0xff]   ;;  %v6172_v44 = vld [vmem:[%s6966_s4 + $0x920] ss:$16 sps:$4 sm:$0xff]  }
 0x192   : > { %4237 = vmatprep.subr.bf16.mxu0 %v6108_v45  ;;  %4565 = vmatprep.subr.bf16.mxu1 %v6111_v47  ;;  %v6175_v45 = vld [vmem:[%s6966_s4 + $0x928] ss:$16 sps:$4 sm:$0xff]   ;;  %v6180_v47 = vld [vmem:[%s6966_s4 + $0x944] ss:$16 sps:$4 sm:$0xff]  }
 0x195   : > { %4238 = vmatpush1.bf16.msra.mxu0 %v6106_v55  ;;  %4566 = vmatpush1.bf16.msra.mxu1 %v6109_v62  ;;  %v6183_v55 = vld [vmem:[%s6966_s4 + $0x94c] ss:$16 sps:$4 sm:$0xff]   ;;  %v6178_v62 = vld [vmem:[%s6966_s4 + $0x940] ss:$16 sps:$4 sm:$0xff]  }
 0x196   : > { %4239 = vmatprep.subr.bf16.mxu0 %v6114_v63  ;;  %4567 = vmatprep.subr.bf16.mxu1 %v6117_v0  ;;  %v6181_v63 = vld [vmem:[%s6966_s4 + $0x948] ss:$16 sps:$4 sm:$0xff]   ;;  %v6186_v0 = vld [vmem:[%s6966_s4 + $0x964] ss:$16 sps:$4 sm:$0xff]  }
 0x199   : > { %4240 = vmatpush1.bf16.msra.mxu0 %v6112_v40  ;;  %4568 = vmatpush1.bf16.msra.mxu1 %v6115_v4  ;;  %v6189_v40 = vld [vmem:[%s6966_s4 + $0x96c] ss:$16 sps:$4 sm:$0xff]   ;;  %v6184_v4 = vld [vmem:[%s6966_s4 + $0x960] ss:$16 sps:$4 sm:$0xff]  }
 0x19a   : > { %4250 = vmatprep.subr.bf16.mxu0 %v6120_v2  ;;  %4578 = vmatprep.subr.bf16.mxu1 %v6123_v6  ;;  %v6187_v2 = vld [vmem:[%s6966_s4 + $0x968] ss:$16 sps:$4 sm:$0xff]   ;;  %v6192_v6 = vld [vmem:[%s6966_s4 + $0x984] ss:$16 sps:$4 sm:$0xff]  }
 0x19c   : > { %4242 = vmatmul.mubr.bf16.vlgmr.msra.gmra.mrb[0].mxu0 %v982_v8  ;;  %4570 = vmatmul.mubr.bf16.vlgmr.msra.gmra.mrb[0].mxu1 %v982_v8  ;;  %v6190_v8 = vld [vmem:[%s6966_s4 + $0x980] ss:$16 sps:$4 sm:$0xff]  }
 0x19d   : > { %4251 = vmatpush1.bf16.msra.mxu0 %v6118_v57  ;;  %4579 = vmatpush1.bf16.msra.mxu1 %v6121_v9  ;;  %v6193_v57 = vld [vmem:[%s6966_s4 + $0x988] ss:$16 sps:$4 sm:$0xff]   ;;  %v6198_v9 = vld [vmem:[%s6966_s4 + $0x9a4] ss:$16 sps:$4 sm:$0xff]  }
 0x19e   : > { %4252 = vmatprep.subr.bf16.mxu0 %v6126_v10  ;;  %4580 = vmatprep.subr.bf16.mxu1 %v6129_v11  ;;  %v6201_v10 = vld [vmem:[%s6966_s4 + $0x9ac] ss:$16 sps:$4 sm:$0xff]   ;;  %v6196_v11 = vld [vmem:[%s6966_s4 + $0x9a0] ss:$16 sps:$4 sm:$0xff]  }
 0x19f   : > { %4282 = vmatprep.mubr.bf16.mxu0 %v985_v12  ;;  %4610 = vmatprep.mubr.bf16.mxu1 %v985_v12  ;;  %v6199_v12 = vld [vmem:[%s6966_s4 + $0x9a8] ss:$16 sps:$4 sm:$0xff]  }
 0x1a1   : > { %4253 = vmatpush1.bf16.msra.mxu0 %v6124_v3  ;;  %4581 = vmatpush1.bf16.msra.mxu1 %v6127_v13  ;;  %v6204_v3 = vld [vmem:[%s6966_s4 + $0x9c4] ss:$16 sps:$4 sm:$0xff]   ;;  %v6207_v13 = vld [vmem:[%s6966_s4 + $0x9cc] ss:$16 sps:$4 sm:$0xff]  }
 0x1a2   : > { %4254 = vmatprep.subr.bf16.mxu0 %v6132_v14  ;;  %4582 = vmatprep.subr.bf16.mxu1 %v6135_v5  ;;  %v926_v14 = vcombine.high %v7421_v56, %v7421_v56  ;;  %v6202_v5 = vld [vmem:[%s6966_s4 + $0x9c0] ss:$16 sps:$4 sm:$0xff]  }
 0x1a3   : > { %v6208_v56 = vld [vmem:[%s6966_s4 + $0x9e0] ss:$16 sps:$4 sm:$0xff]  }
 0x1a5   : > { %4255 = vmatpush1.bf16.msra.mxu0 %v6130_v15  ;;  %4583 = vmatpush1.bf16.msra.mxu1 %v6133_v16  ;;  %v6205_v15 = vld [vmem:[%s6966_s4 + $0x9c8] ss:$16 sps:$4 sm:$0xff]   ;;  %v6210_v16 = vld [vmem:[%s6966_s4 + $0x9e4] ss:$16 sps:$4 sm:$0xff]  }
 0x1a6   : > { %4256 = vmatprep.subr.bf16.mxu0 %v6138_v59  ;;  %4584 = vmatprep.subr.bf16.mxu1 %v6141_v17  ;;  %v6213_v59 = vld [vmem:[%s6966_s4 + $0x9ec] ss:$16 sps:$4 sm:$0xff]   ;;  %v7502_v17 = vrot.slane %v926_v14, %v7056_v58  ;;  %v6259_v14 = vld [vmem:[%s6966_s4 + $0xae8] ss:$16 sps:$4 sm:$0xff]  }
 0x1a9   : > { %4257 = vmatpush1.bf16.msra.mxu0 %v6136_v18  ;;  %4585 = vmatpush1.bf16.msra.mxu1 %v6139_v19  ;;  %v6211_v18 = vld [vmem:[%s6966_s4 + $0x9e8] ss:$16 sps:$4 sm:$0xff]   ;;  %v6216_v19 = vld [vmem:[%s6966_s4 + $0xa04] ss:$16 sps:$4 sm:$0xff]  }
 0x1aa   : > { %4258 = vmatprep.subr.bf16.mxu0 %v6144_v20  ;;  %4586 = vmatprep.subr.bf16.mxu1 %v6147_v21  ;;  %v6219_v20 = vld [vmem:[%s6966_s4 + $0xa0c] ss:$16 sps:$4 sm:$0xff]   ;;  %v942_v21 = vcombine.high %v7502_v17, %v7502_v17 }
 0x1ad   : > { %4259 = vmatpush1.bf16.msra.mxu0 %v6142_v22  ;;  %4587 = vmatpush1.bf16.msra.mxu1 %v6145_v23  ;;  %v984_v22 = vpack.c.bf16 %v7429_v1, %v7429_v1  ;;  %v6214_v23 = vld [vmem:[%s6966_s4 + $0xa00] ss:$16 sps:$4 sm:$0xff]  }
 0x1ae   : > { %4260 = vmatprep.subr.bf16.mxu0 %v6150_v24  ;;  %4588 = vmatprep.subr.bf16.mxu1 %v6153_v25  ;;  %v6217_v24 = vld [vmem:[%s6966_s4 + $0xa08] ss:$16 sps:$4 sm:$0xff]   ;;  %v6222_v25 = vld [vmem:[%s6966_s4 + $0xa24] ss:$16 sps:$4 sm:$0xff]   ;;  %v6220_v1 = vld [vmem:[%s6966_s4 + $0xa20] ss:$16 sps:$4 sm:$0xff]  }
 0x1b1   : > { %4261 = vmatpush1.bf16.msra.mxu0 %v6148_v60  ;;  %4589 = vmatpush1.bf16.msra.mxu1 %v6151_v26  ;;  %v6225_v60 = vld [vmem:[%s6966_s4 + $0xa2c] ss:$16 sps:$4 sm:$0xff]   ;;  %v987_v26 = vpack.c.bf16 %v942_v21, %v942_v21  ;;  %v799_v21 = vrot.slane %v7375_v61, %v7180_v53 }
 0x1b2   : > { %4262 = vmatprep.subr.bf16.mxu0 %v6156_v27  ;;  %4590 = vmatprep.subr.bf16.mxu1 %v6159_v28  ;;  %v6223_v27 = vld [vmem:[%s6966_s4 + $0xa28] ss:$16 sps:$4 sm:$0xff]   ;;  %v6228_v28 = vld [vmem:[%s6966_s4 + $0xa44] ss:$16 sps:$4 sm:$0xff]  }
 0x1b5   : > { %4263 = vmatpush1.bf16.msra.mxu0 %v6154_v29  ;;  %4591 = vmatpush1.bf16.msra.mxu1 %v6157_v30  ;;  %v6231_v29 = vld [vmem:[%s6966_s4 + $0xa4c] ss:$16 sps:$4 sm:$0xff]   ;;  %v6226_v30 = vld [vmem:[%s6966_s4 + $0xa40] ss:$16 sps:$4 sm:$0xff]  }
 0x1b6   : > { %4264 = vmatprep.subr.bf16.mxu0 %v6162_v31  ;;  %4592 = vmatprep.subr.bf16.mxu1 %v6165_v33  ;;  %v6229_v31 = vld [vmem:[%s6966_s4 + $0xa48] ss:$16 sps:$4 sm:$0xff]   ;;  %v6234_v33 = vld [vmem:[%s6966_s4 + $0xa64] ss:$16 sps:$4 sm:$0xff]  }
 0x1b9   : > { %4265 = vmatpush1.bf16.msra.mxu0 %v6160_v34  ;;  %4593 = vmatpush1.bf16.msra.mxu1 %v6163_v35  ;;  %v6237_v34 = vld [vmem:[%s6966_s4 + $0xa6c] ss:$16 sps:$4 sm:$0xff]   ;;  %v6232_v35 = vld [vmem:[%s6966_s4 + $0xa60] ss:$16 sps:$4 sm:$0xff]  }
 0x1ba   : > { %4266 = vmatprep.subr.bf16.mxu0 %v6168_v36  ;;  %4594 = vmatprep.subr.bf16.mxu1 %v6171_v38  ;;  %v6235_v36 = vld [vmem:[%s6966_s4 + $0xa68] ss:$16 sps:$4 sm:$0xff]   ;;  %v6240_v38 = vld [vmem:[%s6966_s4 + $0xa84] ss:$16 sps:$4 sm:$0xff]  }
 0x1bd   : > { %4267 = vmatpush1.bf16.msra.mxu0 %v6166_v39  ;;  %4595 = vmatpush1.bf16.msra.mxu1 %v6169_v41  ;;  %v6243_v39 = vld [vmem:[%s6966_s4 + $0xa8c] ss:$16 sps:$4 sm:$0xff]   ;;  %v6238_v41 = vld [vmem:[%s6966_s4 + $0xa80] ss:$16 sps:$4 sm:$0xff]  }
 0x1be   : > { %4268 = vmatprep.subr.bf16.mxu0 %v6174_v42  ;;  %4596 = vmatprep.subr.bf16.mxu1 %v6177_v43  ;;  %v6241_v42 = vld [vmem:[%s6966_s4 + $0xa88] ss:$16 sps:$4 sm:$0xff]   ;;  %v6246_v43 = vld [vmem:[%s6966_s4 + $0xaa4] ss:$16 sps:$4 sm:$0xff]  }
 0x1c1   : > { %4269 = vmatpush1.bf16.msra.mxu0 %v6172_v44  ;;  %4597 = vmatpush1.bf16.msra.mxu1 %v6175_v45  ;;  %v6249_v44 = vld [vmem:[%s6966_s4 + $0xaac] ss:$16 sps:$4 sm:$0xff]   ;;  %v6244_v45 = vld [vmem:[%s6966_s4 + $0xaa0] ss:$16 sps:$4 sm:$0xff]  }
 0x1c2   : > { %4270 = vmatprep.subr.bf16.mxu0 %v6180_v47  ;;  %4598 = vmatprep.subr.bf16.mxu1 %v6183_v55  ;;  %v6247_v47 = vld [vmem:[%s6966_s4 + $0xaa8] ss:$16 sps:$4 sm:$0xff]   ;;  %v6252_v55 = vld [vmem:[%s6966_s4 + $0xac4] ss:$16 sps:$4 sm:$0xff]  }
 0x1c5   : > { %4271 = vmatpush1.bf16.msra.mxu0 %v6178_v62  ;;  %4599 = vmatpush1.bf16.msra.mxu1 %v6181_v63  ;;  %v6255_v62 = vld [vmem:[%s6966_s4 + $0xacc] ss:$16 sps:$4 sm:$0xff]   ;;  %v499_v63 = vrot.slane %v7345_v32, %v7170_v46 }
 0x1c6   : > { %4272 = vmatprep.subr.bf16.mxu0 %v6186_v0  ;;  %4600 = vmatprep.subr.bf16.mxu1 %v6189_v40  ;;  %v503_v0 = vrot.slane %v7345_v32, %v7174_v49  ;;  %v507_v40 = vrot.slane %v7345_v32, %v7177_v50 }
 0x1c9   : > { %4273 = vmatpush1.bf16.msra.mxu0 %v6184_v4  ;;  %4601 = vmatpush1.bf16.msra.mxu1 %v6187_v2  ;;  %v511_v4 = vrot.slane %v7345_v32, %v7180_v53  ;;  %v6250_v2 = vld [vmem:[%s6966_s4 + $0xac0] ss:$16 sps:$4 sm:$0xff]   ;;  %v647_v32 = vrot.slane %v7358_v37, %v7174_v49 }
 0x1ca   : > { %4274 = vmatprep.subr.bf16.mxu0 %v6192_v6  ;;  %4602 = vmatprep.subr.bf16.mxu1 %v6195_v7  ;;  %v6253_v6 = vld [vmem:[%s6966_s4 + $0xac8] ss:$16 sps:$4 sm:$0xff]   ;;  %v6258_v7 = vld [vmem:[%s6966_s4 + $0xae4] ss:$16 sps:$4 sm:$0xff]  }
 0x1cd   : > { %4275 = vmatpush1.bf16.msra.mxu0 %v6190_v8  ;;  %4603 = vmatpush1.bf16.msra.mxu1 %v6193_v57  ;;  %v6261_v8 = vld [vmem:[%s6966_s4 + $0xaec] ss:$16 sps:$4 sm:$0xff]   ;;  %v563_v57 = vcombine.low %v499_v63, %v503_v0  ;;  %v6294_v63 = vld [vmem:[%s6966_s4 + $0xba4] ss:$16 sps:$4 sm:$0xff]  }
 0x1ce   : > { %4276 = vmatprep.subr.bf16.mxu0 %v6198_v9  ;;  %4604 = vmatprep.subr.bf16.mxu1 %v6201_v10  ;;  %v564_v9 = vcombine.low %v507_v40, %v511_v4  ;;  %v643_v10 = vrot.slane %v7358_v37, %v7170_v46  ;;  %v6297_v0 = vld [vmem:[%s6966_s4 + $0xbac] ss:$16 sps:$4 sm:$0xff]   ;;  %v6292_v4 = vld [vmem:[%s6966_s4 + $0xba0] ss:$16 sps:$4 sm:$0xff]  }
 0x1cf   : > { %v571_v37 = vrot.slane %v563_v57, %v7056_v58  ;;  %v6298_v57 = vld [vmem:[%s6966_s4 + $0xbc0] ss:$16 sps:$4 sm:$0xff]  }
 0x1d1   : > { %4277 = vmatpush1.bf16.msra.mxu0 %v6196_v11  ;;  %4605 = vmatpush1.bf16.msra.mxu1 %v6199_v12  ;;  %v6510_v11 = vld [vmem:[%s7841_s2 + $0x8] sm:$0xff] }
 0x1d2   : > { %4278 = vmatprep.subr.bf16.mxu0 %v6204_v3  ;;  %4606 = vmatprep.subr.bf16.mxu1 %v6207_v13  ;;  %v651_v12 = vrot.slane %v6510_v11, %v7177_v50  ;;  %v655_v3 = vrot.slane %v6510_v11, %v7180_v53  ;;  %v6256_v13 = vld [vmem:[%s6966_s4 + $0xae0] ss:$16 sps:$4 sm:$0xff]  }
 0x1d3   : > { %v6268_v53 = vld [vmem:[%s6966_s4 + $0xb20] ss:$16 sps:$4 sm:$0xff]  }
 0x1d5   : > { %4279 = vmatpush1.bf16.msra.mxu0 %v6202_v5  ;;  %4607 = vmatpush1.bf16.msra.mxu1 %v6205_v15  ;;  %v6264_v5 = vld [vmem:[%s6966_s4 + $0xb04] ss:$16 sps:$4 sm:$0xff]   ;;  %v6267_v15 = vld [vmem:[%s6966_s4 + $0xb0c] ss:$16 sps:$4 sm:$0xff]  }
 0x1d6   : > { %4280 = vmatprep.subr.bf16.mxu0 %v6210_v16  ;;  %4608 = vmatprep.subr.bf16.mxu1 %v6213_v59  ;;  %v578_v16 = vrot.slane %v564_v9, %v7056_v58  ;;  %v707_v59 = vcombine.low %v643_v10, %v647_v32  ;;  %v6301_v9 = vld [vmem:[%s6966_s4 + $0xbc8] ss:$16 sps:$4 sm:$0xff]   ;;  %v6306_v10 = vld [vmem:[%s6966_s4 + $0xbe4] ss:$16 sps:$4 sm:$0xff]   ;;  %v6309_v32 = vld [vmem:[%s6966_s4 + $0xbec] ss:$16 sps:$4 sm:$0xff]  }
 0x1d9   : > { %4281 = vmatpush1.bf16.msra.mxu0 %v6208_v56  ;;  %4609 = vmatpush1.bf16.msra.mxu1 %v6211_v18  ;;  %v787_v56 = vrot.slane %v7375_v61, %v7170_v46  ;;  %v708_v18 = vcombine.low %v651_v12, %v655_v3  ;;  %v6270_v46 = vld [vmem:[%s6966_s4 + $0xb24] ss:$16 sps:$4 sm:$0xff]   ;;  %v6304_v12 = vld [vmem:[%s6966_s4 + $0xbe0] ss:$16 sps:$4 sm:$0xff]   ;;  %v6307_v3 = vld [vmem:[%s6966_s4 + $0xbe8] ss:$16 sps:$4 sm:$0xff]  }
 0x1da   : > { %4291 = vmatprep.subr.bf16.mxu0 %v6216_v19  ;;  %4619 = vmatprep.subr.bf16.mxu1 %v6219_v20  ;;  %v791_v19 = vrot.slane %v7375_v61, %v7174_v49  ;;  %v795_v20 = vrot.slane %v7375_v61, %v7177_v50  ;;  %v715_v49 = vrot.slane %v707_v59, %v7056_v58  ;;  %v6271_v61 = vld [vmem:[%s6966_s4 + $0xb28] ss:$16 sps:$4 sm:$0xff]   ;;  %v6318_v59 = vld [vmem:[%s6966_s4 + $0xc24] ss:$16 sps:$4 sm:$0xff]  }
 0x1db   : > { %v722_v50 = vrot.slane %v708_v18, %v7056_v58 }
 0x1dc   : > { %4283 = vmatmul.mubr.bf16.vlgmr.msra.gmra.mrb[0].mxu0 %v984_v22  ;;  %4611 = vmatmul.mubr.bf16.vlgmr.msra.gmra.mrb[0].mxu1 %v984_v22  ;;  %v6262_v22 = vld [vmem:[%s6966_s4 + $0xb00] ss:$16 sps:$4 sm:$0xff]  }
 0x1dd   : > { %4292 = vmatpush1.bf16.msra.mxu0 %v6214_v23  ;;  %4620 = vmatpush1.bf16.msra.mxu1 %v6217_v24  ;;  %v6265_v23 = vld [vmem:[%s6966_s4 + $0xb08] ss:$16 sps:$4 sm:$0xff]   ;;  %v6273_v24 = vld [vmem:[%s6966_s4 + $0xb2c] ss:$16 sps:$4 sm:$0xff]  }
 0x1de   : > { %4293 = vmatprep.subr.bf16.mxu0 %v6222_v25  ;;  %4621 = vmatprep.subr.bf16.mxu1 %v6225_v60  ;;  %v579_v25 = vcombine.low %v571_v37, %v578_v16  ;;  %v851_v60 = vcombine.low %v787_v56, %v791_v19  ;;  %v6310_v37 = vld [vmem:[%s6966_s4 + $0xc00] ss:$16 sps:$4 sm:$0xff]   ;;  %v6313_v16 = vld [vmem:[%s6966_s4 + $0xc08] ss:$16 sps:$4 sm:$0xff]   ;;  %v6321_v56 = vld [vmem:[%s6966_s4 + $0xc2c] ss:$16 sps:$4 sm:$0xff]  }
 0x1df   : > { %4323 = vmatprep.mubr.bf16.mxu0 %v987_v26  ;;  %4651 = vmatprep.mubr.bf16.mxu1 %v987_v26  ;;  %v852_v26 = vcombine.low %v795_v20, %v799_v21  ;;  %v6319_v19 = vld [vmem:[%s6966_s4 + $0xc28] ss:$16 sps:$4 sm:$0xff]   ;;  %v6324_v20 = vld [vmem:[%s6966_s4 + $0xc44] ss:$16 sps:$4 sm:$0xff]   ;;  %v6327_v21 = vld [vmem:[%s6966_s4 + $0xc4c] ss:$16 sps:$4 sm:$0xff]  }
 0x1e1   : > { %4294 = vmatpush1.bf16.msra.mxu0 %v6220_v1  ;;  %4622 = vmatpush1.bf16.msra.mxu1 %v6223_v27  ;;  %v443_v1 = vld [vmem:[%s7839_s0 + $0x18] sm:$0xff]  ;;  %v6276_v27 = vld [vmem:[%s6966_s4 + $0xb44] ss:$16 sps:$4 sm:$0xff]  }
 0x1e2   : > { %4295 = vmatprep.subr.bf16.mxu0 %v6228_v28  ;;  %4623 = vmatprep.subr.bf16.mxu1 %v6231_v29  ;;  %v6279_v28 = vld [vmem:[%s6966_s4 + $0xb4c] ss:$16 sps:$4 sm:$0xff]   ;;  %v587_v29 = vsub.f32 %v443_v1, %v579_v25  ;;  %v6331_v25 = vld [vmem:[%s6966_s4 + $0xc68] ss:$16 sps:$4 sm:$0xff]  }
 0x1e3   : > { %v6345_v1 = vld [vmem:[%s6966_s4 + $0xcac] ss:$16 sps:$4 sm:$0xff]  }
 0x1e5   : > { %4296 = vmatpush1.bf16.msra.mxu0 %v6226_v30  ;;  %4624 = vmatpush1.bf16.msra.mxu1 %v6229_v31  ;;  %v723_v30 = vcombine.low %v715_v49, %v722_v50  ;;  %v859_v31 = vrot.slane %v851_v60, %v7056_v58  ;;  %v6328_v49 = vld [vmem:[%s6966_s4 + $0xc60] ss:$16 sps:$4 sm:$0xff]   ;;  %v6336_v50 = vld [vmem:[%s6966_s4 + $0xc84] ss:$16 sps:$4 sm:$0xff]   ;;  %v6339_v60 = vld [vmem:[%s6966_s4 + $0xc8c] ss:$16 sps:$4 sm:$0xff]  }
 0x1e6   : > { %4297 = vmatprep.subr.bf16.mxu0 %v6234_v33  ;;  %4625 = vmatprep.subr.bf16.mxu1 %v6237_v34  ;;  %v866_v33 = vrot.slane %v852_v26, %v7056_v58  ;;  %v6274_v34 = vld [vmem:[%s6966_s4 + $0xb40] ss:$16 sps:$4 sm:$0xff]  }
 0x1e7   : > { %v6334_v26 = vld [vmem:[%s6966_s4 + $0xc80] ss:$16 sps:$4 sm:$0xff]  }
 0x1e9   : > { %4298 = vmatpush1.bf16.msra.mxu0 %v6232_v35  ;;  %4626 = vmatpush1.bf16.msra.mxu1 %v6235_v36  ;;  %v6277_v35 = vld [vmem:[%s6966_s4 + $0xb48] ss:$16 sps:$4 sm:$0xff]   ;;  %v6282_v36 = vld [vmem:[%s6966_s4 + $0xb64] ss:$16 sps:$4 sm:$0xff]  }
 0x1ea   : > { %4299 = vmatprep.subr.bf16.mxu0 %v6240_v38  ;;  %4627 = vmatprep.subr.bf16.mxu1 %v6243_v39  ;;  %v6285_v38 = vld [vmem:[%s6966_s4 + $0xb6c] ss:$16 sps:$4 sm:$0xff]   ;;  %v731_v39 = vmul.f32 %v723_v30, %v587_v29  ;;  %v6348_v29 = vld [vmem:[%s6966_s4 + $0xcc4] ss:$16 sps:$4 sm:$0xff]  }
 0x1eb   : > { %v6351_v30 = vld [vmem:[%s6966_s4 + $0xccc] ss:$16 sps:$4 sm:$0xff]  }
 0x1ed   : > { %4300 = vmatpush1.bf16.msra.mxu0 %v6238_v41  ;;  %4628 = vmatpush1.bf16.msra.mxu1 %v6241_v42  ;;  %v867_v41 = vcombine.low %v859_v31, %v866_v33  ;;  %v6280_v42 = vld [vmem:[%s6966_s4 + $0xb60] ss:$16 sps:$4 sm:$0xff]   ;;  %v6349_v33 = vld [vmem:[%s6966_s4 + $0xcc8] ss:$16 sps:$4 sm:$0xff]  }
 0x1ee   : > { %4301 = vmatprep.subr.bf16.mxu0 %v6246_v43  ;;  %4629 = vmatprep.subr.bf16.mxu1 %v6249_v44  ;;  %v6283_v43 = vld [vmem:[%s6966_s4 + $0xb68] ss:$16 sps:$4 sm:$0xff]   ;;  %v6288_v44 = vld [vmem:[%s6966_s4 + $0xb84] ss:$16 sps:$4 sm:$0xff]   ;;  %v6346_v31 = vld [vmem:[%s6966_s4 + $0xcc0] ss:$16 sps:$4 sm:$0xff]  }
 0x1f1   : > { %4302 = vmatpush1.bf16.msra.mxu0 %v6244_v45  ;;  %4630 = vmatpush1.bf16.msra.mxu1 %v6247_v47  ;;  %v6291_v45 = vld [vmem:[%s6966_s4 + $0xb8c] ss:$16 sps:$4 sm:$0xff]   ;;  %v875_v47 = vadd.f32 %v867_v41, %v731_v39  ;;  %v6360_v39 = vld [vmem:[%s6966_s4 + $0xd04] ss:$16 sps:$4 sm:$0xff]  }
 0x1f2   : > { %4303 = vmatprep.subr.bf16.mxu0 %v6252_v55  ;;  %4631 = vmatprep.subr.bf16.mxu1 %v6255_v62  ;;  %v6286_v55 = vld [vmem:[%s6966_s4 + $0xb80] ss:$16 sps:$4 sm:$0xff]   ;;  %v6289_v62 = vld [vmem:[%s6966_s4 + $0xb88] ss:$16 sps:$4 sm:$0xff]   ;;  %v6363_v41 = vld [vmem:[%s6966_s4 + $0xd0c] ss:$16 sps:$4 sm:$0xff]  }
 0x1f3   : > { %v883_v40 = vmul.f32 0.2, %v875_v47  ;;  %vm879_vm3 = vcmp.gt.f32.partialorder %v875_v47, 0.0 }
 0x1f5   : > { %4304 = vmatpush1.bf16.msra.mxu0 %v6250_v2  ;;  %4632 = vmatpush1.bf16.msra.mxu1 %v6253_v6  ;;  %v6295_v2 = vld [vmem:[%s6966_s4 + $0xba8] ss:$16 sps:$4 sm:$0xff]   ;;  %v6300_v6 = vld [vmem:[%s6966_s4 + $0xbc4] ss:$16 sps:$4 sm:$0xff]  }
 0x1f6   : > { %4305 = vmatprep.subr.bf16.mxu0 %v6258_v7  ;;  %4633 = vmatprep.subr.bf16.mxu1 %v6261_v8  ;;  %v6303_v7 = vld [vmem:[%s6966_s4 + $0xbcc] ss:$16 sps:$4 sm:$0xff]   ;;  %v7602_v8 = vsel %vm879_vm3, %v875_v47, %v883_v40  ;;  %v6364_v47 = vld [vmem:[%s6966_s4 + $0xd20] ss:$16 sps:$4 sm:$0xff]   ;;  %v6373_v40 = vld [vmem:[%s6966_s4 + $0xd48] ss:$16 sps:$4 sm:$0xff]  }
 0x1f7   : > { %v7610_v11 = vrot.slane %v7602_v8, %v7056_v58 }
 0x1f9   : > { %4306 = vmatpush1.bf16.msra.mxu0 %v6256_v13  ;;  %4634 = vmatpush1.bf16.msra.mxu1 %v6259_v14  ;;  %v6312_v13 = vld [vmem:[%s6966_s4 + $0xc04] ss:$16 sps:$4 sm:$0xff]   ;;  %v6315_v14 = vld [vmem:[%s6966_s4 + $0xc0c] ss:$16 sps:$4 sm:$0xff]  }
 0x1fa   : > { %4307 = vmatprep.subr.bf16.mxu0 %v6264_v5  ;;  %4635 = vmatprep.subr.bf16.mxu1 %v6267_v15  ;;  %v958_v5 = vcombine.high %v7610_v11, %v7610_v11  ;;  %v986_v15 = vpack.c.bf16 %v7502_v17, %v7502_v17  ;;  %v6316_v17 = vld [vmem:[%s6966_s4 + $0xc20] ss:$16 sps:$4 sm:$0xff]  }
 0x1fc   : > { %v989_v18 = vpack.c.bf16 %v958_v5, %v958_v5  ;;  %v6396_v5 = vld [vmem:[%s6966_s4 + $0xdc4] ss:$16 sps:$4 sm:$0xff]  }
 0x1fd   : > { %4308 = vmatpush1.bf16.msra.mxu0 %v6262_v22  ;;  %4636 = vmatpush1.bf16.msra.mxu1 %v6265_v23  ;;  %v6322_v22 = vld [vmem:[%s6966_s4 + $0xc40] ss:$16 sps:$4 sm:$0xff]   ;;  %v6325_v23 = vld [vmem:[%s6966_s4 + $0xc48] ss:$16 sps:$4 sm:$0xff]  }
 0x1fe   : > { %4309 = vmatprep.subr.bf16.mxu0 %v6270_v46  ;;  %4637 = vmatprep.subr.bf16.mxu1 %v6273_v24  ;;  %v6330_v46 = vld [vmem:[%s6966_s4 + $0xc64] ss:$16 sps:$4 sm:$0xff]   ;;  %v6333_v24 = vld [vmem:[%s6966_s4 + $0xc6c] ss:$16 sps:$4 sm:$0xff]  }
 0x201   : > { %4310 = vmatpush1.bf16.msra.mxu0 %v6268_v53  ;;  %4638 = vmatpush1.bf16.msra.mxu1 %v6271_v61  ;;  %v6337_v53 = vld [vmem:[%s6966_s4 + $0xc88] ss:$16 sps:$4 sm:$0xff]   ;;  %v6342_v61 = vld [vmem:[%s6966_s4 + $0xca4] ss:$16 sps:$4 sm:$0xff]  }
 0x202   : > { %4311 = vmatprep.subr.bf16.mxu0 %v6276_v27  ;;  %4639 = vmatprep.subr.bf16.mxu1 %v6279_v28  ;;  %v6340_v27 = vld [vmem:[%s6966_s4 + $0xca0] ss:$16 sps:$4 sm:$0xff]   ;;  %v6343_v28 = vld [vmem:[%s6966_s4 + $0xca8] ss:$16 sps:$4 sm:$0xff]  }
 0x205   : > { %4312 = vmatpush1.bf16.msra.mxu0 %v6274_v34  ;;  %4640 = vmatpush1.bf16.msra.mxu1 %v6277_v35  ;;  %v6354_v34 = vld [vmem:[%s6966_s4 + $0xce4] ss:$16 sps:$4 sm:$0xff]   ;;  %v6357_v35 = vld [vmem:[%s6966_s4 + $0xcec] ss:$16 sps:$4 sm:$0xff]  }
 0x206   : > { %4313 = vmatprep.subr.bf16.mxu0 %v6282_v36  ;;  %4641 = vmatprep.subr.bf16.mxu1 %v6285_v38  ;;  %v6352_v36 = vld [vmem:[%s6966_s4 + $0xce0] ss:$16 sps:$4 sm:$0xff]   ;;  %v6355_v38 = vld [vmem:[%s6966_s4 + $0xce8] ss:$16 sps:$4 sm:$0xff]  }
 0x209   : > { %4314 = vmatpush1.bf16.msra.mxu0 %v6280_v42  ;;  %4642 = vmatpush1.bf16.msra.mxu1 %v6283_v43  ;;  %v6358_v42 = vld [vmem:[%s6966_s4 + $0xd00] ss:$16 sps:$4 sm:$0xff]   ;;  %v6361_v43 = vld [vmem:[%s6966_s4 + $0xd08] ss:$16 sps:$4 sm:$0xff]  }
 0x20a   : > { %4315 = vmatprep.subr.bf16.mxu0 %v6288_v44  ;;  %4643 = vmatprep.subr.bf16.mxu1 %v6291_v45  ;;  %v6366_v44 = vld [vmem:[%s6966_s4 + $0xd24] ss:$16 sps:$4 sm:$0xff]   ;;  %v6369_v45 = vld [vmem:[%s6966_s4 + $0xd2c] ss:$16 sps:$4 sm:$0xff]  }
 0x20d   : > { %4316 = vmatpush1.bf16.msra.mxu0 %v6286_v55  ;;  %4644 = vmatpush1.bf16.msra.mxu1 %v6289_v62  ;;  %v6367_v55 = vld [vmem:[%s6966_s4 + $0xd28] ss:$16 sps:$4 sm:$0xff]   ;;  %v6372_v62 = vld [vmem:[%s6966_s4 + $0xd44] ss:$16 sps:$4 sm:$0xff]  }
 0x20e   : > { %4317 = vmatprep.subr.bf16.mxu0 %v6294_v63  ;;  %4645 = vmatprep.subr.bf16.mxu1 %v6297_v0  ;;  %v6375_v63 = vld [vmem:[%s6966_s4 + $0xd4c] ss:$16 sps:$4 sm:$0xff]   ;;  %v6370_v0 = vld [vmem:[%s6966_s4 + $0xd40] ss:$16 sps:$4 sm:$0xff]  }
 0x211   : > { %4318 = vmatpush1.bf16.msra.mxu0 %v6292_v4  ;;  %4646 = vmatpush1.bf16.msra.mxu1 %v6295_v2  ;;  %v6378_v4 = vld [vmem:[%s6966_s4 + $0xd64] ss:$16 sps:$4 sm:$0xff]   ;;  %v6381_v2 = vld [vmem:[%s6966_s4 + $0xd6c] ss:$16 sps:$4 sm:$0xff]  }
 0x212   : > { %4319 = vmatprep.subr.bf16.mxu0 %v6300_v6  ;;  %4647 = vmatprep.subr.bf16.mxu1 %v6303_v7  ;;  %v6376_v6 = vld [vmem:[%s6966_s4 + $0xd60] ss:$16 sps:$4 sm:$0xff]   ;;  %v6379_v7 = vld [vmem:[%s6966_s4 + $0xd68] ss:$16 sps:$4 sm:$0xff]  }
 0x215   : > { %4320 = vmatpush1.bf16.msra.mxu0 %v6298_v57  ;;  %4648 = vmatpush1.bf16.msra.mxu1 %v6301_v9  ;;  %v6384_v57 = vld [vmem:[%s6966_s4 + $0xd84] ss:$16 sps:$4 sm:$0xff]   ;;  %v6387_v9 = vld [vmem:[%s6966_s4 + $0xd8c] ss:$16 sps:$4 sm:$0xff]  }
 0x216   : > { %4321 = vmatprep.subr.bf16.mxu0 %v6306_v10  ;;  %4649 = vmatprep.subr.bf16.mxu1 %v6309_v32  ;;  %v6382_v10 = vld [vmem:[%s6966_s4 + $0xd80] ss:$16 sps:$4 sm:$0xff]   ;;  %v6385_v32 = vld [vmem:[%s6966_s4 + $0xd88] ss:$16 sps:$4 sm:$0xff]  }
 0x219   : > { %4322 = vmatpush1.bf16.msra.mxu0 %v6304_v12  ;;  %4650 = vmatpush1.bf16.msra.mxu1 %v6307_v3  ;;  %v6390_v12 = vld [vmem:[%s6966_s4 + $0xda4] ss:$16 sps:$4 sm:$0xff]   ;;  %v6393_v3 = vld [vmem:[%s6966_s4 + $0xdac] ss:$16 sps:$4 sm:$0xff]  }
 0x21a   : > { %4332 = vmatprep.subr.bf16.mxu0 %v6312_v13  ;;  %4660 = vmatprep.subr.bf16.mxu1 %v6315_v14  ;;  %v6388_v13 = vld [vmem:[%s6966_s4 + $0xda0] ss:$16 sps:$4 sm:$0xff]   ;;  %v6391_v14 = vld [vmem:[%s6966_s4 + $0xda8] ss:$16 sps:$4 sm:$0xff]  }
 0x21c   : > { %4324 = vmatmul.mubr.bf16.vlgmr.msra.gmra.mrb[0].mxu0 %v986_v15  ;;  %4652 = vmatmul.mubr.bf16.vlgmr.msra.gmra.mrb[0].mxu1 %v986_v15  ;;  %v6399_v15 = vld [vmem:[%s6966_s4 + $0xdcc] ss:$16 sps:$4 sm:$0xff]  }
 0x21d   : > { %4333 = vmatpush1.bf16.msra.mxu0 %v6310_v37  ;;  %4661 = vmatpush1.bf16.msra.mxu1 %v6313_v16  ;;  %v943_v37 = vcombine.high %v7602_v8, %v7602_v8  ;;  %v6394_v16 = vld [vmem:[%s6966_s4 + $0xdc0] ss:$16 sps:$4 sm:$0xff]  }
 0x21e   : > { %4334 = vmatprep.subr.bf16.mxu0 %v6318_v59  ;;  %4662 = vmatprep.subr.bf16.mxu1 %v6321_v56  ;;  %v6397_v59 = vld [vmem:[%s6966_s4 + $0xdc8] ss:$16 sps:$4 sm:$0xff]   ;;  %v6402_v56 = vld [vmem:[%s6966_s4 + $0xde4] ss:$16 sps:$4 sm:$0xff]   ;;  %v6400_v8 = vld [vmem:[%s6966_s4 + $0xde0] ss:$16 sps:$4 sm:$0xff]  }
 0x21f   : > { %4364 = vmatprep.mubr.bf16.mxu0 %v989_v18  ;;  %4692 = vmatprep.mubr.bf16.mxu1 %v989_v18  ;;  %v6405_v18 = vld [vmem:[%s6966_s4 + $0xdec] ss:$16 sps:$4 sm:$0xff]  }
 0x221   : > { %4335 = vmatpush1.bf16.msra.mxu0 %v6316_v17  ;;  %4663 = vmatpush1.bf16.msra.mxu1 %v6319_v19  ;;  %v7683_v17 = vrot.slane %v943_v37, %v7056_v58  ;;  %v6403_v19 = vld [vmem:[%s6966_s4 + $0xde8] ss:$16 sps:$4 sm:$0xff]   ;;  %v6480_v37 = vld [vmem:[%s6966_s4 + $0xf84] ss:$16 sps:$4 sm:$0xff]  }
 0x222   : > { %4336 = vmatprep.subr.bf16.mxu0 %v6324_v20  ;;  %4664 = vmatprep.subr.bf16.mxu1 %v6327_v21  ;;  %v6408_v20 = vld [vmem:[%s6966_s4 + $0xe04] ss:$16 sps:$4 sm:$0xff]   ;;  %v6411_v21 = vld [vmem:[%s6966_s4 + $0xe0c] ss:$16 sps:$4 sm:$0xff]  }
 0x225   : > { %4337 = vmatpush1.bf16.msra.mxu0 %v6322_v22  ;;  %4665 = vmatpush1.bf16.msra.mxu1 %v6325_v23  ;;  %v959_v22 = vcombine.high %v7683_v17, %v7683_v17  ;;  %v988_v23 = vpack.c.bf16 %v7610_v11, %v7610_v11  ;;  %v6412_v11 = vld [vmem:[%s6966_s4 + $0xe20] ss:$16 sps:$4 sm:$0xff]  }
 0x226   : > { %4338 = vmatprep.subr.bf16.mxu0 %v6330_v46  ;;  %4666 = vmatprep.subr.bf16.mxu1 %v6333_v24  ;;  %v6406_v46 = vld [vmem:[%s6966_s4 + $0xe00] ss:$16 sps:$4 sm:$0xff]   ;;  %v6409_v24 = vld [vmem:[%s6966_s4 + $0xe08] ss:$16 sps:$4 sm:$0xff]  }
 0x229   : > { %4339 = vmatpush1.bf16.msra.mxu0 %v6328_v49  ;;  %4667 = vmatpush1.bf16.msra.mxu1 %v6331_v25  ;;  %v6414_v49 = vld [vmem:[%s6966_s4 + $0xe24] ss:$16 sps:$4 sm:$0xff]   ;;  %v6417_v25 = vld [vmem:[%s6966_s4 + $0xe2c] ss:$16 sps:$4 sm:$0xff]  }
 0x22a   : > { %4340 = vmatprep.subr.bf16.mxu0 %v6336_v50  ;;  %4668 = vmatprep.subr.bf16.mxu1 %v6339_v60  ;;  %v991_v50 = vpack.c.bf16 %v959_v22, %v959_v22  ;;  %v6415_v60 = vld [vmem:[%s6966_s4 + $0xe28] ss:$16 sps:$4 sm:$0xff]   ;;  %v6495_v22 = vld [vmem:[%s6966_s4 + $0xfcc] ss:$16 sps:$4 sm:$0xff]  }
 0x22d   : > { %4341 = vmatpush1.bf16.msra.mxu0 %v6334_v26  ;;  %4669 = vmatpush1.bf16.msra.mxu1 %v6337_v53  ;;  %v6420_v26 = vld [vmem:[%s6966_s4 + $0xe44] ss:$16 sps:$4 sm:$0xff]   ;;  %v6423_v53 = vld [vmem:[%s6966_s4 + $0xe4c] ss:$16 sps:$4 sm:$0xff]  }
 0x22e   : > { %4342 = vmatprep.subr.bf16.mxu0 %v6342_v61  ;;  %4670 = vmatprep.subr.bf16.mxu1 %v6345_v1  ;;  %v6418_v61 = vld [vmem:[%s6966_s4 + $0xe40] ss:$16 sps:$4 sm:$0xff]   ;;  %v6421_v1 = vld [vmem:[%s6966_s4 + $0xe48] ss:$16 sps:$4 sm:$0xff]  }
 0x231   : > { %4343 = vmatpush1.bf16.msra.mxu0 %v6340_v27  ;;  %4671 = vmatpush1.bf16.msra.mxu1 %v6343_v28  ;;  %v6426_v27 = vld [vmem:[%s6966_s4 + $0xe64] ss:$16 sps:$4 sm:$0xff]   ;;  %v6429_v28 = vld [vmem:[%s6966_s4 + $0xe6c] ss:$16 sps:$4 sm:$0xff]  }
 0x232   : > { %4344 = vmatprep.subr.bf16.mxu0 %v6348_v29  ;;  %4672 = vmatprep.subr.bf16.mxu1 %v6351_v30  ;;  %v6424_v29 = vld [vmem:[%s6966_s4 + $0xe60] ss:$16 sps:$4 sm:$0xff]   ;;  %v6427_v30 = vld [vmem:[%s6966_s4 + $0xe68] ss:$16 sps:$4 sm:$0xff]  }
 0x235   : > { %4345 = vmatpush1.bf16.msra.mxu0 %v6346_v31  ;;  %4673 = vmatpush1.bf16.msra.mxu1 %v6349_v33  ;;  %v6432_v31 = vld [vmem:[%s6966_s4 + $0xe84] ss:$16 sps:$4 sm:$0xff]   ;;  %v6435_v33 = vld [vmem:[%s6966_s4 + $0xe8c] ss:$16 sps:$4 sm:$0xff]  }
 0x236   : > { %4346 = vmatprep.subr.bf16.mxu0 %v6354_v34  ;;  %4674 = vmatprep.subr.bf16.mxu1 %v6357_v35  ;;  %v6430_v34 = vld [vmem:[%s6966_s4 + $0xe80] ss:$16 sps:$4 sm:$0xff]   ;;  %v6433_v35 = vld [vmem:[%s6966_s4 + $0xe88] ss:$16 sps:$4 sm:$0xff]  }
 0x239   : > { %4347 = vmatpush1.bf16.msra.mxu0 %v6352_v36  ;;  %4675 = vmatpush1.bf16.msra.mxu1 %v6355_v38  ;;  %v6438_v36 = vld [vmem:[%s6966_s4 + $0xea4] ss:$16 sps:$4 sm:$0xff]   ;;  %v6441_v38 = vld [vmem:[%s6966_s4 + $0xeac] ss:$16 sps:$4 sm:$0xff]  }
 0x23a   : > { %4348 = vmatprep.subr.bf16.mxu0 %v6360_v39  ;;  %4676 = vmatprep.subr.bf16.mxu1 %v6363_v41  ;;  %v6436_v39 = vld [vmem:[%s6966_s4 + $0xea0] ss:$16 sps:$4 sm:$0xff]   ;;  %v6439_v41 = vld [vmem:[%s6966_s4 + $0xea8] ss:$16 sps:$4 sm:$0xff]  }
 0x23d   : > { %4349 = vmatpush1.bf16.msra.mxu0 %v6358_v42  ;;  %4677 = vmatpush1.bf16.msra.mxu1 %v6361_v43  ;;  %v6444_v42 = vld [vmem:[%s6966_s4 + $0xec4] ss:$16 sps:$4 sm:$0xff]   ;;  %v6447_v43 = vld [vmem:[%s6966_s4 + $0xecc] ss:$16 sps:$4 sm:$0xff]  }
 0x23e   : > { %4350 = vmatprep.subr.bf16.mxu0 %v6366_v44  ;;  %4678 = vmatprep.subr.bf16.mxu1 %v6369_v45  ;;  %v6442_v44 = vld [vmem:[%s6966_s4 + $0xec0] ss:$16 sps:$4 sm:$0xff]   ;;  %v6445_v45 = vld [vmem:[%s6966_s4 + $0xec8] ss:$16 sps:$4 sm:$0xff]  }
 0x241   : > { %4351 = vmatpush1.bf16.msra.mxu0 %v6364_v47  ;;  %4679 = vmatpush1.bf16.msra.mxu1 %v6367_v55  ;;  %v6450_v47 = vld [vmem:[%s6966_s4 + $0xee4] ss:$16 sps:$4 sm:$0xff]   ;;  %v6453_v55 = vld [vmem:[%s6966_s4 + $0xeec] ss:$16 sps:$4 sm:$0xff]  }
 0x242   : > { %4352 = vmatprep.subr.bf16.mxu0 %v6372_v62  ;;  %4680 = vmatprep.subr.bf16.mxu1 %v6375_v63  ;;  %v6448_v62 = vld [vmem:[%s6966_s4 + $0xee0] ss:$16 sps:$4 sm:$0xff]   ;;  %v6451_v63 = vld [vmem:[%s6966_s4 + $0xee8] ss:$16 sps:$4 sm:$0xff]  }
 0x245   : > { %4353 = vmatpush1.bf16.msra.mxu0 %v6370_v0  ;;  %4681 = vmatpush1.bf16.msra.mxu1 %v6373_v40  ;;  %v6456_v0 = vld [vmem:[%s6966_s4 + $0xf04] ss:$16 sps:$4 sm:$0xff]   ;;  %v6459_v40 = vld [vmem:[%s6966_s4 + $0xf0c] ss:$16 sps:$4 sm:$0xff]  }
 0x246   : > { %4354 = vmatprep.subr.bf16.mxu0 %v6378_v4  ;;  %4682 = vmatprep.subr.bf16.mxu1 %v6381_v2  ;;  %v6454_v4 = vld [vmem:[%s6966_s4 + $0xf00] ss:$16 sps:$4 sm:$0xff]   ;;  %v6457_v2 = vld [vmem:[%s6966_s4 + $0xf08] ss:$16 sps:$4 sm:$0xff]  }
 0x249   : > { %4355 = vmatpush1.bf16.msra.mxu0 %v6376_v6  ;;  %4683 = vmatpush1.bf16.msra.mxu1 %v6379_v7  ;;  %v6462_v6 = vld [vmem:[%s6966_s4 + $0xf24] ss:$16 sps:$4 sm:$0xff]   ;;  %v6465_v7 = vld [vmem:[%s6966_s4 + $0xf2c] ss:$16 sps:$4 sm:$0xff]  }
 0x24a   : > { %4356 = vmatprep.subr.bf16.mxu0 %v6384_v57  ;;  %4684 = vmatprep.subr.bf16.mxu1 %v6387_v9  ;;  %v6460_v57 = vld [vmem:[%s6966_s4 + $0xf20] ss:$16 sps:$4 sm:$0xff]   ;;  %v6463_v9 = vld [vmem:[%s6966_s4 + $0xf28] ss:$16 sps:$4 sm:$0xff]  }
 0x24d   : > { %4357 = vmatpush1.bf16.msra.mxu0 %v6382_v10  ;;  %4685 = vmatpush1.bf16.msra.mxu1 %v6385_v32  ;;  %v6468_v10 = vld [vmem:[%s6966_s4 + $0xf44] ss:$16 sps:$4 sm:$0xff]   ;;  %v6471_v32 = vld [vmem:[%s6966_s4 + $0xf4c] ss:$16 sps:$4 sm:$0xff]  }
 0x24e   : > { %4358 = vmatprep.subr.bf16.mxu0 %v6390_v12  ;;  %4686 = vmatprep.subr.bf16.mxu1 %v6393_v3  ;;  %v6466_v12 = vld [vmem:[%s6966_s4 + $0xf40] ss:$16 sps:$4 sm:$0xff]   ;;  %v6469_v3 = vld [vmem:[%s6966_s4 + $0xf48] ss:$16 sps:$4 sm:$0xff]  }
 0x251   : > { %4359 = vmatpush1.bf16.msra.mxu0 %v6388_v13  ;;  %4687 = vmatpush1.bf16.msra.mxu1 %v6391_v14  ;;  %v6474_v13 = vld [vmem:[%s6966_s4 + $0xf64] ss:$16 sps:$4 sm:$0xff]   ;;  %v6477_v14 = vld [vmem:[%s6966_s4 + $0xf6c] ss:$16 sps:$4 sm:$0xff]  }
 0x252   : > { %4360 = vmatprep.subr.bf16.mxu0 %v6396_v5  ;;  %4688 = vmatprep.subr.bf16.mxu1 %v6399_v15  ;;  %v6472_v5 = vld [vmem:[%s6966_s4 + $0xf60] ss:$16 sps:$4 sm:$0xff]   ;;  %v6475_v15 = vld [vmem:[%s6966_s4 + $0xf68] ss:$16 sps:$4 sm:$0xff]  }
 0x255   : > { %4361 = vmatpush1.bf16.msra.mxu0 %v6394_v16  ;;  %4689 = vmatpush1.bf16.msra.mxu1 %v6397_v59  ;;  %v6483_v16 = vld [vmem:[%s6966_s4 + $0xf8c] ss:$16 sps:$4 sm:$0xff]   ;;  %v6478_v59 = vld [vmem:[%s6966_s4 + $0xf80] ss:$16 sps:$4 sm:$0xff]  }
 0x256   : > { %4362 = vmatprep.subr.bf16.mxu0 %v6402_v56  ;;  %4690 = vmatprep.subr.bf16.mxu1 %v6405_v18  ;;  %v6481_v56 = vld [vmem:[%s6966_s4 + $0xf88] ss:$16 sps:$4 sm:$0xff]   ;;  %v6486_v18 = vld [vmem:[%s6966_s4 + $0xfa4] ss:$16 sps:$4 sm:$0xff]  }
 0x259   : > { %4363 = vmatpush1.bf16.msra.mxu0 %v6400_v8  ;;  %4691 = vmatpush1.bf16.msra.mxu1 %v6403_v19  ;;  %v6489_v8 = vld [vmem:[%s6966_s4 + $0xfac] ss:$16 sps:$4 sm:$0xff]   ;;  %v6484_v19 = vld [vmem:[%s6966_s4 + $0xfa0] ss:$16 sps:$4 sm:$0xff]  }
 0x25a   : > { %4373 = vmatprep.subr.bf16.mxu0 %v6408_v20  ;;  %4701 = vmatprep.subr.bf16.mxu1 %v6411_v21  ;;  %v6487_v20 = vld [vmem:[%s6966_s4 + $0xfa8] ss:$16 sps:$4 sm:$0xff]   ;;  %v6492_v21 = vld [vmem:[%s6966_s4 + $0xfc4] ss:$16 sps:$4 sm:$0xff]  }
 0x25c   : > { %4365 = vmatmul.mubr.bf16.vlgmr.msra.gmra.mrb[0].mxu0 %v988_v23  ;;  %4693 = vmatmul.mubr.bf16.vlgmr.msra.gmra.mrb[0].mxu1 %v988_v23  ;;  %v6490_v23 = vld [vmem:[%s6966_s4 + $0xfc0] ss:$16 sps:$4 sm:$0xff]  }
 0x25d   : > { %4374 = vmatpush1.bf16.msra.mxu0 %v6406_v46  ;;  %4702 = vmatpush1.bf16.msra.mxu1 %v6409_v24  ;;  %v6493_v46 = vld [vmem:[%s6966_s4 + $0xfc8] ss:$16 sps:$4 sm:$0xff]   ;;  %v6498_v24 = vld [vmem:[%s6966_s4 + $0xfe4] ss:$16 sps:$4 sm:$0xff]  }
 0x25e   : > { %4375 = vmatprep.subr.bf16.mxu0 %v6414_v49  ;;  %4703 = vmatprep.subr.bf16.mxu1 %v6417_v25  ;;  %v6501_v49 = vld [vmem:[%s6966_s4 + $0xfec] ss:$16 sps:$4 sm:$0xff]   ;;  %v6496_v25 = vld [vmem:[%s6966_s4 + $0xfe0] ss:$16 sps:$4 sm:$0xff]  }
 0x25f   : > { %4405 = vmatprep.mubr.bf16.mxu0 %v991_v50  ;;  %4733 = vmatprep.mubr.bf16.mxu1 %v991_v50  ;;  %v6499_v50 = vld [vmem:[%s6966_s4 + $0xfe8] ss:$16 sps:$4 sm:$0xff]   ;;  %s5086_s4 = sshll.u32 %s6962_s14, 3 }
 0x261   : > { %4376 = vmatpush1.bf16.msra.mxu0 %v6412_v11  ;;  %4704 = vmatpush1.bf16.msra.mxu1 %v6415_v60  ;;  %v990_v11 = vpack.c.bf16 %v7683_v17, %v7683_v17  ;;  %v1504_v60 = vld [vmem:[%s369_s23] sm:$0xf]  ;;  %s434_s23 = scalar_lea.vmem [#allocation10], %s5086_s4 }
 0x262   : > { %4377 = vmatprep.subr.bf16.mxu0 %v6420_v26  ;;  %4705 = vmatprep.subr.bf16.mxu1 %v6423_v53  ;;  %v1509_v26 = vrot.slane %v1504_v60, %v7035_v48  ;;  %v1517_v53 = vrot.slane %v1504_v60, %v7042_v52 }
 0x265   : > { %4378 = vmatpush1.bf16.msra.mxu0 %v6418_v61  ;;  %4706 = vmatpush1.bf16.msra.mxu1 %v6421_v1  ;;  %v1513_v61 = vrot.slane %v1504_v60, %v7039_v51  ;;  %v1521_v1 = vrot.slane %v1504_v60, %v7046_v54 }
 0x266   : > { %4379 = vmatprep.subr.bf16.mxu0 %v6426_v27  ;;  %4707 = vmatprep.subr.bf16.mxu1 %v6429_v28 }
 0x269   : > { %4380 = vmatpush1.bf16.msra.mxu0 %v6424_v29  ;;  %4708 = vmatpush1.bf16.msra.mxu1 %v6427_v30 }
 0x26a   : > { %4381 = vmatprep.subr.bf16.mxu0 %v6432_v31  ;;  %4709 = vmatprep.subr.bf16.mxu1 %v6435_v33 }
 0x26d   : > { %4382 = vmatpush1.bf16.msra.mxu0 %v6430_v34  ;;  %4710 = vmatpush1.bf16.msra.mxu1 %v6433_v35 }
 0x26e   : > { %4383 = vmatprep.subr.bf16.mxu0 %v6438_v36  ;;  %4711 = vmatprep.subr.bf16.mxu1 %v6441_v38 }
 0x271   : > { %4384 = vmatpush1.bf16.msra.mxu0 %v6436_v39  ;;  %4712 = vmatpush1.bf16.msra.mxu1 %v6439_v41 }
 0x272   : > { %4385 = vmatprep.subr.bf16.mxu0 %v6444_v42  ;;  %4713 = vmatprep.subr.bf16.mxu1 %v6447_v43 }
 0x275   : > { %4386 = vmatpush1.bf16.msra.mxu0 %v6442_v44  ;;  %4714 = vmatpush1.bf16.msra.mxu1 %v6445_v45 }
 0x276   : > { %4387 = vmatprep.subr.bf16.mxu0 %v6450_v47  ;;  %4715 = vmatprep.subr.bf16.mxu1 %v6453_v55 }
 0x279   : > { %4388 = vmatpush1.bf16.msra.mxu0 %v6448_v62  ;;  %4716 = vmatpush1.bf16.msra.mxu1 %v6451_v63 }
 0x27a   : > { %4389 = vmatprep.subr.bf16.mxu0 %v6456_v0  ;;  %4717 = vmatprep.subr.bf16.mxu1 %v6459_v40 }
 0x27d   : > { %4390 = vmatpush1.bf16.msra.mxu0 %v6454_v4  ;;  %4718 = vmatpush1.bf16.msra.mxu1 %v6457_v2 }
 0x27e   : > { %4391 = vmatprep.subr.bf16.mxu0 %v6462_v6  ;;  %4719 = vmatprep.subr.bf16.mxu1 %v6465_v7 }
 0x281   : > { %4392 = vmatpush1.bf16.msra.mxu0 %v6460_v57  ;;  %4720 = vmatpush1.bf16.msra.mxu1 %v6463_v9 }
 0x282   : > { %4393 = vmatprep.subr.bf16.mxu0 %v6468_v10  ;;  %4721 = vmatprep.subr.bf16.mxu1 %v6471_v32 }
 0x285   : > { %4394 = vmatpush1.bf16.msra.mxu0 %v6466_v12  ;;  %4722 = vmatpush1.bf16.msra.mxu1 %v6469_v3 }
 0x286   : > { %4395 = vmatprep.subr.bf16.mxu0 %v6474_v13  ;;  %4723 = vmatprep.subr.bf16.mxu1 %v6477_v14 }
 0x289   : > { %4396 = vmatpush1.bf16.msra.mxu0 %v6472_v5  ;;  %4724 = vmatpush1.bf16.msra.mxu1 %v6475_v15 }
 0x28a   : > { %4397 = vmatprep.subr.bf16.mxu0 %v6480_v37  ;;  %4725 = vmatprep.subr.bf16.mxu1 %v6483_v16 }
 0x28d   : > { %4398 = vmatpush1.bf16.msra.mxu0 %v6478_v59  ;;  %4726 = vmatpush1.bf16.msra.mxu1 %v6481_v56 }
 0x28e   : > { %4399 = vmatprep.subr.bf16.mxu0 %v6486_v18  ;;  %4727 = vmatprep.subr.bf16.mxu1 %v6489_v8 }
 0x291   : > { %4400 = vmatpush1.bf16.msra.mxu0 %v6484_v19  ;;  %4728 = vmatpush1.bf16.msra.mxu1 %v6487_v20 }
 0x292   : > { %4401 = vmatprep.subr.bf16.mxu0 %v6492_v21  ;;  %4729 = vmatprep.subr.bf16.mxu1 %v6495_v22 }
 0x295   : > { %4402 = vmatpush1.bf16.msra.mxu0 %v6490_v23  ;;  %4730 = vmatpush1.bf16.msra.mxu1 %v6493_v46 }
 0x296   : > { %4403 = vmatprep.subr.bf16.mxu0 %v6498_v24  ;;  %4731 = vmatprep.subr.bf16.mxu1 %v6501_v49 }
 0x299   : > { %4404 = vmatpush1.bf16.msra.mxu0 %v6496_v25  ;;  %4732 = vmatpush1.bf16.msra.mxu1 %v6499_v50 }
 0x29c   : > { %4406 = vmatmul.mubr.bf16.vlgmr.msra.gmra.mrb[0].mxu0 %v990_v11  ;;  %4734 = vmatmul.mubr.bf16.vlgmr.msra.gmra.mrb[0].mxu1 %v990_v11 }
 0x36f   : > { %v4407_v27 = vpop.f32.mrb[0].mxu0  ;;  %v4735_v28 = vpop.f32.mrb[0].mxu1 }
 0x370   : > { %v5609_v29 = vadd.f32 %v4407_v27, %v1509_v26  ;;  %v5611_v30 = vadd.f32 %v4735_v28, %v1517_v53  ;;  %v4409_v17 = vpop.f32.mrb[1].mxu0  ;;  %v4737_v31 = vpop.f32.mrb[1].mxu1 }
 0x371   : > { %v5610_v33 = vadd.f32 %v4409_v17, %v1513_v61  ;;  %v5612_v34 = vadd.f32 %v4737_v31, %v1521_v1  ;;  %v4411_v35 = vpop.f32.mrb[2].mxu0  ;;  %v4739_v36 = vpop.f32.mrb[2].mxu1 }
 0x372   : > { %v4743_v38 = vsel %vm4742_vm4, %v5609_v29, 0.0  ;;  %v4757_v39 = vsel %vm4742_vm4, %v5611_v30, 0.0  ;;  %v4412_v41 = vpop.f32.mrb[3].mxu0  ;;  %v4740_v42 = vpop.f32.mrb[3].mxu1 }
 0x373   : > { %v4744_v43 = vrot.slane %v4743_v38, 4  ;;  %v4758_v44 = vrot.slane %v4757_v39, 4  ;;  %v4750_v45 = vsel %vm4742_vm4, %v5610_v33, 0.0  ;;  %v4764_v47 = vsel %vm4742_vm4, %v5612_v34, 0.0 }
 0x374   : > { %v4751_v55 = vrot.slane %v4750_v45, 4  ;;  %v4765_v62 = vrot.slane %v4764_v47, 4 }
 0x375   : > { %v4745_v63 = vadd.f32 %v4744_v43, %v4743_v38  ;;  %v4759_v0 = vadd.f32 %v4758_v44, %v4757_v39 }
 0x376   : > { %v4752_v40 = vadd.f32 %v4751_v55, %v4750_v45  ;;  %v4766_v4 = vadd.f32 %v4765_v62, %v4764_v47 }
 0x377   : > { %v4746_v2 = vrot.slane %v4745_v63, 2  ;;  %v4760_v6 = vrot.slane %v4759_v0, 2 }
 0x378   : > { %v4753_v7 = vrot.slane %v4752_v40, 2  ;;  %v4767_v57 = vrot.slane %v4766_v4, 2 }
 0x379   : > { %v4747_v9 = vadd.f32 %v4746_v2, %v4745_v63  ;;  %v4761_v10 = vadd.f32 %v4760_v6, %v4759_v0 }
 0x37a   : > { %v4754_v32 = vadd.f32 %v4753_v7, %v4752_v40  ;;  %v4768_v12 = vadd.f32 %v4767_v57, %v4766_v4 }
 0x37b   : > { %v4748_v3 = vrot.slane %v4747_v9, 1  ;;  %v4762_v13 = vrot.slane %v4761_v10, 1 }
 0x37c   : > { %v4755_v14 = vrot.slane %v4754_v32, 1  ;;  %v4769_v5 = vrot.slane %v4768_v12, 1 }
 0x37d   : > { %v4749_v15 = vadd.f32 %v4748_v3, %v4747_v9  ;;  %v4763_v37 = vadd.f32 %v4762_v13, %v4761_v10  ;;  %v4828_v10 = vld [vmem:[%s378_s30] sm:$0xf]  ;;  %s4930_s30 = sshll.u32 %s434_s23, 4  ;;  %s7797_s30 = int_to_ptr.vmem [resolvable:$true] %s4930_s30 }
 0x37e   : > { %v4756_v16 = vadd.f32 %v4755_v14, %v4754_v32  ;;  %v4770_v59 = vadd.f32 %v4769_v5, %v4768_v12  ;;  %v4854_v32 = vld [vmem:[%s387_s5] sm:$0xf]  ;;  %v4833_v12 = vrot.slane %v4828_v10, %v7035_v48  ;;  %v4841_v13 = vrot.slane %v4828_v10, %v7042_v52  ;;  %s6631_s20 = scalar_lea.vmem %s7797_s30, 128  ;;  %p6638_p10 = scmp.lt.s32.totalorder %s7797_s30, %s6636_s13 }
 0x37f   : > { %v4772_v56 = vmul.f32 0.5, %v4749_v15  ;;  %v4774_v18 = vmul.f32 0.5, %v4763_v37  ;;  %v4859_v15 = vrot.slane %v4854_v32, %v7035_v48  ;;  %v4837_v37 = vrot.slane %v4828_v10, %v7039_v51  ;;  %p6632_p5 = scmp.ne.s32.totalorder %s7797_s30, %s6631_s20  ;;  %p6639_p4 = scmp.lt.s32.totalorder %s6637_s8, %s6631_s20 }
 0x380   : > { %v4773_v8 = vmul.f32 0.5, %v4756_v16  ;;  %v4775_v19 = vmul.f32 0.5, %v4770_v59 }
 0x381   : > { %v4776_v20 = vsub.f32 %v5609_v29, %v4772_v56  ;;  %v4778_v21 = vsub.f32 %v5611_v30, %v4774_v18  ;;  %v4867_v56 = vrot.slane %v4854_v32, %v7042_v52  ;;  %v4845_v18 = vrot.slane %v4828_v10, %v7046_v54  ;;  %p6633_p11 = pnand %p6632_p5, %p7882_p6  ;;  %p6640_p12 = por %p6639_p4, %p6638_p10 }
 0x382   : > { %v4777_v22 = vsub.f32 %v5610_v33, %v4773_v8  ;;  %v7767_v23 = vsub.f32 %v5612_v34, %v4775_v19 }
 0x383   : > { %v4780_v46 = vmul.f32 %v4776_v20, %v4776_v20  ;;  %v4782_v24 = vmul.f32 %v4778_v21, %v4778_v21  ;;  %p6634_p8 = pneg %p6633_p11 }
 0x384   : > { %v4781_v49 = vmul.f32 %v4777_v22, %v4777_v22  ;;  %v4783_v25 = vmul.f32 %v7767_v23, %v7767_v23 }
 0x385   : > { %v4784_v50 = vsel %vm4742_vm4, %v4780_v46, 0.0  ;;  %v4798_v11 = vsel %vm4742_vm4, %v4782_v24, 0.0  ;;  %v4863_v24 = vrot.slane %v4854_v32, %v7039_v51  ;;  %p6641_p3 = pnand %p6640_p12, %p6634_p8 }
 0x386   : > { %v4785_v60 = vrot.slane %v4784_v50, 4  ;;  %v4799_v26 = vrot.slane %v4798_v11, 4  ;;  %v4791_v53 = vsel %vm4742_vm4, %v4781_v49, 0.0  ;;  %v4805_v61 = vsel %vm4742_vm4, %v4783_v25, 0.0 }
 0x387   : > { %v4792_v1 = vrot.slane %v4791_v53, 4  ;;  %v4806_v27 = vrot.slane %v4805_v61, 4 }
 0x388   : > { %v4786_v28 = vadd.f32 %v4785_v60, %v4784_v50  ;;  %v4800_v29 = vadd.f32 %v4799_v26, %v4798_v11 }
 0x389   : > { %v4793_v30 = vadd.f32 %v4792_v1, %v4791_v53  ;;  %v4807_v17 = vadd.f32 %v4806_v27, %v4805_v61 }
 0x38a   : > { %v4787_v31 = vrot.slane %v4786_v28, 2  ;;  %v4801_v33 = vrot.slane %v4800_v29, 2 }
 0x38b   : > { %v4794_v34 = vrot.slane %v4793_v30, 2  ;;  %v4808_v35 = vrot.slane %v4807_v17, 2 }
 0x38c   : > { %v4788_v36 = vadd.f32 %v4787_v31, %v4786_v28  ;;  %v4802_v38 = vadd.f32 %v4801_v33, %v4800_v29 }
 0x38d   : > { %v4795_v39 = vadd.f32 %v4794_v34, %v4793_v30  ;;  %v4809_v41 = vadd.f32 %v4808_v35, %v4807_v17 }
 0x38e   : > { %v4789_v42 = vrot.slane %v4788_v36, 1  ;;  %v4803_v43 = vrot.slane %v4802_v38, 1 }
 0x38f   : > { %v4796_v44 = vrot.slane %v4795_v39, 1  ;;  %v4810_v45 = vrot.slane %v4809_v41, 1 }
 0x390   : > { %v4790_v47 = vadd.f32 %v4789_v42, %v4788_v36  ;;  %v4804_v55 = vadd.f32 %v4803_v43, %v4802_v38 }
 0x391   : > { %v4797_v62 = vadd.f32 %v4796_v44, %v4795_v39  ;;  %v4811_v63 = vadd.f32 %v4810_v45, %v4809_v41 }
 0x392   : > { %v4812_v0 = vmul.f32 0.5, %v4790_v47  ;;  %v4814_v40 = vmul.f32 0.5, %v4804_v55 }
 0x393   : > { %v4813_v4 = vmul.f32 0.5, %v4797_v62  ;;  %v4815_v2 = vmul.f32 0.5, %v4811_v63 }
 0x394   : > { %v4816_v6 = vadd.f32 1e-05, %v4812_v0  ;;  %v4818_v7 = vadd.f32 1e-05, %v4814_v40 }
 0x395   : > { %v4817_v57 = vadd.f32 1e-05, %v4813_v4  ;;  %v4819_v9 = vadd.f32 1e-05, %v4815_v2 }
 0x396   : > { %6502 = vrsqrt.f32 %v4816_v6 }
 0x397   : > { %6504 = vrsqrt.f32 %v4818_v7 }
 0x398   : > { %6506 = vrsqrt.f32 %v4817_v57 }
 0x399   : > { %6508 = vrsqrt.f32 %v4819_v9 }
 0x3a0   : > { %v6503_v3 = vpop.eup %6502 }
 0x3a1   : > { %v6505_v14 = vpop.eup %6504  ;;  %v4824_v5 = vmul.f32 %v6503_v3, %v4776_v20  ;;  %v4871_v20 = vrot.slane %v4854_v32, %v7046_v54 }
 0x3a2   : > { %v6507_v16 = vpop.eup %6506  ;;  %v4826_v59 = vmul.f32 %v6505_v14, %v4778_v21 }
 0x3a3   : > { %v6509_v8 = vpop.eup %6508  ;;  %v4850_v19 = vmul.f32 %v4833_v12, %v4824_v5  ;;  %v4825_v46 = vmul.f32 %v6507_v16, %v4777_v22 }
 0x3a4   : > { %v4852_v49 = vmul.f32 %v4841_v13, %v4826_v59  ;;  %v4827_v25 = vmul.f32 %v6509_v8, %v7767_v23 }
 0x3a5   : > { %v4876_v48 = vadd.f32 %v4859_v15, %v4850_v19  ;;  %v4851_v50 = vmul.f32 %v4837_v37, %v4825_v46 }
 0x3a6   : > { %v4878_v11 = vadd.f32 %v4867_v56, %v4852_v49  ;;  %v4853_v60 = vmul.f32 %v4845_v18, %v4827_v25 }
 0x3a7   : > { %vm4880_vm5 = vcmp.gt.f32.partialorder %v4876_v48, 0.0  ;;  %v4884_v21 = vmul.f32 0.2, %v4876_v48  ;;  %v4877_v52 = vadd.f32 %v4863_v24, %v4851_v50 }
 0x3a8   : > { %vm4882_vm6 = vcmp.gt.f32.partialorder %v4878_v11, 0.0  ;;  %v4886_v26 = vmul.f32 0.2, %v4878_v11  ;;  %v4879_v53 = vadd.f32 %v4871_v20, %v4853_v60 }
 0x3a9   : > { %v4888_v22 = vsel %vm4880_vm5, %v4876_v48, %v4884_v21  ;;  %vm4881_vm7 = vcmp.gt.f32.partialorder %v4877_v52, 0.0  ;;  %v4885_v51 = vmul.f32 0.2, %v4877_v52 }
 0x3aa   : > { %v4890_v61 = vsel %vm4882_vm6, %v4878_v11, %v4886_v26  ;;  %vm4883_vm8 = vcmp.gt.f32.partialorder %v4879_v53, 0.0  ;;  %v4887_v23 = vmul.f32 0.2, %v4879_v53 }
 0x3ab   : > { %v4889_v54 = vsel %vm4881_vm7, %v4877_v52, %v4885_v51 }
 0x3ac   : > { %v4896_v1 = vcombine.low %v4888_v22, %v4889_v54  ;;  %v4891_v27 = vsel %vm4883_vm8, %v4879_v53, %v4887_v23 }
 0x3ad   : > { %v4897_v28 = vcombine.low %v4890_v61, %v4891_v27 }
 0x3ae   : > { %v4904_v29 = vrot.slane %v4896_v1, %v7056_v58 }
 0x3af   : > { %v4911_v30 = vrot.slane %v4897_v28, %v7056_v58 }
 0x3b1   : > { %v4912_v17 = vcombine.low %v4904_v29, %v4911_v30 }
 0x3b3   : > { %4914 = vst [vmem:[%s434_s23] sm:$0xff] %v4912_v17 }
 0x3b4   : > { %6644 = shalt.err (!%p6641_p3)
}
 0x3b5   : > { %s6645_s14 = scalar_lea.hbm %s7795_s21, 128  ;;  %s6649_s17 = scalar_lea.hbm %s7881_s18, 256 }
 0x3b6   : > { %p6646_p13 = scmp.ne.s32.totalorder %s7795_s21, %s6645_s14  ;;  %p6650_p9 = scmp.lt.u32.totalorder %s7795_s21, %s7881_s18 }
 0x3b7   : > { %p6651_p7 = scmp.lt.u32.totalorder %s6649_s17, %s6645_s14  ;;  %p6653_p5 = scmp.lt.u32.totalorder %s6645_s14, %s7795_s21 }
 0x3b8   : > { %p6647_p1 = pnand %p6646_p13, %p7882_p6 }
 0x3b9   : > { %p6652_p2 = por %p6651_p7, %p6650_p9 }
 0x3ba   : > { %p6648_p0 = pneg %p6647_p1 }
 0x3bb   : > { %p6654_p11 = por %p6653_p5, %p6652_p2 }
 0x3bd   : > { %p6655_p8 = pnand %p6654_p11, %p6648_p0 }
 0x3bf   : > { %6658 = shalt.err (!%p6655_p8)
}
 0x3c0   : > { %5677 = dma.vmem_to_hbm [thread:$0]  (%p7882_p6), %s7797_s30, 128, %s7795_s21, %s4916_s10  }
 0x3c1 PF: > { %s7883_s25 = sld [smem:[#allocation15_spill]]  ;;  %s7884_s12 = sld [smem:[#allocation20_spill]] }
 0x3c2   : > { %s7885_s11 = sld [smem:[#allocation17_spill]] }
 0x3c7   : > { %s4942_s29 = sand.u32 1, %s7883_s25   ;;  %p7886_p10 = scmp.ne.s32.totalorder %s7884_s12, 0 }
 0x3c8   : > { %p7887_p4 = scmp.ge.s32.totalorder %s7885_s11, 2  ;;  %s4943_s4 = scalar_lea.sflag [#allocation4], %s4942_s29 }
 0x3ca   : > { %p5693_p12 = pnand %p7887_p4, %p7886_p10 }
 0x3cc   : > { %6688 = dma.done.wait (!%p5693_p12), %s4943_s4, 128  }
 0x3cd   : > { %6690 = vsyncadd (!%p5693_p12), %s4943_s4, 4294967168  ;;  %s7888_s30 = sld [smem:[#allocation18_spill]]  ;;  %s7889_s26 = sld [smem:[#allocation16_spill]] }
 0x3ce   : > { %s7890_s29 = sld [smem:[#allocation19_spill]]  ;;  %s7891_s27 = smov %s6697_s28 }
 0x3d3   : > { %p27_p3 = scmp.ge.s32.totalorder %s7888_s30, 4   ;;  %s7892_s28 = smov %s7889_s26 }
 0x3d5   :  { %29 = sbr.rel (!%p27_p3) target bundleno = 13 (0xd), region = 134 }
 0x3dc   :  { %4948 = vsyncpa [#allocation3], 1 }
 0x3dd   :  { %4950 = vsyncpa [#allocation3 + $0x1], 1 }
 0x3de   :  { %4951 = vsyncpa [#allocation6], 1 }
 0x3df   :  { %4953 = vsyncpa [#allocation6 + $0x1], 1 }
 0x3e0   :  { %4954 = vsyncpa [#allocation9], 1 }
 0x3e1   :  { %4956 = vsyncpa [#allocation9 + $0x1], 1 }
 0x3e2   :  { %4957 = vsyncpa [#allocation4], 1 }
 0x3e3   :  { %4959 = vsyncpa [#allocation4 + $0x1], 1 }

</bundles_post_ra>
